<compile_context>
chip_gen: v6e
topology: v6e:2x2x1
jax: 0.10.0
libtpu: 0.0.40
codegen_flags: <defaults>
</compile_context>

<pallas_src>
import functools

import jax
import jax.numpy as jnp
import numpy as np
from jax.experimental import pallas as pl
from jax.experimental.pallas import tpu as pltpu

_LANE = 128


def _round_up(x, m):
    return ((x + m - 1) // m) * m


# =============================================================================
# Fused Pallas kernel
# =============================================================================
def _textcnn_fused_kernel(emb_ref, wpack_ref, bconv_ref, wlin_ref, blin_ref,
                          out_ref, *, seg_offsets, n_pos_list, filter_dim):
    """Fused TextCNN: conv (all filter sizes) + max-pool + bias/ReLU + Linear.

    emb_ref   : [rows, T*E]      bf16 flattened embedded tokens
    wpack_ref : [T*E, c_pad]     bf16 block-banded packing of every conv column
    bconv_ref : [1, c_pad]       f32 conv biases scattered to the head lanes
    wlin_ref  : [c_pad, out_pad] bf16 linear weight, rows only at head lanes
    blin_ref  : [1, out_pad]     f32 linear bias (zero-padded)
    out_ref   : [rows, out_pad]  f32 lane-dense output
    """
    c_pad = wpack_ref.shape[1]

    # Every (filter size, time position, channel) conv output in ONE MXU matmul.
    s = jnp.dot(emb_ref[...], wpack_ref[...],
                preferred_element_type=jnp.float32)              # [rows, c_pad]

    # Segmented max-pool over time positions via XLU lane rolls at stride
    # filter_dim.  After k roll+max steps, lane p holds max(s[p + filter_dim*j],
    # j=0..k); a filter with n_pos positions is complete (and uncontaminated,
    # since its coverage never leaves its own segment) at k = n_pos - 1, so we
    # snapshot the accumulator there.
    max_k = max(n_pos_list) - 1
    needed = {n_pos - 1 for n_pos in n_pos_list}
    snaps = {}
    acc = s
    rolled = s
    if 0 in needed:
        snaps[0] = acc
    for k in range(1, max_k + 1):
        rolled = pltpu.roll(rolled, shift=c_pad - filter_dim, axis=1)
        acc = jnp.maximum(acc, rolled)
        if k in needed:
            snaps[k] = acc

    # Merge the per-filter snapshots by (static) lane range.  Pooled features
    # stay at their original head lanes; all other lanes are garbage and hit
    # zero rows of wlin_ref below.
    lane = jax.lax.broadcasted_iota(jnp.int32, s.shape, 1)
    pooled = snaps[n_pos_list[-1] - 1]
    for i in range(len(n_pos_list) - 2, -1, -1):
        boundary = seg_offsets[i + 1]
        pooled = jnp.where(lane < boundary, snaps[n_pos_list[i] - 1], pooled)

    # Conv bias + ReLU hoisted past the max (bias constant over t, ReLU monotone).
    feat = jnp.maximum(pooled + bconv_ref[...], 0.0)

    # Final Linear: compaction of the 12 head lanes is folded into the expanded
    # (zero-row-padded) weight; 128-lane output -> unmasked vector stores.
    out_ref[...] = (jnp.dot(feat.astype(wlin_ref.dtype), wlin_ref[...],
                            preferred_element_type=jnp.float32)
                    + blin_ref[...])


# =============================================================================
# Parameter packing (conv stack -> one lane-dense matmul operand + expanded lin)
# =============================================================================
def _pack_params(params, filter_size, st_length, embed_dim, filter_dim,
                 output_size):
    te = st_length * embed_dim
    blocks, seg_offsets, n_pos_list = [], [], []
    off = 0
    for h, (wc, _) in zip(filter_size, params["convs"]):
        n_pos = st_length - h + 1
        seg_offsets.append(off)
        n_pos_list.append(n_pos)
        for t in range(n_pos):
            top = t * embed_dim
            bot = te - (t + h) * embed_dim
            blocks.append(jnp.pad(wc, ((top, bot), (0, 0))))     # [T*E, F]
        off += n_pos * filter_dim
    w_pack = jnp.concatenate(blocks, axis=1)                     # [T*E, C]
    c = w_pack.shape[1]
    c_pad = _round_up(c, _LANE)
    w_pack = jnp.pad(w_pack, ((0, 0), (0, c_pad - c))).astype(jnp.bfloat16)

    out_pad = _round_up(output_size, _LANE)
    b_exp = jnp.zeros((1, c_pad), jnp.float32)
    wlin_exp = jnp.zeros((c_pad, out_pad), jnp.float32)
    for i, (_, bc) in enumerate(params["convs"]):
        head = seg_offsets[i]
        b_exp = b_exp.at[:, head:head + filter_dim].set(bc)
        wlin_exp = wlin_exp.at[head:head + filter_dim, :output_size].set(
            params["lin_w"][i * filter_dim:(i + 1) * filter_dim, :])
    wlin_exp = wlin_exp.astype(jnp.bfloat16)
    blin_exp = jnp.zeros((1, out_pad), jnp.float32).at[:, :output_size].set(
        params["lin_b"])
    return (w_pack, b_exp, wlin_exp, blin_exp,
            tuple(seg_offsets), tuple(n_pos_list), c_pad, out_pad)


# =============================================================================
# Forward pass wrapper
# =============================================================================
def textcnn_forward(params, tokens, *, filter_size, st_length, row_block=256):
    embed_dim = params["embed"].shape[1]
    filter_dim = params["convs"][0][0].shape[1]
    output_size = params["lin_w"].shape[1]
    n = tokens.shape[0]
    te = st_length * embed_dim

    # Embedding gather (XLA glue) in bf16: halves the HBM round-trip bytes on
    # the only N-scaled stream feeding the kernel.
    emb = jnp.take(params["embed"].astype(jnp.bfloat16), tokens,
                   axis=0).reshape(n, te)

    (w_pack, b_exp, wlin_exp, blin_exp,
     seg_offsets, n_pos_list, c_pad, out_pad) = _pack_params(
        params, filter_size, st_length, embed_dim, filter_dim, output_size)

    # Row tile: large (default 256) for MXU/DMA efficiency, clamped for tiny
    # batches, always a multiple of 8 sublanes.
    rb = _round_up(min(row_block, _round_up(n, 8)), 8)
    n_pad = _round_up(n, rb)
    if n_pad != n:
        emb = jnp.pad(emb, ((0, n_pad - n), (0, 0)))

    out = pl.pallas_call(
        functools.partial(_textcnn_fused_kernel, seg_offsets=seg_offsets,
                          n_pos_list=n_pos_list, filter_dim=filter_dim),
        out_shape=jax.ShapeDtypeStruct((n_pad, out_pad), jnp.float32),
        grid_spec=pltpu.PrefetchScalarGridSpec(
            num_scalar_prefetch=0,
            grid=(n_pad // rb,),
            in_specs=[
                pl.BlockSpec((rb, te), lambda i: (i, 0)),
                pl.BlockSpec((te, c_pad), lambda i: (0, 0)),
                pl.BlockSpec((1, c_pad), lambda i: (0, 0)),
                pl.BlockSpec((c_pad, out_pad), lambda i: (0, 0)),
                pl.BlockSpec((1, out_pad), lambda i: (0, 0)),
            ],
            out_specs=pl.BlockSpec((rb, out_pad), lambda i: (i, 0)),
        ),
        compiler_params=pltpu.CompilerParams(
            dimension_semantics=("parallel",)),
    )(emb, w_pack, b_exp, wlin_exp, blin_exp)
    return out[:n, :output_size]


# =============================================================================
# Pure-JAX reference (mirrors the torch forward op-for-op) for validation
# =============================================================================
def _reference_forward(params, tokens, *, filter_size, st_length):
    HI = jax.lax.Precision.HIGHEST
    n = tokens.shape[0]
    emb = jnp.take(params["embed"], tokens, axis=0)              # [N, T, E]
    feats = []
    for h, (wc, bc) in zip(filter_size, params["convs"]):
        n_pos = st_length - h + 1
        windows = jnp.stack(
            [emb[:, t:t + h, :].reshape(n, -1) for t in range(n_pos)], axis=0)
        s = jnp.einsum("tnk,kf->tnf", windows, wc, precision=HI) + bc
        s = jnp.maximum(s, 0.0)
        feats.append(jnp.max(s, axis=0))
    feat = jnp.concatenate(feats, axis=1)
    return jnp.dot(feat, params["lin_w"], precision=HI) + params["lin_b"]


# =============================================================================
# Deterministic parameter init (shapes follow the module __init__)
# =============================================================================
def init_params(key, *, embed_num, embed_dim, filter_dim, filter_size,
                output_size):
    ks = jax.random.split(key, 3 + 2 * len(filter_size))

    def xavier(k, shape):
        limit = float(np.sqrt(6.0 / (shape[0] + shape[1])))
        return jax.random.uniform(k, shape, jnp.float32, -limit, limit)

    params = {}
    params["embed"] = jax.random.normal(ks[0], (embed_num, embed_dim),
                                        jnp.float32)
    convs = []
    for i, h in enumerate(filter_size):
        wk, bk = ks[1 + 2 * i], ks[2 + 2 * i]
        convs.append((xavier(wk, (h * embed_dim, filter_dim)),
                      0.01 * jax.random.normal(bk, (1, filter_dim),
                                               jnp.float32)))
    params["convs"] = convs
    lin_in = len(filter_size) * filter_dim
    params["lin_w"] = xavier(ks[1 + 2 * len(filter_size)],
                             (lin_in, output_size))
    params["lin_b"] = 0.01 * jax.random.normal(
        ks[2 + 2 * len(filter_size)], (1, output_size), jnp.float32)
    return params


if __name__ == "__main__":
    # Module hyper-parameters (small, consistent with the PyTorch __init__).
    embed_num = 50
    embed_dim = 16
    filter_dim = 4
    filter_size = (2, 3, 4)
    output_size = 10
    st_length = 12
    batch = 300          # non-multiple of the row block: exercises padding + 2 grid steps

    root = jax.random.PRNGKey(0)
    pkey, dkey = jax.random.split(root)
    params = init_params(pkey, embed_num=embed_num, embed_dim=embed_dim,
                         filter_dim=filter_dim, filter_size=filter_size,
                         output_size=output_size)
    tokens = jax.random.randint(dkey, (batch, st_length), 0, embed_num,
                                dtype=jnp.int32)

    out = textcnn_forward(params, tokens,
                          filter_size=filter_size, st_length=st_length,
                          row_block=256)
    jax.block_until_ready(out)

    ref = _reference_forward(params, tokens,
                             filter_size=filter_size, st_length=st_length)
    np.testing.assert_allclose(np.asarray(out), np.asarray(ref),
                               rtol=5e-2, atol=5e-2)
    print("KERNEL_OK")
</pallas_src>

<mosaic_0001>
module attributes {stable_mosaic.version = 11 : i64} {
  func.func @_textcnn_fused_kernel(%arg0: i32, %arg1: memref<256x192xbf16, #tpu.memory_space<vmem>>, %arg2: memref<192x128xbf16, #tpu.memory_space<vmem>>, %arg3: memref<1x128xf32, #tpu.memory_space<vmem>>, %arg4: memref<128x128xbf16, #tpu.memory_space<vmem>>, %arg5: memref<1x128xf32, #tpu.memory_space<vmem>>, %arg6: memref<256x128xf32, #tpu.memory_space<vmem>>) attributes {dimension_semantics = [#tpu.dimension_semantics<parallel>], iteration_bounds = array<i64: 2>, scalar_prefetch = 0 : i64, scratch_operands = 0 : i64, tpu.core_type = #tpu.core_type<tc>, window_params = [{transform_indices = @transform_0, window_bounds = array<i64: 256, 192>}, {pipeline_mode = #tpu.pipeline_mode<synchronous>, transform_indices = @transform_1, window_bounds = array<i64: 192, 128>}, {pipeline_mode = #tpu.pipeline_mode<synchronous>, transform_indices = @transform_2, window_bounds = array<i64: 1, 128>}, {pipeline_mode = #tpu.pipeline_mode<synchronous>, transform_indices = @transform_3, window_bounds = array<i64: 128, 128>}, {pipeline_mode = #tpu.pipeline_mode<synchronous>, transform_indices = @transform_4, window_bounds = array<i64: 1, 128>}, {transform_indices = @transform_5, window_bounds = array<i64: 256, 128>}]} {
    %c0 = arith.constant 0 : index
    %c0_0 = arith.constant 0 : index
    %0 = vector.load %arg1[%c0, %c0_0] : memref<256x192xbf16, #tpu.memory_space<vmem>>, vector<256x192xbf16>
    %c0_1 = arith.constant 0 : index
    %c0_2 = arith.constant 0 : index
    %1 = vector.load %arg2[%c0_1, %c0_2] : memref<192x128xbf16, #tpu.memory_space<vmem>>, vector<192x128xbf16>
    %cst = arith.constant dense<0.000000e+00> : vector<256x128xf32>
    %2 = tpu.matmul %0, %1, %cst {dimension_numbers = #tpu.dot_dimension_numbers<[1], [0], [0], [1], [0, 0, 1, 1], [], []>} : vector<256x192xbf16>, vector<192x128xbf16>, vector<256x128xf32> -> vector<256x128xf32>
    %c124_i32 = arith.constant 124 : i32
    %3 = tpu.dynamic_rotate %2 by %c124_i32 dim 1 : vector<256x128xf32>, i32 -> vector<256x128xf32>
    %4 = arith.maximumf %2, %3 : vector<256x128xf32>
    %c124_i32_3 = arith.constant 124 : i32
    %5 = tpu.dynamic_rotate %3 by %c124_i32_3 dim 1 : vector<256x128xf32>, i32 -> vector<256x128xf32>
    %6 = arith.maximumf %4, %5 : vector<256x128xf32>
    %c124_i32_4 = arith.constant 124 : i32
    %7 = tpu.dynamic_rotate %5 by %c124_i32_4 dim 1 : vector<256x128xf32>, i32 -> vector<256x128xf32>
    %8 = arith.maximumf %6, %7 : vector<256x128xf32>
    %c124_i32_5 = arith.constant 124 : i32
    %9 = tpu.dynamic_rotate %7 by %c124_i32_5 dim 1 : vector<256x128xf32>, i32 -> vector<256x128xf32>
    %10 = arith.maximumf %8, %9 : vector<256x128xf32>
    %c124_i32_6 = arith.constant 124 : i32
    %11 = tpu.dynamic_rotate %9 by %c124_i32_6 dim 1 : vector<256x128xf32>, i32 -> vector<256x128xf32>
    %12 = arith.maximumf %10, %11 : vector<256x128xf32>
    %c124_i32_7 = arith.constant 124 : i32
    %13 = tpu.dynamic_rotate %11 by %c124_i32_7 dim 1 : vector<256x128xf32>, i32 -> vector<256x128xf32>
    %14 = arith.maximumf %12, %13 : vector<256x128xf32>
    %c124_i32_8 = arith.constant 124 : i32
    %15 = tpu.dynamic_rotate %13 by %c124_i32_8 dim 1 : vector<256x128xf32>, i32 -> vector<256x128xf32>
    %16 = arith.maximumf %14, %15 : vector<256x128xf32>
    %c124_i32_9 = arith.constant 124 : i32
    %17 = tpu.dynamic_rotate %15 by %c124_i32_9 dim 1 : vector<256x128xf32>, i32 -> vector<256x128xf32>
    %18 = arith.maximumf %16, %17 : vector<256x128xf32>
    %c124_i32_10 = arith.constant 124 : i32
    %19 = tpu.dynamic_rotate %17 by %c124_i32_10 dim 1 : vector<256x128xf32>, i32 -> vector<256x128xf32>
    %20 = arith.maximumf %18, %19 : vector<256x128xf32>
    %c124_i32_11 = arith.constant 124 : i32
    %21 = tpu.dynamic_rotate %19 by %c124_i32_11 dim 1 : vector<256x128xf32>, i32 -> vector<256x128xf32>
    %22 = arith.maximumf %20, %21 : vector<256x128xf32>
    %23 = tpu.iota {dimensions = array<i32: 1>} : vector<256x128xi32>
    %c84_i32 = arith.constant 84 : i32
    %24 = vector.broadcast %c84_i32 : i32 to vector<256x128xi32>
    %25 = arith.cmpi slt, %23, %24 : vector<256x128xi32>
    %26 = arith.select %25, %20, %18 : vector<256x128xi1>, vector<256x128xf32>
    %c44_i32 = arith.constant 44 : i32
    %27 = vector.broadcast %c44_i32 : i32 to vector<256x128xi32>
    %28 = arith.cmpi slt, %23, %27 : vector<256x128xi32>
    %29 = arith.select %28, %22, %26 : vector<256x128xi1>, vector<256x128xf32>
    %c0_12 = arith.constant 0 : index
    %c0_13 = arith.constant 0 : index
    %30 = vector.load %arg3[%c0_12, %c0_13] : memref<1x128xf32, #tpu.memory_space<vmem>>, vector<1x128xf32>
    %31 = vector.broadcast %30 : vector<1x128xf32> to vector<256x128xf32>
    %32 = arith.addf %29, %31 : vector<256x128xf32>
    %cst_14 = arith.constant 0.000000e+00 : f32
    %33 = vector.broadcast %cst_14 : f32 to vector<256x128xf32>
    %34 = arith.maximumf %32, %33 : vector<256x128xf32>
    %35 = arith.truncf %34 : vector<256x128xf32> to vector<256x128xbf16>
    %c0_15 = arith.constant 0 : index
    %c0_16 = arith.constant 0 : index
    %36 = vector.load %arg4[%c0_15, %c0_16] : memref<128x128xbf16, #tpu.memory_space<vmem>>, vector<128x128xbf16>
    %cst_17 = arith.constant dense<0.000000e+00> : vector<256x128xf32>
    %37 = tpu.matmul %35, %36, %cst_17 {dimension_numbers = #tpu.dot_dimension_numbers<[1], [0], [0], [1], [0, 0, 1, 1], [], []>} : vector<256x128xbf16>, vector<128x128xbf16>, vector<256x128xf32> -> vector<256x128xf32>
    %c0_18 = arith.constant 0 : index
    %c0_19 = arith.constant 0 : index
    %38 = vector.load %arg5[%c0_18, %c0_19] : memref<1x128xf32, #tpu.memory_space<vmem>>, vector<1x128xf32>
    %39 = vector.broadcast %38 : vector<1x128xf32> to vector<256x128xf32>
    %40 = arith.addf %37, %39 : vector<256x128xf32>
    %c0_20 = arith.constant 0 : index
    %c0_21 = arith.constant 0 : index
    %41 = vector.load %arg6[%c0_20, %c0_21] : memref<256x128xf32, #tpu.memory_space<vmem>>, vector<256x128xf32>
    tpu.vector_store %arg6[%c0_20, %c0_21], %40 {strides = array<i32>} : memref<256x128xf32, #tpu.memory_space<vmem>>, vector<256x128xf32>,
    return
  }
  func.func @transform_0(%arg0: i32) -> (i32, i32) {
    %c0_i32 = arith.constant 0 : i32
    %c0_i32_0 = arith.constant 0 : i32
    return %arg0, %c0_i32 : i32, i32
  }
  func.func @transform_1(%arg0: i32) -> (i32, i32) {
    %c0_i32 = arith.constant 0 : i32
    %c0_i32_0 = arith.constant 0 : i32
    %c0_i32_1 = arith.constant 0 : i32
    return %c0_i32, %c0_i32_0 : i32, i32
  }
  func.func @transform_2(%arg0: i32) -> (i32, i32) {
    %c0_i32 = arith.constant 0 : i32
    %c0_i32_0 = arith.constant 0 : i32
    %c0_i32_1 = arith.constant 0 : i32
    return %c0_i32, %c0_i32_0 : i32, i32
  }
  func.func @transform_3(%arg0: i32) -> (i32, i32) {
    %c0_i32 = arith.constant 0 : i32
    %c0_i32_0 = arith.constant 0 : i32
    %c0_i32_1 = arith.constant 0 : i32
    return %c0_i32, %c0_i32_0 : i32, i32
  }
  func.func @transform_4(%arg0: i32) -> (i32, i32) {
    %c0_i32 = arith.constant 0 : i32
    %c0_i32_0 = arith.constant 0 : i32
    %c0_i32_1 = arith.constant 0 : i32
    return %c0_i32, %c0_i32_0 : i32, i32
  }
  func.func @transform_5(%arg0: i32) -> (i32, i32) {
    %c0_i32 = arith.constant 0 : i32
    %c0_i32_0 = arith.constant 0 : i32
    return %arg0, %c0_i32 : i32, i32
  }
}

</mosaic_0001>

<bundles_post_ra>
// kernel: tpu_custom_call.1
= control target key start
LH: loop header
LB: loop body
LE: loop exit
PB: predicated region body
PF: predicated region fallthrough
CT: control target
= control target key end

     0   :  { %10 = vsyncpa [#allocation3], 0  ;;  %s4714_s0 = inlined_call_operand.vmem [shape: bf16[512,192], index: 0, kind: input, shape index: {}]   ;;  %s4715_s1 = inlined_call_operand.vmem [shape: bf16[192,128], index: 1, kind: input, shape index: {}]   ;;  %s4716_s2 = inlined_call_operand.vmem [shape: f32[1,128], index: 2, kind: input, shape index: {}]   ;;  %s4717_s3 = inlined_call_operand.vmem [shape: bf16[128,128], index: 3, kind: input, shape index: {}]   ;;  %s4718_s4 = inlined_call_operand.vmem [shape: f32[1,128], index: 4, kind: input, shape index: {}]   ;;  %s4719_s5 = inlined_call_operand.hbm [shape: f32[512,128], index: 5, kind: output, shape index: {}]  }
   0x1   :  { %12 = vsyncpa [#allocation3 + $0x1], 0  ;;  %s2556_s18 = smov 0   ;;  %s2558_s19 = smov 0  }
   0x2   :  { %s2560_s20 = smov 0   ;;  %s2562_s21 = smov 0  }
   0x3 LB: > { %s2577_s22 = sadd.s32 4294967295, %s2519_s21   ;;  %s2167_s23 = sadd.s32 4294967294, %s2519_s21   ;;  %s2519_s21 = sphi %s2562_s21, %s5431_s21   ;;  %s2515_s20 = sphi %s2560_s20, %s5430_s20   ;;  %s2511_s19 = sphi %s2558_s19, %s5429_s19   ;;  %s2507_s18 = sphi %s2556_s18, %s5428_s18  }
   0x4   : > { %s2581_s24 = sadd.s32 1, %s2519_s21   ;;  %s135_s25 = sadd.s32 1, %s2515_s20 }
   0x5   : > { %s132_s26 = ssub.s32 %s2519_s21, %s2581_s24  ;;  %p145_p0 = scmp.ne.s32.totalorder %s2515_s20, %s2511_s19 }
   0x6   : > { %p133_p1 = scmp.eq.s32.totalorder %s132_s26, 0  ;;  %p146_p2 = scmp.eq.s32.totalorder %s2577_s22, 1 }
   0x7   : > { %p151_p3 = scmp.ne.s32.totalorder %s2511_s19, %s2507_s18  ;;  %p152_p4 = scmp.eq.s32.totalorder %s2167_s23, 1 }
   0x8   : > { %s2592_s27 = scalar_select %p133_p1, %s2515_s20, %s135_s25  }
   0x9   : > { %p2594_p5 = por %p146_p2, %p145_p0  ;;  %p2598_p6 = por %p152_p4, %p151_p3 }
   0xa   : > { %p2170_p7 = scmp.ge.s32.totalorder %s2519_s21, 1  ;;  %p192_p8 = scmp.lt.s32.totalorder %s2519_s21, 3 }
   0xc   : > { %p193_p9 = pnand %p2170_p7, %p192_p8 }
   0xe   : > { %196 = sbr.rel (%p193_p9) target bundleno = 1743 (0x6cf), region = 40 }
  0x13   : > { %v2391_v0 = vld [vmem:[%s4715_s1 + $0x38] sm:$0xff]   ;;  %v2521_v1 = vmov 0   ;;  %s2172_s7 = sshll.u32 %s2577_s22, 5  ;;  %v2392_v2 = vld [vmem:[%s4715_s1 + $0x30] sm:$0xff]   ;;  %v2393_v3 = vld [vmem:[%s4715_s1 + $0x28] sm:$0xff]   ;;  %vm502_vm0 = vcmask 523264  }
  0x14   : > { %551 = vmatprep.subr.bf16.mxu0 %v2521_v1  ;;  %2324 = vmatprep.subr.bf16.mxu1 %v2521_v1  ;;  %p222_p10 = scmp.lt.s32.totalorder %s2172_s7, 63  ;;  %v2394_v4 = vld [vmem:[%s4715_s1 + $0x20] sm:$0xff]   ;;  %v2395_v6 = vld [vmem:[%s4715_s1 + $0x18] sm:$0xff]   ;;  %v2396_v8 = vld [vmem:[%s4715_s1 + $0x10] sm:$0xff]   ;;  %s2522_s25 = smov 124  }
  0x15   : > { %552 = vmatpush1.bf16.msra.mxu0 %v2391_v0  ;;  %2336 = vmatpush1.bf16.msra.mxu1 %v2391_v0  ;;  %v2397_v9 = vld [vmem:[%s4715_s1 + $0x8] sm:$0xff]   ;;  %v2398_v10 = vld [vmem:[%s4715_s1] sm:$0xff]   ;;  %v2399_v11 = vld [vmem:[%s4715_s1 + $0x58] sm:$0xff]   ;;  %s2251_s10 = sshll.u32 %s2577_s22, 12  ;;  %s2523_s16 = smov [#allocation2]  }
  0x16   : > { %553 = vmatprep.subr.bf16.mxu0 %v2521_v1  ;;  %2325 = vmatprep.subr.bf16.mxu1 %v2521_v1  ;;  %s5433_s7 = smov (!%p222_p10, %s2172_s7), 63  ;;  %v2400_v12 = vld [vmem:[%s4715_s1 + $0x50] sm:$0xff]   ;;  %v2401_v13 = vld [vmem:[%s4715_s1 + $0x48] sm:$0xff]   ;;  %v2402_v14 = vld [vmem:[%s4715_s1 + $0x40] sm:$0xff]   ;;  %s4665_s14 = scalar_lea.hbm %s4719_s5, %s2251_s10 }
  0x17   : > { %s2250_s12 = sshll.u32 %s5433_s7, 3  ;;  %s2463_s23 = sshll.u32 %s2523_s16, 4  ;;  %s2464_s23 = int_to_ptr.vmem [resolvable:$false] %s2463_s23 }
  0x18   : > { %s2626_s17 = scalar_lea.vmem %s4714_s0, %s2250_s12 }
  0x19   : > { %554 = vmatpush1.bf16.msra.mxu0 %v2392_v2  ;;  %2337 = vmatpush1.bf16.msra.mxu1 %v2392_v2  ;;  %v2405_v5 = vld [vmem:[%s2626_s17 + $0x4] ss:$8 sps:$4 sm:$0xff]   ;;  %v2403_v15 = vld [vmem:[%s2626_s17] ss:$8 sps:$4 sm:$0xff]   ;;  %v2409_v17 = vld [vmem:[%s2626_s17 + $0x14] ss:$8 sps:$4 sm:$0xff]  }
  0x1a   : > { %555 = vmatprep.subr.bf16.mxu0 %v2521_v1  ;;  %2326 = vmatprep.subr.bf16.mxu1 %v2521_v1  ;;  %v2408_v7 = vld [vmem:[%s2626_s17 + $0xc4] ss:$8 sps:$4 sm:$0xff]   ;;  %v2406_v16 = vld [vmem:[%s2626_s17 + $0xc0] ss:$8 sps:$4 sm:$0xff]   ;;  %v2412_v18 = vld [vmem:[%s2626_s17 + $0xd4] ss:$8 sps:$4 sm:$0xff]  }
  0x1b   : > { %2219 = vmatprep.mubr.msk.bf16.mxu0 %vm502_vm0, %v2405_v5  ;;  %2231 = vmatprep.mubr.msk.bf16.mxu1 %vm502_vm0, %v2408_v7  ;;  %v2411_v19 = vld [vmem:[%s2626_s17 + $0x10] ss:$8 sps:$4 sm:$0xff]   ;;  %v2415_v21 = vld [vmem:[%s2626_s17 + $0x24] ss:$8 sps:$4 sm:$0xff]   ;;  %v2417_v23 = vld [vmem:[%s2626_s17 + $0x20] ss:$8 sps:$4 sm:$0xff]  }
  0x1c   : > { %v2414_v20 = vld [vmem:[%s2626_s17 + $0xd0] ss:$8 sps:$4 sm:$0xff]   ;;  %v2418_v22 = vld [vmem:[%s2626_s17 + $0xe4] ss:$8 sps:$4 sm:$0xff]   ;;  %v2420_v24 = vld [vmem:[%s2626_s17 + $0xe0] ss:$8 sps:$4 sm:$0xff]  }
  0x1d   : > { %556 = vmatpush1.bf16.msra.mxu0 %v2393_v3  ;;  %2338 = vmatpush1.bf16.msra.mxu1 %v2393_v3  ;;  %v2421_v25 = vld [vmem:[%s2626_s17 + $0x34] ss:$8 sps:$4 sm:$0xff]   ;;  %v2423_v27 = vld [vmem:[%s2626_s17 + $0x30] ss:$8 sps:$4 sm:$0xff]   ;;  %v2427_v29 = vld [vmem:[%s2626_s17 + $0x44] ss:$8 sps:$4 sm:$0xff]  }
  0x1e   : > { %557 = vmatprep.subr.bf16.mxu0 %v2521_v1  ;;  %2327 = vmatprep.subr.bf16.mxu1 %v2521_v1  ;;  %v2424_v26 = vld [vmem:[%s2626_s17 + $0xf4] ss:$8 sps:$4 sm:$0xff]   ;;  %v2426_v28 = vld [vmem:[%s2626_s17 + $0xf0] ss:$8 sps:$4 sm:$0xff]   ;;  %v2429_v30 = vld [vmem:[%s2626_s17 + $0x40] ss:$8 sps:$4 sm:$0xff]  }
  0x1f   : > { %v2430_v31 = vld [vmem:[%s2626_s17 + $0x54] ss:$8 sps:$4 sm:$0xff]   ;;  %v2432_v32 = vld [vmem:[%s2626_s17 + $0x50] ss:$8 sps:$4 sm:$0xff]   ;;  %v2433_v33 = vld [vmem:[%s2626_s17 + $0x64] ss:$8 sps:$4 sm:$0xff]  }
  0x20   : > { %v2435_v34 = vld [vmem:[%s2626_s17 + $0x60] ss:$8 sps:$4 sm:$0xff]   ;;  %v2436_v35 = vld [vmem:[%s2626_s17 + $0x74] ss:$8 sps:$4 sm:$0xff]   ;;  %v2438_v36 = vld [vmem:[%s2626_s17 + $0x70] ss:$8 sps:$4 sm:$0xff]  }
  0x21   : > { %558 = vmatpush1.bf16.msra.mxu0 %v2394_v4  ;;  %2339 = vmatpush1.bf16.msra.mxu1 %v2394_v4  ;;  %v2439_v37 = vld [vmem:[%s2626_s17 + $0x84] ss:$8 sps:$4 sm:$0xff]   ;;  %v2441_v38 = vld [vmem:[%s2626_s17 + $0x80] ss:$8 sps:$4 sm:$0xff]   ;;  %v2442_v39 = vld [vmem:[%s2626_s17 + $0x94] ss:$8 sps:$4 sm:$0xff]  }
  0x22   : > { %559 = vmatprep.subr.bf16.mxu0 %v2521_v1  ;;  %2328 = vmatprep.subr.bf16.mxu1 %v2521_v1  ;;  %v2444_v40 = vld [vmem:[%s2626_s17 + $0x90] ss:$8 sps:$4 sm:$0xff]   ;;  %v2445_v41 = vld [vmem:[%s2626_s17 + $0xa4] ss:$8 sps:$4 sm:$0xff]   ;;  %v2447_v42 = vld [vmem:[%s2626_s17 + $0xa0] ss:$8 sps:$4 sm:$0xff]  }
  0x23   : > { %v2448_v43 = vld [vmem:[%s2626_s17 + $0xb4] ss:$8 sps:$4 sm:$0xff]   ;;  %v2450_v44 = vld [vmem:[%s2626_s17 + $0xb0] ss:$8 sps:$4 sm:$0xff]   ;;  %s2465_s17 = scalar_lea.vmem %s2464_s23, 8192 }
  0x25   : > { %560 = vmatpush1.bf16.msra.mxu0 %v2395_v6  ;;  %2340 = vmatpush1.bf16.msra.mxu1 %v2395_v6 }
  0x26   : > { %561 = vmatprep.subr.bf16.mxu0 %v2521_v1  ;;  %2329 = vmatprep.subr.bf16.mxu1 %v2521_v1 }
  0x29   : > { %562 = vmatpush1.bf16.msra.mxu0 %v2396_v8  ;;  %2341 = vmatpush1.bf16.msra.mxu1 %v2396_v8 }
  0x2a   : > { %563 = vmatprep.subr.bf16.mxu0 %v2521_v1  ;;  %2330 = vmatprep.subr.bf16.mxu1 %v2521_v1 }
  0x2d   : > { %564 = vmatpush1.bf16.msra.mxu0 %v2397_v9  ;;  %2342 = vmatpush1.bf16.msra.mxu1 %v2397_v9 }
  0x2e   : > { %565 = vmatprep.subr.bf16.mxu0 %v2521_v1  ;;  %2331 = vmatprep.subr.bf16.mxu1 %v2521_v1 }
  0x31   : > { %566 = vmatpush1.bf16.msra.mxu0 %v2398_v10  ;;  %2343 = vmatpush1.bf16.msra.mxu1 %v2398_v10 }
  0x32   : > { %575 = vmatprep.subr.bf16.mxu0 %v2521_v1  ;;  %2332 = vmatprep.subr.bf16.mxu1 %v2521_v1 }
  0x35   : > { %576 = vmatpush2.bf16.msra.mxu0 %v2399_v11  ;;  %2344 = vmatpush2.bf16.msra.mxu1 %v2399_v11 }
  0x36   : > { %577 = vmatprep.subr.bf16.mxu0 %v2521_v1  ;;  %2333 = vmatprep.subr.bf16.mxu1 %v2521_v1 }
  0x39   : > { %578 = vmatpush2.bf16.msra.mxu0 %v2400_v12  ;;  %2345 = vmatpush2.bf16.msra.mxu1 %v2400_v12 }
  0x3a   : > { %579 = vmatprep.subr.bf16.mxu0 %v2521_v1  ;;  %2334 = vmatprep.subr.bf16.mxu1 %v2521_v1 }
  0x3d   : > { %580 = vmatpush2.bf16.msra.mxu0 %v2401_v13  ;;  %2346 = vmatpush2.bf16.msra.mxu1 %v2401_v13 }
  0x3e   : > { %581 = vmatprep.subr.bf16.mxu0 %v2521_v1  ;;  %2335 = vmatprep.subr.bf16.mxu1 %v2521_v1 }
  0x41   : > { %582 = vmatpush2.bf16.msra.mxu0 %v2402_v14  ;;  %2347 = vmatpush2.bf16.msra.mxu1 %v2402_v14 }
  0x44   : > { %584 = vmatmul.mubr.bf16.vlgmr.msra.gmra.mxu0 %v2403_v15  ;;  %680 = vmatmul.mubr.bf16.vlgmr.msra.gmra.mxu1 %v2406_v16 }
  0x45   : > { %2220 = vmatprep.mubr.msk.bf16.mxu0 %vm502_vm0, %v2409_v17  ;;  %2232 = vmatprep.mubr.msk.bf16.mxu1 %vm502_vm0, %v2412_v18 }
  0x4c   : > { %592 = vmatmul.mubr.bf16.gmra.mxu0 %v2411_v19  ;;  %688 = vmatmul.mubr.bf16.gmra.mxu1 %v2414_v20 }
  0x4d   : > { %2221 = vmatprep.mubr.msk.bf16.mxu0 %vm502_vm0, %v2415_v21  ;;  %2233 = vmatprep.mubr.msk.bf16.mxu1 %vm502_vm0, %v2418_v22 }
  0x54   : > { %600 = vmatmul.mubr.bf16.gmra.mxu0 %v2417_v23  ;;  %696 = vmatmul.mubr.bf16.gmra.mxu1 %v2420_v24 }
  0x55   : > { %2222 = vmatprep.mubr.msk.bf16.mxu0 %vm502_vm0, %v2421_v25  ;;  %2234 = vmatprep.mubr.msk.bf16.mxu1 %vm502_vm0, %v2424_v26 }
  0x5c   : > { %608 = vmatmul.mubr.bf16.gmra.mxu0 %v2423_v27  ;;  %704 = vmatmul.mubr.bf16.gmra.mxu1 %v2426_v28 }
  0x5d   : > { %2223 = vmatprep.mubr.msk.bf16.mxu0 %vm502_vm0, %v2427_v29 }
  0x64   : > { %616 = vmatmul.mubr.bf16.gmra.mxu0 %v2429_v30 }
  0x65   : > { %2224 = vmatprep.mubr.msk.bf16.mxu0 %vm502_vm0, %v2430_v31 }
  0x6c   : > { %624 = vmatmul.mubr.bf16.gmra.mxu0 %v2432_v32 }
  0x6d   : > { %2225 = vmatprep.mubr.msk.bf16.mxu0 %vm502_vm0, %v2433_v33 }
  0x74   : > { %632 = vmatmul.mubr.bf16.gmra.mxu0 %v2435_v34 }
  0x75   : > { %2226 = vmatprep.mubr.msk.bf16.mxu0 %vm502_vm0, %v2436_v35 }
  0x7c   : > { %640 = vmatmul.mubr.bf16.gmra.mxu0 %v2438_v36 }
  0x7d   : > { %2227 = vmatprep.mubr.msk.bf16.mxu0 %vm502_vm0, %v2439_v37 }
  0x84   : > { %648 = vmatmul.mubr.bf16.gmra.mxu0 %v2441_v38 }
  0x85   : > { %2228 = vmatprep.mubr.msk.bf16.mxu0 %vm502_vm0, %v2442_v39 }
  0x8c   : > { %656 = vmatmul.mubr.bf16.gmra.mxu0 %v2444_v40 }
  0x8d   : > { %2229 = vmatprep.mubr.msk.bf16.mxu0 %vm502_vm0, %v2445_v41 }
  0x94   : > { %664 = vmatmul.mubr.bf16.gmra.mxu0 %v2447_v42 }
  0x95   : > { %2230 = vmatprep.mubr.msk.bf16.mxu0 %vm502_vm0, %v2448_v43 }
  0x9c   : > { %672 = vmatmul.mubr.bf16.gmra.mxu0 %v2450_v44 }
 0x104   : > { %v2718_v45 = vpop.f32.mrf.mxu0  ;;  %v2720_v46 = vpop.f32.mrf.mxu1 }
 0x105   : > { %4954 = vst [vmem:[#allocation5_spill] sm:$0xff] %v2720_v46  ;;  %712 = vrot.lane.b32.xlu0 %v2718_v45, %s2522_s25 }
 0x106   : > { %v587_v47 = vpop.f32.mrf.mxu0  ;;  %v683_v48 = vpop.f32.mrf.mxu1 }
 0x108   : > { %v2724_v49 = vpop.f32.mrf.mxu0  ;;  %v2726_v50 = vpop.f32.mrf.mxu1 }
 0x109   : > { %4955 = vst [vmem:[#allocation6_spill] sm:$0xff] %v2726_v50  ;;  %762 = vrot.lane.b32.xlu1 %v2726_v50, %s2522_s25  ;;  %760 = vrot.lane.b32.xlu0 %v2720_v46, %s2522_s25 }
 0x10a   : > { %v590_v51 = vpop.f32.mrf.mxu0  ;;  %v686_v52 = vpop.f32.mrf.mxu1 }
 0x10c   : > { %v2732_v53 = vpop.f32.mrf.mxu0  ;;  %v2734_v54 = vpop.f32.mrf.mxu1 }
 0x10d   : > { %4956 = vst [vmem:[#allocation7_spill] sm:$0xff] %v2734_v54  ;;  %714 = vrot.lane.b32.xlu0 %v2724_v49, %s2522_s25  ;;  %716 = vrot.lane.b32.xlu1 %v2732_v53, %s2522_s25 }
 0x10e   : > { %v595_v55 = vpop.f32.mrf.mxu0  ;;  %v691_v56 = vpop.f32.mrf.mxu1 }
 0x110   : > { %v2740_v57 = vpop.f32.mrf.mxu0  ;;  %v2742_v58 = vpop.f32.mrf.mxu1 }
 0x111   : > { %4957 = vst [vmem:[#allocation8_spill] sm:$0xff] %v2742_v58  ;;  %764 = vrot.lane.b32.xlu0 %v2734_v54, %s2522_s25  ;;  %718 = vrot.lane.b32.xlu1 %v2740_v57, %s2522_s25 }
 0x112   : > { %v598_v59 = vpop.f32.mrf.mxu0  ;;  %v694_v60 = vpop.f32.mrf.mxu1 }
 0x114   : > { %v2748_v61 = vpop.f32.mrf.mxu0  ;;  %v2750_v62 = vpop.f32.mrf.mxu1 }
 0x115   : > { %4958 = vst [vmem:[#allocation9_spill] sm:$0xff] %v2750_v62  ;;  %766 = vrot.lane.b32.xlu1 %v2742_v58, %s2522_s25  ;;  %720 = vrot.lane.b32.xlu0 %v2748_v61, %s2522_s25 }
 0x116   : > { %v603_v63 = vpop.f32.mrf.mxu0  ;;  %v699_v0 = vpop.f32.mrf.mxu1 }
 0x118   : > { %v2756_v1 = vpop.f32.mrf.mxu0  ;;  %v2758_v2 = vpop.f32.mrf.mxu1 }
 0x119   : > { %4959 = vst [vmem:[#allocation10_spill] sm:$0xff] %v2756_v1  ;;  %4960 = vst [vmem:[#allocation11_spill] sm:$0xff] %v2758_v2  ;;  %768 = vrot.lane.b32.xlu0 %v2750_v62, %s2522_s25  ;;  %722 = vrot.lane.b32.xlu1 %v2756_v1, %s2522_s25 }
 0x11a   : > { %v606_v3 = vpop.f32.mrf.mxu0  ;;  %v702_v4 = vpop.f32.mrf.mxu1 }
 0x11c   : > { %v2764_v5 = vpop.f32.mrf.mxu0  ;;  %v2766_v6 = vpop.f32.mrf.mxu1 }
 0x11d   : > { %4961 = vst [vmem:[#allocation12_spill] sm:$0xff] %v2764_v5  ;;  %4962 = vst [vmem:[#allocation13_spill] sm:$0xff] %v2766_v6  ;;  %770 = vrot.lane.b32.xlu1 %v2758_v2, %s2522_s25  ;;  %724 = vrot.lane.b32.xlu0 %v2764_v5, %s2522_s25 }
 0x11e   : > { %v611_v7 = vpop.f32.mrf.mxu0  ;;  %v707_v8 = vpop.f32.mrf.mxu1 }
 0x120   : > { %v2772_v9 = vpop.f32.mrf.mxu0  ;;  %v2774_v10 = vpop.f32.mrf.mxu1 }
 0x121   : > { %4963 = vst [vmem:[#allocation14_spill] sm:$0xff] %v2772_v9  ;;  %4964 = vst [vmem:[#allocation15_spill] sm:$0xff] %v2774_v10  ;;  %772 = vrot.lane.b32.xlu0 %v2766_v6, %s2522_s25  ;;  %726 = vrot.lane.b32.xlu1 %v2772_v9, %s2522_s25 }
 0x122   : > { %v614_v11 = vpop.f32.mrf.mxu0  ;;  %v710_v12 = vpop.f32.mrf.mxu1 }
 0x124   : > { %v2780_v13 = vpop.f32.mrf.mxu0 }
 0x125   : > { %4965 = vst [vmem:[#allocation16_spill] sm:$0xff] %v2780_v13  ;;  %774 = vrot.lane.b32.xlu1 %v2774_v10, %s2522_s25  ;;  %728 = vrot.lane.b32.xlu0 %v2780_v13, %s2522_s25 }
 0x126   : > { %v619_v14 = vpop.f32.mrf.mxu0 }
 0x128   : > { %v2786_v15 = vpop.f32.mrf.mxu0 }
 0x129   : > { %4966 = vst [vmem:[#allocation17_spill] sm:$0xff] %v2786_v15  ;;  %730 = vrot.lane.b32.xlu1 %v2786_v15, %s2522_s25 }
 0x12a   : > { %v622_v16 = vpop.f32.mrf.mxu0 }
 0x12c   : > { %v2790_v17 = vpop.f32.mrf.mxu0 }
 0x12d   : > { %4967 = vst [vmem:[#allocation18_spill] sm:$0xff] %v2790_v17  ;;  %732 = vrot.lane.b32.xlu0 %v2790_v17, %s2522_s25 }
 0x12e   : > { %v627_v18 = vpop.f32.mrf.mxu0 }
 0x130   : > { %v2794_v19 = vpop.f32.mrf.mxu0 }
 0x131   : > { %4968 = vst [vmem:[#allocation19_spill] sm:$0xff] %v2794_v19  ;;  %734 = vrot.lane.b32.xlu1 %v2794_v19, %s2522_s25 }
 0x132   : > { %v630_v20 = vpop.f32.mrf.mxu0 }
 0x134   : > { %v2798_v21 = vpop.f32.mrf.mxu0 }
 0x135   : > { %4969 = vst [vmem:[#allocation20_spill] sm:$0xff] %v2798_v21  ;;  %736 = vrot.lane.b32.xlu0 %v2798_v21, %s2522_s25 }
 0x136   : > { %v635_v22 = vpop.f32.mrf.mxu0 }
 0x138   : > { %v2802_v23 = vpop.f32.mrf.mxu0 }
 0x139   : > { %4970 = vst [vmem:[#allocation21_spill] sm:$0xff] %v2802_v23  ;;  %738 = vrot.lane.b32.xlu1 %v2802_v23, %s2522_s25 }
 0x13a   : > { %v638_v24 = vpop.f32.mrf.mxu0 }
 0x13c   : > { %v2806_v25 = vpop.f32.mrf.mxu0 }
 0x13d   : > { %4971 = vst [vmem:[#allocation22_spill] sm:$0xff] %v2806_v25  ;;  %740 = vrot.lane.b32.xlu0 %v2806_v25, %s2522_s25 }
 0x13e   : > { %v643_v26 = vpop.f32.mrf.mxu0 }
 0x140   : > { %v2810_v27 = vpop.f32.mrf.mxu0 }
 0x141   : > { %4972 = vst [vmem:[#allocation23_spill] sm:$0xff] %v2810_v27  ;;  %742 = vrot.lane.b32.xlu1 %v2810_v27, %s2522_s25 }
 0x142   : > { %v646_v28 = vpop.f32.mrf.mxu0 }
 0x144   : > { %v2814_v29 = vpop.f32.mrf.mxu0 }
 0x145   : > { %4973 = vst [vmem:[#allocation24_spill] sm:$0xff] %v2814_v29  ;;  %744 = vrot.lane.b32.xlu0 %v2814_v29, %s2522_s25 }
 0x146   : > { %v651_v30 = vpop.f32.mrf.mxu0 }
 0x148   : > { %v2818_v31 = vpop.f32.mrf.mxu0 }
 0x149   : > { %4974 = vst [vmem:[#allocation25_spill] sm:$0xff] %v2818_v31  ;;  %746 = vrot.lane.b32.xlu1 %v2818_v31, %s2522_s25 }
 0x14a   : > { %v654_v32 = vpop.f32.mrf.mxu0 }
 0x14c   : > { %v2822_v33 = vpop.f32.mrf.mxu0 }
 0x14d   : > { %4975 = vst [vmem:[#allocation26_spill] sm:$0xff] %v2822_v33  ;;  %748 = vrot.lane.b32.xlu0 %v2822_v33, %s2522_s25 }
 0x14e   : > { %v659_v34 = vpop.f32.mrf.mxu0 }
 0x150   : > { %v2826_v35 = vpop.f32.mrf.mxu0 }
 0x151   : > { %4976 = vst [vmem:[#allocation27_spill] sm:$0xff] %v2826_v35  ;;  %750 = vrot.lane.b32.xlu1 %v2826_v35, %s2522_s25 }
 0x152   : > { %v662_v36 = vpop.f32.mrf.mxu0 }
 0x154   : > { %v2830_v37 = vpop.f32.mrf.mxu0 }
 0x155   : > { %4977 = vst [vmem:[#allocation28_spill] sm:$0xff] %v2830_v37  ;;  %752 = vrot.lane.b32.xlu0 %v2830_v37, %s2522_s25 }
 0x156   : > { %v667_v38 = vpop.f32.mrf.mxu0 }
 0x158   : > { %v2834_v39 = vpop.f32.mrf.mxu0 }
 0x159   : > { %4978 = vst [vmem:[#allocation29_spill] sm:$0xff] %v2834_v39  ;;  %754 = vrot.lane.b32.xlu1 %v2834_v39, %s2522_s25 }
 0x15a   : > { %v670_v40 = vpop.f32.mrf.mxu0 }
 0x15c   : > { %v2838_v41 = vpop.f32.mrf.mxu0 }
 0x15d   : > { %756 = vrot.lane.b32.xlu0 %v2838_v41, %s2522_s25 }
 0x15e   : > { %v675_v42 = vpop.f32.mrf.mxu0 }
 0x160   : > { %v2842_v43 = vpop.f32.mrf.mxu0 }
 0x161   : > { %758 = vrot.lane.b32.xlu1 %v2842_v43, %s2522_s25 }
 0x162   : > { %v678_v44 = vpop.f32.mrf.mxu0 }
 0x177   : > { %v2846_v47 = vpop.permute.xlu0 %712 }
 0x178   : > { %808 = vrot.lane.b32.xlu0 %v2846_v47, %s2522_s25 }
 0x17b   : > { %v2850_v48 = vpop.permute.xlu1 %762  ;;  %v2852_v51 = vpop.permute.xlu0 %760 }
 0x17c   : > { %4979 = vst [vmem:[#allocation30_spill] sm:$0xff] %v2850_v48  ;;  %4980 = vst [vmem:[#allocation31_spill] sm:$0xff] %v2852_v51  ;;  %856 = vrot.lane.b32.xlu0 %v2852_v51, %s2522_s25 }
 0x17f   : > { %v2856_v52 = vpop.permute.xlu0 %714  ;;  %v2858_v55 = vpop.permute.xlu1 %716 }
 0x180   : > { %812 = vrot.lane.b32.xlu0 %v2858_v55, %s2522_s25  ;;  %810 = vrot.lane.b32.xlu1 %v2856_v52, %s2522_s25 }
 0x183   : > { %v2864_v56 = vpop.permute.xlu0 %764  ;;  %v2866_v59 = vpop.permute.xlu1 %718 }
 0x184   : > { %4981 = vst [vmem:[#allocation32_spill] sm:$0xff] %v2864_v56  ;;  %860 = vrot.lane.b32.xlu0 %v2864_v56, %s2522_s25  ;;  %858 = vrot.lane.b32.xlu1 %v2850_v48, %s2522_s25 }
 0x187   : > { %v2872_v60 = vpop.permute.xlu1 %766  ;;  %v2874_v63 = vpop.permute.xlu0 %720 }
 0x188   : > { %4982 = vst [vmem:[#allocation33_spill] sm:$0xff] %v2872_v60  ;;  %816 = vrot.lane.b32.xlu0 %v2874_v63, %s2522_s25  ;;  %814 = vrot.lane.b32.xlu1 %v2866_v59, %s2522_s25 }
 0x18b   : > { %v2880_v0 = vpop.permute.xlu0 %768  ;;  %v2882_v3 = vpop.permute.xlu1 %722 }
 0x18c   : > { %4983 = vst [vmem:[#allocation34_spill] sm:$0xff] %v2880_v0  ;;  %4984 = vst [vmem:[#allocation35_spill] sm:$0xff] %v2882_v3  ;;  %864 = vrot.lane.b32.xlu0 %v2880_v0, %s2522_s25  ;;  %862 = vrot.lane.b32.xlu1 %v2872_v60, %s2522_s25 }
 0x18f   : > { %v2888_v4 = vpop.permute.xlu1 %770  ;;  %v2890_v7 = vpop.permute.xlu0 %724 }
 0x190   : > { %4985 = vst [vmem:[#allocation36_spill] sm:$0xff] %v2888_v4  ;;  %4986 = vst [vmem:[#allocation37_spill] sm:$0xff] %v2890_v7  ;;  %820 = vrot.lane.b32.xlu0 %v2890_v7, %s2522_s25  ;;  %818 = vrot.lane.b32.xlu1 %v2882_v3, %s2522_s25 }
 0x193   : > { %v2896_v8 = vpop.permute.xlu0 %772  ;;  %v2898_v11 = vpop.permute.xlu1 %726 }
 0x194   : > { %4987 = vst [vmem:[#allocation38_spill] sm:$0xff] %v2896_v8  ;;  %4988 = vst [vmem:[#allocation39_spill] sm:$0xff] %v2898_v11  ;;  %868 = vrot.lane.b32.xlu0 %v2896_v8, %s2522_s25  ;;  %866 = vrot.lane.b32.xlu1 %v2888_v4, %s2522_s25 }
 0x197   : > { %v2904_v12 = vpop.permute.xlu0 %728  ;;  %v2910_v14 = vpop.permute.xlu1 %774 }
 0x198   : > { %4989 = vst [vmem:[#allocation40_spill] sm:$0xff] %v2904_v12  ;;  %824 = vrot.lane.b32.xlu0 %v2904_v12, %s2522_s25  ;;  %822 = vrot.lane.b32.xlu1 %v2898_v11, %s2522_s25  ;;  %4990 = vst [vmem:[#allocation41_spill] sm:$0xff] %v2910_v14 }
 0x19b   : > { %v2914_v16 = vpop.permute.xlu1 %730 }
 0x19c   : > { %870 = vrot.lane.b32.xlu1 %v2910_v14, %s2522_s25  ;;  %4991 = vst [vmem:[#allocation42_spill] sm:$0xff] %v2914_v16 }
 0x19f   : > { %v2916_v18 = vpop.permute.xlu0 %732 }
 0x1a0   : > { %4992 = vst [vmem:[#allocation43_spill] sm:$0xff] %v2916_v18  ;;  %828 = vrot.lane.b32.xlu0 %v2916_v18, %s2522_s25  ;;  %826 = vrot.lane.b32.xlu1 %v2914_v16, %s2522_s25 }
 0x1a3   : > { %v2922_v20 = vpop.permute.xlu1 %734 }
 0x1a4   : > { %4993 = vst [vmem:[#allocation44_spill] sm:$0xff] %v2922_v20  ;;  %830 = vrot.lane.b32.xlu1 %v2922_v20, %s2522_s25 }
 0x1a7   : > { %v2926_v22 = vpop.permute.xlu0 %736 }
 0x1a8   : > { %4994 = vst [vmem:[#allocation45_spill] sm:$0xff] %v2926_v22  ;;  %832 = vrot.lane.b32.xlu0 %v2926_v22, %s2522_s25 }
 0x1ab   : > { %v2930_v24 = vpop.permute.xlu1 %738 }
 0x1ac   : > { %4995 = vst [vmem:[#allocation46_spill] sm:$0xff] %v2930_v24  ;;  %834 = vrot.lane.b32.xlu1 %v2930_v24, %s2522_s25 }
 0x1af   : > { %v2934_v26 = vpop.permute.xlu0 %740 }
 0x1b0   : > { %4996 = vst [vmem:[#allocation47_spill] sm:$0xff] %v2934_v26  ;;  %836 = vrot.lane.b32.xlu0 %v2934_v26, %s2522_s25 }
 0x1b3   : > { %v2938_v28 = vpop.permute.xlu1 %742 }
 0x1b4   : > { %4997 = vst [vmem:[#allocation48_spill] sm:$0xff] %v2938_v28  ;;  %838 = vrot.lane.b32.xlu1 %v2938_v28, %s2522_s25 }
 0x1b7   : > { %v2942_v30 = vpop.permute.xlu0 %744 }
 0x1b8   : > { %4998 = vst [vmem:[#allocation49_spill] sm:$0xff] %v2942_v30  ;;  %840 = vrot.lane.b32.xlu0 %v2942_v30, %s2522_s25 }
 0x1bb   : > { %v2946_v32 = vpop.permute.xlu1 %746 }
 0x1bc   : > { %4999 = vst [vmem:[#allocation50_spill] sm:$0xff] %v2946_v32  ;;  %842 = vrot.lane.b32.xlu1 %v2946_v32, %s2522_s25 }
 0x1bf   : > { %v2950_v34 = vpop.permute.xlu0 %748 }
 0x1c0   : > { %5000 = vst [vmem:[#allocation51_spill] sm:$0xff] %v2950_v34  ;;  %844 = vrot.lane.b32.xlu0 %v2950_v34, %s2522_s25 }
 0x1c3   : > { %v2954_v36 = vpop.permute.xlu1 %750 }
 0x1c4   : > { %5001 = vst [vmem:[#allocation52_spill] sm:$0xff] %v2954_v36  ;;  %846 = vrot.lane.b32.xlu1 %v2954_v36, %s2522_s25 }
 0x1c7   : > { %v2958_v38 = vpop.permute.xlu0 %752 }
 0x1c8   : > { %5002 = vst [vmem:[#allocation53_spill] sm:$0xff] %v2958_v38  ;;  %848 = vrot.lane.b32.xlu0 %v2958_v38, %s2522_s25 }
 0x1cb   : > { %v2962_v40 = vpop.permute.xlu1 %754 }
 0x1cc   : > { %5003 = vst [vmem:[#allocation54_spill] sm:$0xff] %v2962_v40  ;;  %850 = vrot.lane.b32.xlu1 %v2962_v40, %s2522_s25 }
 0x1cf   : > { %v2966_v42 = vpop.permute.xlu0 %756 }
 0x1d0   : > { %852 = vrot.lane.b32.xlu0 %v2966_v42, %s2522_s25 }
 0x1d3   : > { %v2970_v44 = vpop.permute.xlu1 %758 }
 0x1d4   : > { %854 = vrot.lane.b32.xlu1 %v2970_v44, %s2522_s25 }
 0x1ea   : > { %v2974_v2 = vpop.permute.xlu0 %808 }
 0x1eb   : > { %904 = vrot.lane.b32.xlu0 %v2974_v2, %s2522_s25 }
 0x1ee   : > { %v2978_v4 = vpop.permute.xlu0 %856 }
 0x1ef   : > { %5004 = vst [vmem:[#allocation55_spill] sm:$0xff] %v2978_v4  ;;  %952 = vrot.lane.b32.xlu0 %v2978_v4, %s2522_s25 }
 0x1f2   : > { %v2982_v62 = vpop.permute.xlu0 %812  ;;  %v2984_v0 = vpop.permute.xlu1 %810 }
 0x1f3   : > { %908 = vrot.lane.b32.xlu0 %v2982_v62, %s2522_s25  ;;  %906 = vrot.lane.b32.xlu1 %v2984_v0, %s2522_s25 }
 0x1f6   : > { %v2990_v58 = vpop.permute.xlu0 %860  ;;  %v2992_v60 = vpop.permute.xlu1 %858 }
 0x1f7   : > { %5005 = vst [vmem:[#allocation56_spill] sm:$0xff] %v2990_v58  ;;  %5006 = vst [vmem:[#allocation57_spill] sm:$0xff] %v2992_v60  ;;  %956 = vrot.lane.b32.xlu0 %v2990_v58, %s2522_s25  ;;  %954 = vrot.lane.b32.xlu1 %v2992_v60, %s2522_s25 }
 0x1fa   : > { %v2998_v54 = vpop.permute.xlu0 %816  ;;  %v3000_v56 = vpop.permute.xlu1 %814 }
 0x1fb   : > { %912 = vrot.lane.b32.xlu0 %v2998_v54, %s2522_s25  ;;  %910 = vrot.lane.b32.xlu1 %v3000_v56, %s2522_s25 }
 0x1fe   : > { %v3006_v4 = vpop.permute.xlu0 %864  ;;  %v3008_v50 = vpop.permute.xlu1 %862 }
 0x1ff   : > { %5007 = vst [vmem:[#allocation58_spill] sm:$0xff] %v3006_v4  ;;  %5008 = vst [vmem:[#allocation59_spill] sm:$0xff] %v3008_v50  ;;  %960 = vrot.lane.b32.xlu0 %v3006_v4, %s2522_s25  ;;  %958 = vrot.lane.b32.xlu1 %v3008_v50, %s2522_s25 }
 0x202   : > { %v3014_v58 = vpop.permute.xlu0 %820  ;;  %v3016_v60 = vpop.permute.xlu1 %818 }
 0x203   : > { %5009 = vst [vmem:[#allocation60_spill] sm:$0xff] %v3014_v58  ;;  %5010 = vst [vmem:[#allocation61_spill] sm:$0xff] %v3016_v60  ;;  %916 = vrot.lane.b32.xlu0 %v3014_v58, %s2522_s25  ;;  %914 = vrot.lane.b32.xlu1 %v3016_v60, %s2522_s25 }
 0x206   : > { %v3022_v48 = vpop.permute.xlu0 %868  ;;  %v3024_v46 = vpop.permute.xlu1 %866 }
 0x207   : > { %5011 = vst [vmem:[#allocation62_spill] sm:$0xff] %v3022_v48  ;;  %5012 = vst [vmem:[#allocation63_spill] sm:$0xff] %v3024_v46  ;;  %964 = vrot.lane.b32.xlu0 %v3022_v48, %s2522_s25  ;;  %962 = vrot.lane.b32.xlu1 %v3024_v46, %s2522_s25 }
 0x20a   : > { %v3030_v50 = vpop.permute.xlu0 %824  ;;  %v3032_v4 = vpop.permute.xlu1 %822 }
 0x20b   : > { %5013 = vst [vmem:[#allocation64_spill] sm:$0xff] %v3030_v50  ;;  %5014 = vst [vmem:[#allocation65_spill] sm:$0xff] %v3032_v4  ;;  %920 = vrot.lane.b32.xlu0 %v3030_v50, %s2522_s25  ;;  %918 = vrot.lane.b32.xlu1 %v3032_v4, %s2522_s25 }
 0x20e   : > { %v3038_v51 = vpop.permute.xlu1 %870 }
 0x20f   : > { %5015 = vst [vmem:[#allocation66_spill] sm:$0xff] %v3038_v51  ;;  %966 = vrot.lane.b32.xlu1 %v3038_v51, %s2522_s25 }
 0x212   : > { %v3042_v10 = vpop.permute.xlu0 %828  ;;  %v3044_v14 = vpop.permute.xlu1 %826 }
 0x213   : > { %5016 = vst [vmem:[#allocation67_spill] sm:$0xff] %v3042_v10  ;;  %5017 = vst [vmem:[#allocation68_spill] sm:$0xff] %v3044_v14  ;;  %924 = vrot.lane.b32.xlu0 %v3042_v10, %s2522_s25  ;;  %922 = vrot.lane.b32.xlu1 %v3044_v14, %s2522_s25 }
 0x216   : > { %v3050_v46 = vpop.permute.xlu1 %830 }
 0x217   : > { %5018 = vst [vmem:[#allocation69_spill] sm:$0xff] %v3050_v46  ;;  %926 = vrot.lane.b32.xlu1 %v3050_v46, %s2522_s25 }
 0x21a   : > { %v3054_v48 = vpop.permute.xlu0 %832 }
 0x21b   : > { %5019 = vst [vmem:[#allocation70_spill] sm:$0xff] %v3054_v48  ;;  %928 = vrot.lane.b32.xlu0 %v3054_v48, %s2522_s25 }
 0x21e   : > { %v3058_v51 = vpop.permute.xlu1 %834 }
 0x21f   : > { %5020 = vst [vmem:[#allocation71_spill] sm:$0xff] %v3058_v51  ;;  %930 = vrot.lane.b32.xlu1 %v3058_v51, %s2522_s25 }
 0x222   : > { %v3062_v6 = vpop.permute.xlu0 %836 }
 0x223   : > { %5021 = vst [vmem:[#allocation72_spill] sm:$0xff] %v3062_v6  ;;  %932 = vrot.lane.b32.xlu0 %v3062_v6, %s2522_s25 }
 0x226   : > { %v3066_v8 = vpop.permute.xlu1 %838 }
 0x227   : > { %5022 = vst [vmem:[#allocation73_spill] sm:$0xff] %v3066_v8  ;;  %934 = vrot.lane.b32.xlu1 %v3066_v8, %s2522_s25 }
 0x22a   : > { %v3070_v39 = vpop.permute.xlu0 %840 }
 0x22b   : > { %5023 = vst [vmem:[#allocation74_spill] sm:$0xff] %v3070_v39  ;;  %936 = vrot.lane.b32.xlu0 %v3070_v39, %s2522_s25 }
 0x22e   : > { %v3074_v40 = vpop.permute.xlu1 %842 }
 0x22f   : > { %5024 = vst [vmem:[#allocation75_spill] sm:$0xff] %v3074_v40  ;;  %938 = vrot.lane.b32.xlu1 %v3074_v40, %s2522_s25 }
 0x232   : > { %v3078_v37 = vpop.permute.xlu0 %844 }
 0x233   : > { %5025 = vst [vmem:[#allocation76_spill] sm:$0xff] %v3078_v37  ;;  %940 = vrot.lane.b32.xlu0 %v3078_v37, %s2522_s25 }
 0x236   : > { %v3082_v38 = vpop.permute.xlu1 %846 }
 0x237   : > { %5026 = vst [vmem:[#allocation77_spill] sm:$0xff] %v3082_v38  ;;  %942 = vrot.lane.b32.xlu1 %v3082_v38, %s2522_s25 }
 0x23a   : > { %v3086_v35 = vpop.permute.xlu0 %848 }
 0x23b   : > { %5027 = vst [vmem:[#allocation78_spill] sm:$0xff] %v3086_v35  ;;  %944 = vrot.lane.b32.xlu0 %v3086_v35, %s2522_s25 }
 0x23e   : > { %v3090_v36 = vpop.permute.xlu1 %850 }
 0x23f   : > { %5028 = vst [vmem:[#allocation79_spill] sm:$0xff] %v3090_v36  ;;  %946 = vrot.lane.b32.xlu1 %v3090_v36, %s2522_s25 }
 0x242   : > { %v3094_v33 = vpop.permute.xlu0 %852 }
 0x243   : > { %948 = vrot.lane.b32.xlu0 %v3094_v33, %s2522_s25 }
 0x246   : > { %v3098_v37 = vpop.permute.xlu1 %854 }
 0x247   : > { %950 = vrot.lane.b32.xlu1 %v3098_v37, %s2522_s25 }
 0x25d   : > { %v3102_v38 = vpop.permute.xlu0 %904 }
 0x25e   : > { %1000 = vrot.lane.b32.xlu0 %v3102_v38, %s2522_s25 }
 0x261   : > { %v3106_v35 = vpop.permute.xlu0 %952 }
 0x262   : > { %5029 = vst [vmem:[#allocation80_spill] sm:$0xff] %v3106_v35  ;;  %1048 = vrot.lane.b32.xlu0 %v3106_v35, %s2522_s25 }
 0x265   : > { %v3110_v36 = vpop.permute.xlu0 %908  ;;  %v3112_v34 = vpop.permute.xlu1 %906 }
 0x266   : > { %1004 = vrot.lane.b32.xlu0 %v3110_v36, %s2522_s25  ;;  %1002 = vrot.lane.b32.xlu1 %v3112_v34, %s2522_s25 }
 0x269   : > { %v3118_v40 = vpop.permute.xlu0 %956  ;;  %v3120_v31 = vpop.permute.xlu1 %954 }
 0x26a   : > { %5030 = vst [vmem:[#allocation81_spill] sm:$0xff] %v3118_v40  ;;  %5031 = vst [vmem:[#allocation82_spill] sm:$0xff] %v3120_v31  ;;  %1052 = vrot.lane.b32.xlu0 %v3118_v40, %s2522_s25  ;;  %1050 = vrot.lane.b32.xlu1 %v3120_v31, %s2522_s25 }
 0x26d   : > { %v3126_v35 = vpop.permute.xlu0 %912  ;;  %v3128_v32 = vpop.permute.xlu1 %910 }
 0x26e   : > { %1008 = vrot.lane.b32.xlu0 %v3126_v35, %s2522_s25  ;;  %1006 = vrot.lane.b32.xlu1 %v3128_v32, %s2522_s25 }
 0x271   : > { %v3134_v39 = vpop.permute.xlu0 %960  ;;  %v3136_v29 = vpop.permute.xlu1 %958 }
 0x272   : > { %5032 = vst [vmem:[#allocation83_spill] sm:$0xff] %v3134_v39  ;;  %5033 = vst [vmem:[#allocation84_spill] sm:$0xff] %v3136_v29  ;;  %1056 = vrot.lane.b32.xlu0 %v3134_v39, %s2522_s25  ;;  %1054 = vrot.lane.b32.xlu1 %v3136_v29, %s2522_s25 }
 0x275   : > { %v3142_v40 = vpop.permute.xlu0 %916  ;;  %v3144_v31 = vpop.permute.xlu1 %914 }
 0x276   : > { %5034 = vst [vmem:[#allocation85_spill] sm:$0xff] %v3142_v40  ;;  %5035 = vst [vmem:[#allocation86_spill] sm:$0xff] %v3144_v31  ;;  %1012 = vrot.lane.b32.xlu0 %v3142_v40, %s2522_s25  ;;  %1010 = vrot.lane.b32.xlu1 %v3144_v31, %s2522_s25 }
 0x279   : > { %v3150_v30 = vpop.permute.xlu0 %964  ;;  %v3152_v8 = vpop.permute.xlu1 %962 }
 0x27a   : > { %5036 = vst [vmem:[#allocation87_spill] sm:$0xff] %v3150_v30  ;;  %5037 = vst [vmem:[#allocation88_spill] sm:$0xff] %v3152_v8  ;;  %1060 = vrot.lane.b32.xlu0 %v3150_v30, %s2522_s25  ;;  %1058 = vrot.lane.b32.xlu1 %v3152_v8, %s2522_s25 }
 0x27d   : > { %v3158_v29 = vpop.permute.xlu0 %920  ;;  %v3160_v39 = vpop.permute.xlu1 %918 }
 0x27e   : > { %5038 = vst [vmem:[#allocation89_spill] sm:$0xff] %v3158_v29  ;;  %5039 = vst [vmem:[#allocation90_spill] sm:$0xff] %v3160_v39  ;;  %1016 = vrot.lane.b32.xlu0 %v3158_v29, %s2522_s25  ;;  %1014 = vrot.lane.b32.xlu1 %v3160_v39, %s2522_s25 }
 0x281   : > { %v3166_v27 = vpop.permute.xlu1 %966 }
 0x282   : > { %5040 = vst [vmem:[#allocation91_spill] sm:$0xff] %v3166_v27  ;;  %1062 = vrot.lane.b32.xlu1 %v3166_v27, %s2522_s25 }
 0x285   : > { %v3170_v28 = vpop.permute.xlu0 %924  ;;  %v3172_v30 = vpop.permute.xlu1 %922 }
 0x286   : > { %5041 = vst [vmem:[#allocation92_spill] sm:$0xff] %v3170_v28  ;;  %5042 = vst [vmem:[#allocation93_spill] sm:$0xff] %v3172_v30  ;;  %1020 = vrot.lane.b32.xlu0 %v3170_v28, %s2522_s25  ;;  %1018 = vrot.lane.b32.xlu1 %v3172_v30, %s2522_s25 }
 0x289   : > { %v3178_v8 = vpop.permute.xlu1 %926 }
 0x28a   : > { %5043 = vst [vmem:[#allocation94_spill] sm:$0xff] %v3178_v8  ;;  %1022 = vrot.lane.b32.xlu1 %v3178_v8, %s2522_s25 }
 0x28d   : > { %v3182_v6 = vpop.permute.xlu0 %928 }
 0x28e   : > { %5044 = vst [vmem:[#allocation95_spill] sm:$0xff] %v3182_v6  ;;  %1024 = vrot.lane.b32.xlu0 %v3182_v6, %s2522_s25 }
 0x291   : > { %v3186_v27 = vpop.permute.xlu1 %930 }
 0x292   : > { %5045 = vst [vmem:[#allocation96_spill] sm:$0xff] %v3186_v27  ;;  %1026 = vrot.lane.b32.xlu1 %v3186_v27, %s2522_s25 }
 0x295   : > { %v3190_v25 = vpop.permute.xlu0 %932 }
 0x296   : > { %5046 = vst [vmem:[#allocation97_spill] sm:$0xff] %v3190_v25  ;;  %1028 = vrot.lane.b32.xlu0 %v3190_v25, %s2522_s25 }
 0x299   : > { %v3194_v26 = vpop.permute.xlu1 %934 }
 0x29a   : > { %5047 = vst [vmem:[#allocation98_spill] sm:$0xff] %v3194_v26  ;;  %1030 = vrot.lane.b32.xlu1 %v3194_v26, %s2522_s25 }
 0x29d   : > { %v3198_v51 = vpop.permute.xlu0 %936 }
 0x29e   : > { %5048 = vst [vmem:[#allocation99_spill] sm:$0xff] %v3198_v51  ;;  %1032 = vrot.lane.b32.xlu0 %v3198_v51, %s2522_s25 }
 0x2a1   : > { %v3202_v6 = vpop.permute.xlu1 %938 }
 0x2a2   : > { %5049 = vst [vmem:[#allocation100_spill] sm:$0xff] %v3202_v6  ;;  %1034 = vrot.lane.b32.xlu1 %v3202_v6, %s2522_s25 }
 0x2a5   : > { %v3206_v27 = vpop.permute.xlu0 %940 }
 0x2a6   : > { %5050 = vst [vmem:[#allocation101_spill] sm:$0xff] %v3206_v27  ;;  %1036 = vrot.lane.b32.xlu0 %v3206_v27, %s2522_s25 }
 0x2a9   : > { %v3210_v25 = vpop.permute.xlu1 %942 }
 0x2aa   : > { %5051 = vst [vmem:[#allocation102_spill] sm:$0xff] %v3210_v25  ;;  %1038 = vrot.lane.b32.xlu1 %v3210_v25, %s2522_s25 }
 0x2ad   : > { %v3214_v26 = vpop.permute.xlu0 %944 }
 0x2ae   : > { %5052 = vst [vmem:[#allocation103_spill] sm:$0xff] %v3214_v26  ;;  %1040 = vrot.lane.b32.xlu0 %v3214_v26, %s2522_s25 }
 0x2b1   : > { %v3218_v51 = vpop.permute.xlu1 %946 }
 0x2b2   : > { %5053 = vst [vmem:[#allocation104_spill] sm:$0xff] %v3218_v51  ;;  %1042 = vrot.lane.b32.xlu1 %v3218_v51, %s2522_s25 }
 0x2b5   : > { %v3222_v6 = vpop.permute.xlu0 %948 }
 0x2b6   : > { %1044 = vrot.lane.b32.xlu0 %v3222_v6, %s2522_s25 }
 0x2b9   : > { %v3226_v27 = vpop.permute.xlu1 %950 }
 0x2ba   : > { %1046 = vrot.lane.b32.xlu1 %v3226_v27, %s2522_s25 }
 0x2d0   : > { %v3230_v25 = vpop.permute.xlu0 %1000 }
 0x2d1   : > { %1096 = vrot.lane.b32.xlu0 %v3230_v25, %s2522_s25 }
 0x2d4   : > { %v3234_v26 = vpop.permute.xlu0 %1048 }
 0x2d5   : > { %5054 = vst [vmem:[#allocation105_spill] sm:$0xff] %v3234_v26  ;;  %1144 = vrot.lane.b32.xlu0 %v3234_v26, %s2522_s25 }
 0x2d8   : > { %v3238_v51 = vpop.permute.xlu0 %1004  ;;  %v3240_v23 = vpop.permute.xlu1 %1002 }
 0x2d9   : > { %1100 = vrot.lane.b32.xlu0 %v3238_v51, %s2522_s25  ;;  %1098 = vrot.lane.b32.xlu1 %v3240_v23, %s2522_s25 }
 0x2dc   : > { %v3246_v24 = vpop.permute.xlu0 %1052  ;;  %v3248_v48 = vpop.permute.xlu1 %1050 }
 0x2dd   : > { %5055 = vst [vmem:[#allocation106_spill] sm:$0xff] %v3246_v24  ;;  %5056 = vst [vmem:[#allocation107_spill] sm:$0xff] %v3248_v48  ;;  %1148 = vrot.lane.b32.xlu0 %v3246_v24, %s2522_s25  ;;  %1146 = vrot.lane.b32.xlu1 %v3248_v48, %s2522_s25 }
 0x2e0   : > { %v3254_v26 = vpop.permute.xlu0 %1008  ;;  %v3256_v8 = vpop.permute.xlu1 %1006 }
 0x2e1   : > { %1104 = vrot.lane.b32.xlu0 %v3254_v26, %s2522_s25  ;;  %1102 = vrot.lane.b32.xlu1 %v3256_v8, %s2522_s25 }
 0x2e4   : > { %v3262_v21 = vpop.permute.xlu0 %1056  ;;  %v3264_v22 = vpop.permute.xlu1 %1054 }
 0x2e5   : > { %5057 = vst [vmem:[#allocation108_spill] sm:$0xff] %v3262_v21  ;;  %5058 = vst [vmem:[#allocation109_spill] sm:$0xff] %v3264_v22  ;;  %1152 = vrot.lane.b32.xlu0 %v3262_v21, %s2522_s25  ;;  %1150 = vrot.lane.b32.xlu1 %v3264_v22, %s2522_s25 }
 0x2e8   : > { %v3270_v24 = vpop.permute.xlu0 %1012  ;;  %v3272_v48 = vpop.permute.xlu1 %1010 }
 0x2e9   : > { %5059 = vst [vmem:[#allocation110_spill] sm:$0xff] %v3270_v24  ;;  %5060 = vst [vmem:[#allocation111_spill] sm:$0xff] %v3272_v48  ;;  %1108 = vrot.lane.b32.xlu0 %v3270_v24, %s2522_s25  ;;  %1106 = vrot.lane.b32.xlu1 %v3272_v48, %s2522_s25 }
 0x2ec   : > { %v3278_v46 = vpop.permute.xlu0 %1060  ;;  %v3280_v30 = vpop.permute.xlu1 %1058 }
 0x2ed   : > { %5061 = vst [vmem:[#allocation112_spill] sm:$0xff] %v3278_v46  ;;  %5062 = vst [vmem:[#allocation113_spill] sm:$0xff] %v3280_v30  ;;  %1156 = vrot.lane.b32.xlu0 %v3278_v46, %s2522_s25  ;;  %1154 = vrot.lane.b32.xlu1 %v3280_v30, %s2522_s25 }
 0x2f0   : > { %v3286_v22 = vpop.permute.xlu0 %1016  ;;  %v3288_v21 = vpop.permute.xlu1 %1014 }
 0x2f1   : > { %5063 = vst [vmem:[#allocation114_spill] sm:$0xff] %v3286_v22  ;;  %5064 = vst [vmem:[#allocation115_spill] sm:$0xff] %v3288_v21  ;;  %1112 = vrot.lane.b32.xlu0 %v3286_v22, %s2522_s25  ;;  %1110 = vrot.lane.b32.xlu1 %v3288_v21, %s2522_s25 }
 0x2f4   : > { %v3294_v28 = vpop.permute.xlu1 %1062 }
 0x2f5   : > { %5065 = vst [vmem:[#allocation116_spill] sm:$0xff] %v3294_v28  ;;  %1158 = vrot.lane.b32.xlu1 %v3294_v28, %s2522_s25 }
 0x2f8   : > { %v3298_v19 = vpop.permute.xlu0 %1020  ;;  %v3300_v46 = vpop.permute.xlu1 %1018 }
 0x2f9   : > { %5066 = vst [vmem:[#allocation117_spill] sm:$0xff] %v3298_v19  ;;  %5067 = vst [vmem:[#allocation118_spill] sm:$0xff] %v3300_v46  ;;  %1116 = vrot.lane.b32.xlu0 %v3298_v19, %s2522_s25  ;;  %1114 = vrot.lane.b32.xlu1 %v3300_v46, %s2522_s25 }
 0x2fc   : > { %v3306_v30 = vpop.permute.xlu1 %1022 }
 0x2fd   : > { %5068 = vst [vmem:[#allocation119_spill] sm:$0xff] %v3306_v30  ;;  %1118 = vrot.lane.b32.xlu1 %v3306_v30, %s2522_s25 }
 0x300   : > { %v3310_v20 = vpop.permute.xlu0 %1024 }
 0x301   : > { %5069 = vst [vmem:[#allocation120_spill] sm:$0xff] %v3310_v20  ;;  %1120 = vrot.lane.b32.xlu0 %v3310_v20, %s2522_s25 }
 0x304   : > { %v3314_v28 = vpop.permute.xlu1 %1026 }
 0x305   : > { %5070 = vst [vmem:[#allocation121_spill] sm:$0xff] %v3314_v28  ;;  %1122 = vrot.lane.b32.xlu1 %v3314_v28, %s2522_s25 }
 0x308   : > { %v3318_v14 = vpop.permute.xlu0 %1028 }
 0x309   : > { %5071 = vst [vmem:[#allocation122_spill] sm:$0xff] %v3318_v14  ;;  %1124 = vrot.lane.b32.xlu0 %v3318_v14, %s2522_s25 }
 0x30c   : > { %v3322_v46 = vpop.permute.xlu1 %1030 }
 0x30d   : > { %5072 = vst [vmem:[#allocation123_spill] sm:$0xff] %v3322_v46  ;;  %1126 = vrot.lane.b32.xlu1 %v3322_v46, %s2522_s25 }
 0x310   : > { %v3326_v30 = vpop.permute.xlu0 %1032 }
 0x311   : > { %5073 = vst [vmem:[#allocation124_spill] sm:$0xff] %v3326_v30  ;;  %1128 = vrot.lane.b32.xlu0 %v3326_v30, %s2522_s25 }
 0x314   : > { %v3330_v20 = vpop.permute.xlu1 %1034 }
 0x315   : > { %5074 = vst [vmem:[#allocation125_spill] sm:$0xff] %v3330_v20  ;;  %1130 = vrot.lane.b32.xlu1 %v3330_v20, %s2522_s25 }
 0x318   : > { %v3334_v28 = vpop.permute.xlu0 %1036 }
 0x319   : > { %5075 = vst [vmem:[#allocation126_spill] sm:$0xff] %v3334_v28  ;;  %1132 = vrot.lane.b32.xlu0 %v3334_v28, %s2522_s25 }
 0x31c   : > { %v3338_v14 = vpop.permute.xlu1 %1038 }
 0x31d   : > { %5076 = vst [vmem:[#allocation127_spill] sm:$0xff] %v3338_v14  ;;  %1134 = vrot.lane.b32.xlu1 %v3338_v14, %s2522_s25 }
 0x320   : > { %v3342_v46 = vpop.permute.xlu0 %1040 }
 0x321   : > { %5077 = vst [vmem:[#allocation128_spill] sm:$0xff] %v3342_v46  ;;  %1136 = vrot.lane.b32.xlu0 %v3342_v46, %s2522_s25 }
 0x324   : > { %v3346_v30 = vpop.permute.xlu1 %1042 }
 0x325   : > { %5078 = vst [vmem:[#allocation129_spill] sm:$0xff] %v3346_v30  ;;  %1138 = vrot.lane.b32.xlu1 %v3346_v30, %s2522_s25 }
 0x328   : > { %v3350_v20 = vpop.permute.xlu0 %1044 }
 0x329   : > { %1140 = vrot.lane.b32.xlu0 %v3350_v20, %s2522_s25 }
 0x32c   : > { %v3354_v28 = vpop.permute.xlu1 %1046 }
 0x32d   : > { %1142 = vrot.lane.b32.xlu1 %v3354_v28, %s2522_s25 }
 0x343   : > { %v3358_v14 = vpop.permute.xlu0 %1096 }
 0x344   : > { %1192 = vrot.lane.b32.xlu0 %v3358_v14, %s2522_s25 }
 0x347   : > { %v3362_v46 = vpop.permute.xlu0 %1144 }
 0x348   : > { %5079 = vst [vmem:[#allocation130_spill] sm:$0xff] %v3362_v46  ;;  %1240 = vrot.lane.b32.xlu0 %v3362_v46, %s2522_s25 }
 0x34b   : > { %v3366_v30 = vpop.permute.xlu0 %1100  ;;  %v3368_v19 = vpop.permute.xlu1 %1098 }
 0x34c   : > { %1196 = vrot.lane.b32.xlu0 %v3366_v30, %s2522_s25  ;;  %1194 = vrot.lane.b32.xlu1 %v3368_v19, %s2522_s25 }
 0x34f   : > { %v3374_v10 = vpop.permute.xlu0 %1148  ;;  %v3376_v17 = vpop.permute.xlu1 %1146 }
 0x350   : > { %5080 = vst [vmem:[#allocation131_spill] sm:$0xff] %v3374_v10  ;;  %5081 = vst [vmem:[#allocation132_spill] sm:$0xff] %v3376_v17  ;;  %1244 = vrot.lane.b32.xlu0 %v3374_v10, %s2522_s25  ;;  %1242 = vrot.lane.b32.xlu1 %v3376_v17, %s2522_s25 }
 0x353   : > { %v3382_v46 = vpop.permute.xlu0 %1104  ;;  %v3384_v18 = vpop.permute.xlu1 %1102 }
 0x354   : > { %5082 = vst [vmem:[#allocation133_spill] sm:$0xff] %v3382_v46  ;;  %5083 = vst [vmem:[#allocation134_spill] sm:$0xff] %v3384_v18  ;;  %1200 = vrot.lane.b32.xlu0 %v3382_v46, %s2522_s25  ;;  %1198 = vrot.lane.b32.xlu1 %v3384_v18, %s2522_s25 }
 0x357   : > { %v3390_v15 = vpop.permute.xlu0 %1152  ;;  %v3392_v16 = vpop.permute.xlu1 %1150 }
 0x358   : > { %5084 = vst [vmem:[#allocation135_spill] sm:$0xff] %v3390_v15  ;;  %5085 = vst [vmem:[#allocation136_spill] sm:$0xff] %v3392_v16  ;;  %1248 = vrot.lane.b32.xlu0 %v3390_v15, %s2522_s25  ;;  %1246 = vrot.lane.b32.xlu1 %v3392_v16, %s2522_s25 }
 0x35b   : > { %v3398_v10 = vpop.permute.xlu0 %1108  ;;  %v3400_v17 = vpop.permute.xlu1 %1106 }
 0x35c   : > { %5086 = vst [vmem:[#allocation137_spill] sm:$0xff] %v3398_v10  ;;  %5087 = vst [vmem:[#allocation138_spill] sm:$0xff] %v3400_v17  ;;  %1204 = vrot.lane.b32.xlu0 %v3398_v10, %s2522_s25  ;;  %1202 = vrot.lane.b32.xlu1 %v3400_v17, %s2522_s25 }
 0x35f   : > { %v3406_v21 = vpop.permute.xlu0 %1156  ;;  %v3408_v22 = vpop.permute.xlu1 %1154 }
 0x360   : > { %5088 = vst [vmem:[#allocation139_spill] sm:$0xff] %v3406_v21  ;;  %5089 = vst [vmem:[#allocation140_spill] sm:$0xff] %v3408_v22  ;;  %1252 = vrot.lane.b32.xlu0 %v3406_v21, %s2522_s25  ;;  %1250 = vrot.lane.b32.xlu1 %v3408_v22, %s2522_s25 }
 0x363   : > { %v3414_v16 = vpop.permute.xlu0 %1112  ;;  %v3416_v15 = vpop.permute.xlu1 %1110 }
 0x364   : > { %5090 = vst [vmem:[#allocation141_spill] sm:$0xff] %v3414_v16  ;;  %5091 = vst [vmem:[#allocation142_spill] sm:$0xff] %v3416_v15  ;;  %1208 = vrot.lane.b32.xlu0 %v3414_v16, %s2522_s25  ;;  %1206 = vrot.lane.b32.xlu1 %v3416_v15, %s2522_s25 }
 0x367   : > { %v3422_v39 = vpop.permute.xlu1 %1158 }
 0x368   : > { %5092 = vst [vmem:[#allocation143_spill] sm:$0xff] %v3422_v39  ;;  %1254 = vrot.lane.b32.xlu1 %v3422_v39, %s2522_s25 }
 0x36b   : > { %v3426_v29 = vpop.permute.xlu0 %1116  ;;  %v3428_v21 = vpop.permute.xlu1 %1114 }
 0x36c   : > { %5093 = vst [vmem:[#allocation144_spill] sm:$0xff] %v3426_v29  ;;  %5094 = vst [vmem:[#allocation145_spill] sm:$0xff] %v3428_v21  ;;  %1212 = vrot.lane.b32.xlu0 %v3426_v29, %s2522_s25  ;;  %1210 = vrot.lane.b32.xlu1 %v3428_v21, %s2522_s25 }
 0x36f   : > { %v3434_v22 = vpop.permute.xlu1 %1118 }
 0x370   : > { %5095 = vst [vmem:[#allocation146_spill] sm:$0xff] %v3434_v22  ;;  %1214 = vrot.lane.b32.xlu1 %v3434_v22, %s2522_s25 }
 0x373   : > { %v3438_v15 = vpop.permute.xlu0 %1120 }
 0x374   : > { %5096 = vst [vmem:[#allocation147_spill] sm:$0xff] %v3438_v15  ;;  %1216 = vrot.lane.b32.xlu0 %v3438_v15, %s2522_s25 }
 0x377   : > { %v3442_v39 = vpop.permute.xlu1 %1122 }
 0x378   : > { %5097 = vst [vmem:[#allocation148_spill] sm:$0xff] %v3442_v39  ;;  %1218 = vrot.lane.b32.xlu1 %v3442_v39, %s2522_s25 }
 0x37b   : > { %v3446_v16 = vpop.permute.xlu0 %1124 }
 0x37c   : > { %5098 = vst [vmem:[#allocation149_spill] sm:$0xff] %v3446_v16  ;;  %1220 = vrot.lane.b32.xlu0 %v3446_v16, %s2522_s25 }
 0x37f   : > { %v3450_v21 = vpop.permute.xlu1 %1126 }
 0x380   : > { %5099 = vst [vmem:[#allocation150_spill] sm:$0xff] %v3450_v21  ;;  %1222 = vrot.lane.b32.xlu1 %v3450_v21, %s2522_s25 }
 0x383   : > { %v3454_v22 = vpop.permute.xlu0 %1128 }
 0x384   : > { %5100 = vst [vmem:[#allocation151_spill] sm:$0xff] %v3454_v22  ;;  %1224 = vrot.lane.b32.xlu0 %v3454_v22, %s2522_s25 }
 0x387   : > { %v3458_v15 = vpop.permute.xlu1 %1130 }
 0x388   : > { %5101 = vst [vmem:[#allocation152_spill] sm:$0xff] %v3458_v15  ;;  %1226 = vrot.lane.b32.xlu1 %v3458_v15, %s2522_s25 }
 0x38b   : > { %v3462_v39 = vpop.permute.xlu0 %1132 }
 0x38c   : > { %5102 = vst [vmem:[#allocation153_spill] sm:$0xff] %v3462_v39  ;;  %1228 = vrot.lane.b32.xlu0 %v3462_v39, %s2522_s25 }
 0x38f   : > { %v3466_v16 = vpop.permute.xlu1 %1134 }
 0x390   : > { %5103 = vst [vmem:[#allocation154_spill] sm:$0xff] %v3466_v16  ;;  %1230 = vrot.lane.b32.xlu1 %v3466_v16, %s2522_s25 }
 0x393   : > { %v3470_v21 = vpop.permute.xlu0 %1136 }
 0x394   : > { %5104 = vst [vmem:[#allocation155_spill] sm:$0xff] %v3470_v21  ;;  %1232 = vrot.lane.b32.xlu0 %v3470_v21, %s2522_s25 }
 0x397   : > { %v3474_v22 = vpop.permute.xlu1 %1138 }
 0x398   : > { %5105 = vst [vmem:[#allocation156_spill] sm:$0xff] %v3474_v22  ;;  %1234 = vrot.lane.b32.xlu1 %v3474_v22, %s2522_s25 }
 0x39b   : > { %v3478_v15 = vpop.permute.xlu0 %1140 }
 0x39c   : > { %1236 = vrot.lane.b32.xlu0 %v3478_v15, %s2522_s25 }
 0x39f   : > { %v3482_v39 = vpop.permute.xlu1 %1142 }
 0x3a0   : > { %1238 = vrot.lane.b32.xlu1 %v3482_v39, %s2522_s25 }
 0x3b6   : > { %v3486_v16 = vpop.permute.xlu0 %1192 }
 0x3b7   : > { %1288 = vrot.lane.b32.xlu0 %v3486_v16, %s2522_s25 }
 0x3ba   : > { %v3490_v21 = vpop.permute.xlu0 %1240 }
 0x3bb   : > { %5106 = vst [vmem:[#allocation157_spill] sm:$0xff] %v3490_v21  ;;  %1336 = vrot.lane.b32.xlu0 %v3490_v21, %s2522_s25 }
 0x3be   : > { %v3494_v22 = vpop.permute.xlu0 %1196  ;;  %v3496_v29 = vpop.permute.xlu1 %1194 }
 0x3bf   : > { %1292 = vrot.lane.b32.xlu0 %v3494_v22, %s2522_s25  ;;  %1290 = vrot.lane.b32.xlu1 %v3496_v29, %s2522_s25 }
 0x3c2   : > { %v3502_v4 = vpop.permute.xlu0 %1244  ;;  %v3504_v50 = vpop.permute.xlu1 %1242 }
 0x3c3   : > { %5107 = vst [vmem:[#allocation158_spill] sm:$0xff] %v3502_v4  ;;  %5108 = vst [vmem:[#allocation159_spill] sm:$0xff] %v3504_v50  ;;  %1340 = vrot.lane.b32.xlu0 %v3502_v4, %s2522_s25  ;;  %1338 = vrot.lane.b32.xlu1 %v3504_v50, %s2522_s25 }
 0x3c6   : > { %v3510_v21 = vpop.permute.xlu0 %1200  ;;  %v3512_v17 = vpop.permute.xlu1 %1198 }
 0x3c7   : > { %5109 = vst [vmem:[#allocation160_spill] sm:$0xff] %v3510_v21  ;;  %5110 = vst [vmem:[#allocation161_spill] sm:$0xff] %v3512_v17  ;;  %1296 = vrot.lane.b32.xlu0 %v3510_v21, %s2522_s25  ;;  %1294 = vrot.lane.b32.xlu1 %v3512_v17, %s2522_s25 }
 0x3ca   : > { %v3518_v10 = vpop.permute.xlu0 %1248  ;;  %v3520_v13 = vpop.permute.xlu1 %1246 }
 0x3cb   : > { %5111 = vst [vmem:[#allocation162_spill] sm:$0xff] %v3518_v10  ;;  %5112 = vst [vmem:[#allocation163_spill] sm:$0xff] %v3520_v13  ;;  %1344 = vrot.lane.b32.xlu0 %v3518_v10, %s2522_s25  ;;  %1342 = vrot.lane.b32.xlu1 %v3520_v13, %s2522_s25 }
 0x3ce   : > { %v3526_v4 = vpop.permute.xlu0 %1204  ;;  %v3528_v50 = vpop.permute.xlu1 %1202 }
 0x3cf   : > { %5113 = vst [vmem:[#allocation164_spill] sm:$0xff] %v3526_v4  ;;  %5114 = vst [vmem:[#allocation165_spill] sm:$0xff] %v3528_v50  ;;  %1300 = vrot.lane.b32.xlu0 %v3526_v4, %s2522_s25  ;;  %1298 = vrot.lane.b32.xlu1 %v3528_v50, %s2522_s25 }
 0x3d2   : > { %v3534_v12 = vpop.permute.xlu0 %1252  ;;  %v3536_v9 = vpop.permute.xlu1 %1250 }
 0x3d3   : > { %5115 = vst [vmem:[#allocation166_spill] sm:$0xff] %v3534_v12  ;;  %5116 = vst [vmem:[#allocation167_spill] sm:$0xff] %v3536_v9  ;;  %1348 = vrot.lane.b32.xlu0 %v3534_v12, %s2522_s25  ;;  %1346 = vrot.lane.b32.xlu1 %v3536_v9, %s2522_s25 }
 0x3d6   : > { %v3542_v13 = vpop.permute.xlu0 %1208  ;;  %v3544_v10 = vpop.permute.xlu1 %1206 }
 0x3d7   : > { %5117 = vst [vmem:[#allocation168_spill] sm:$0xff] %v3542_v13  ;;  %5118 = vst [vmem:[#allocation169_spill] sm:$0xff] %v3544_v10  ;;  %1304 = vrot.lane.b32.xlu0 %v3542_v13, %s2522_s25  ;;  %1302 = vrot.lane.b32.xlu1 %v3544_v10, %s2522_s25 }
 0x3da   : > { %v3550_v50 = vpop.permute.xlu1 %1254 }
 0x3db   : > { %5119 = vst [vmem:[#allocation170_spill] sm:$0xff] %v3550_v50  ;;  %1350 = vrot.lane.b32.xlu1 %v3550_v50, %s2522_s25 }
 0x3de   : > { %v3554_v4 = vpop.permute.xlu0 %1212  ;;  %v3556_v12 = vpop.permute.xlu1 %1210 }
 0x3df   : > { %5120 = vst [vmem:[#allocation171_spill] sm:$0xff] %v3554_v4  ;;  %5121 = vst [vmem:[#allocation172_spill] sm:$0xff] %v3556_v12  ;;  %1308 = vrot.lane.b32.xlu0 %v3554_v4, %s2522_s25  ;;  %1306 = vrot.lane.b32.xlu1 %v3556_v12, %s2522_s25 }
 0x3e2   : > { %v3562_v9 = vpop.permute.xlu1 %1214 }
 0x3e3   : > { %5122 = vst [vmem:[#allocation173_spill] sm:$0xff] %v3562_v9  ;;  %1310 = vrot.lane.b32.xlu1 %v3562_v9, %s2522_s25 }
 0x3e6   : > { %v3566_v10 = vpop.permute.xlu0 %1216 }
 0x3e7   : > { %5123 = vst [vmem:[#allocation174_spill] sm:$0xff] %v3566_v10  ;;  %1312 = vrot.lane.b32.xlu0 %v3566_v10, %s2522_s25 }
 0x3ea   : > { %v3570_v50 = vpop.permute.xlu1 %1218 }
 0x3eb   : > { %5124 = vst [vmem:[#allocation175_spill] sm:$0xff] %v3570_v50  ;;  %1314 = vrot.lane.b32.xlu1 %v3570_v50, %s2522_s25 }
 0x3ee   : > { %v3574_v13 = vpop.permute.xlu0 %1220 }
 0x3ef   : > { %5125 = vst [vmem:[#allocation176_spill] sm:$0xff] %v3574_v13  ;;  %1316 = vrot.lane.b32.xlu0 %v3574_v13, %s2522_s25 }
 0x3f2   : > { %v3578_v12 = vpop.permute.xlu1 %1222 }
 0x3f3   : > { %5126 = vst [vmem:[#allocation177_spill] sm:$0xff] %v3578_v12  ;;  %1318 = vrot.lane.b32.xlu1 %v3578_v12, %s2522_s25 }
 0x3f6   : > { %v3582_v9 = vpop.permute.xlu0 %1224 }
 0x3f7   : > { %5127 = vst [vmem:[#allocation178_spill] sm:$0xff] %v3582_v9  ;;  %1320 = vrot.lane.b32.xlu0 %v3582_v9, %s2522_s25 }
 0x3fa   : > { %v3586_v10 = vpop.permute.xlu1 %1226 }
 0x3fb   : > { %5128 = vst [vmem:[#allocation179_spill] sm:$0xff] %v3586_v10  ;;  %1322 = vrot.lane.b32.xlu1 %v3586_v10, %s2522_s25 }
 0x3fe   : > { %v3590_v50 = vpop.permute.xlu0 %1228 }
 0x3ff   : > { %5129 = vst [vmem:[#allocation180_spill] sm:$0xff] %v3590_v50  ;;  %1324 = vrot.lane.b32.xlu0 %v3590_v50, %s2522_s25 }
 0x402   : > { %v3594_v13 = vpop.permute.xlu1 %1230 }
 0x403   : > { %5130 = vst [vmem:[#allocation181_spill] sm:$0xff] %v3594_v13  ;;  %1326 = vrot.lane.b32.xlu1 %v3594_v13, %s2522_s25 }
 0x406   : > { %v3598_v12 = vpop.permute.xlu0 %1232 }
 0x407   : > { %5131 = vst [vmem:[#allocation182_spill] sm:$0xff] %v3598_v12  ;;  %1328 = vrot.lane.b32.xlu0 %v3598_v12, %s2522_s25 }
 0x40a   : > { %v3602_v9 = vpop.permute.xlu1 %1234 }
 0x40b   : > { %5132 = vst [vmem:[#allocation183_spill] sm:$0xff] %v3602_v9  ;;  %1330 = vrot.lane.b32.xlu1 %v3602_v9, %s2522_s25 }
 0x40e   : > { %v3606_v10 = vpop.permute.xlu0 %1236 }
 0x40f   : > { %1332 = vrot.lane.b32.xlu0 %v3606_v10, %s2522_s25 }
 0x412   : > { %v3610_v50 = vpop.permute.xlu1 %1238 }
 0x413   : > { %1334 = vrot.lane.b32.xlu1 %v3610_v50, %s2522_s25 }
 0x429   : > { %v3614_v13 = vpop.permute.xlu0 %1288 }
 0x42a   : > { %1384 = vrot.lane.b32.xlu0 %v3614_v13, %s2522_s25 }
 0x42d   : > { %v3618_v12 = vpop.permute.xlu0 %1336 }
 0x42e   : > { %5133 = vst [vmem:[#allocation184_spill] sm:$0xff] %v3618_v12  ;;  %1432 = vrot.lane.b32.xlu0 %v3618_v12, %s2522_s25 }
 0x431   : > { %v3622_v9 = vpop.permute.xlu0 %1292  ;;  %v3624_v4 = vpop.permute.xlu1 %1290 }
 0x432   : > { %1388 = vrot.lane.b32.xlu0 %v3622_v9, %s2522_s25  ;;  %1386 = vrot.lane.b32.xlu1 %v3624_v4, %s2522_s25 }
 0x435   : > { %v3630_v11 = vpop.permute.xlu0 %1340  ;;  %v3632_v48 = vpop.permute.xlu1 %1338 }
 0x436   : > { %5134 = vst [vmem:[#allocation185_spill] sm:$0xff] %v3630_v11  ;;  %5135 = vst [vmem:[#allocation186_spill] sm:$0xff] %v3632_v48  ;;  %1436 = vrot.lane.b32.xlu0 %v3630_v11, %s2522_s25  ;;  %1434 = vrot.lane.b32.xlu1 %v3632_v48, %s2522_s25 }
 0x439   : > { %v3638_v12 = vpop.permute.xlu0 %1296  ;;  %v3640_v24 = vpop.permute.xlu1 %1294 }
 0x43a   : > { %5136 = vst [vmem:[#allocation187_spill] sm:$0xff] %v3638_v12  ;;  %5137 = vst [vmem:[#allocation188_spill] sm:$0xff] %v3640_v24  ;;  %1392 = vrot.lane.b32.xlu0 %v3638_v12, %s2522_s25  ;;  %1390 = vrot.lane.b32.xlu1 %v3640_v24, %s2522_s25 }
 0x43d   : > { %v3646_v31 = vpop.permute.xlu0 %1344  ;;  %v3648_v40 = vpop.permute.xlu1 %1342 }
 0x43e   : > { %5138 = vst [vmem:[#allocation189_spill] sm:$0xff] %v3646_v31  ;;  %5139 = vst [vmem:[#allocation190_spill] sm:$0xff] %v3648_v40  ;;  %1440 = vrot.lane.b32.xlu0 %v3646_v31, %s2522_s25  ;;  %1438 = vrot.lane.b32.xlu1 %v3648_v40, %s2522_s25 }
 0x441   : > { %v3654_v11 = vpop.permute.xlu0 %1300  ;;  %v3656_v48 = vpop.permute.xlu1 %1298 }
 0x442   : > { %5140 = vst [vmem:[#allocation191_spill] sm:$0xff] %v3654_v11  ;;  %5141 = vst [vmem:[#allocation192_spill] sm:$0xff] %v3656_v48  ;;  %1396 = vrot.lane.b32.xlu0 %v3654_v11, %s2522_s25  ;;  %1394 = vrot.lane.b32.xlu1 %v3656_v48, %s2522_s25 }
 0x445   : > { %v3662_v24 = vpop.permute.xlu0 %1348  ;;  %v3664_v12 = vpop.permute.xlu1 %1346 }
 0x446   : > { %5142 = vst [vmem:[#allocation193_spill] sm:$0xff] %v3662_v24  ;;  %5143 = vst [vmem:[#allocation194_spill] sm:$0xff] %v3664_v12  ;;  %1442 = vrot.lane.b32.xlu1 %v3664_v12, %s2522_s25 }
 0x449   : > { %v3668_v31 = vpop.permute.xlu0 %1304  ;;  %v3670_v40 = vpop.permute.xlu1 %1302 }
 0x44a   : > { %5144 = vst [vmem:[#allocation195_spill] sm:$0xff] %v3668_v31  ;;  %5145 = vst [vmem:[#allocation196_spill] sm:$0xff] %v3670_v40  ;;  %1400 = vrot.lane.b32.xlu0 %v3668_v31, %s2522_s25  ;;  %1398 = vrot.lane.b32.xlu1 %v3670_v40, %s2522_s25 }
 0x44d   : > { %v3676_v11 = vpop.permute.xlu1 %1350 }
 0x44e   : > { %5146 = vst [vmem:[#allocation197_spill] sm:$0xff] %v3676_v11 }
 0x451   : > { %v3678_v48 = vpop.permute.xlu0 %1308  ;;  %v3680_v17 = vpop.permute.xlu1 %1306 }
 0x452   : > { %5147 = vst [vmem:[#allocation198_spill] sm:$0xff] %v3678_v48  ;;  %5148 = vst [vmem:[#allocation199_spill] sm:$0xff] %v3680_v17  ;;  %1404 = vrot.lane.b32.xlu0 %v3678_v48, %s2522_s25  ;;  %1402 = vrot.lane.b32.xlu1 %v3680_v17, %s2522_s25 }
 0x455   : > { %v3686_v12 = vpop.permute.xlu1 %1310 }
 0x456   : > { %5149 = vst [vmem:[#allocation200_spill] sm:$0xff] %v3686_v12  ;;  %1406 = vrot.lane.b32.xlu1 %v3686_v12, %s2522_s25 }
 0x459   : > { %v3690_v31 = vpop.permute.xlu0 %1312 }
 0x45a   : > { %5150 = vst [vmem:[#allocation201_spill] sm:$0xff] %v3690_v31  ;;  %1408 = vrot.lane.b32.xlu0 %v3690_v31, %s2522_s25 }
 0x45d   : > { %v3694_v40 = vpop.permute.xlu1 %1314 }
 0x45e   : > { %5151 = vst [vmem:[#allocation202_spill] sm:$0xff] %v3694_v40  ;;  %1410 = vrot.lane.b32.xlu1 %v3694_v40, %s2522_s25 }
 0x461   : > { %v3698_v21 = vpop.permute.xlu0 %1316 }
 0x462   : > { %5152 = vst [vmem:[#allocation203_spill] sm:$0xff] %v3698_v21  ;;  %1412 = vrot.lane.b32.xlu0 %v3698_v21, %s2522_s25 }
 0x465   : > { %v3702_v17 = vpop.permute.xlu1 %1318 }
 0x466   : > { %5153 = vst [vmem:[#allocation204_spill] sm:$0xff] %v3702_v17  ;;  %1414 = vrot.lane.b32.xlu1 %v3702_v17, %s2522_s25 }
 0x469   : > { %v3706_v12 = vpop.permute.xlu0 %1320 }
 0x46a   : > { %5154 = vst [vmem:[#allocation205_spill] sm:$0xff] %v3706_v12  ;;  %1416 = vrot.lane.b32.xlu0 %v3706_v12, %s2522_s25 }
 0x46d   : > { %v3710_v31 = vpop.permute.xlu1 %1322 }
 0x46e   : > { %5155 = vst [vmem:[#allocation206_spill] sm:$0xff] %v3710_v31  ;;  %1418 = vrot.lane.b32.xlu1 %v3710_v31, %s2522_s25 }
 0x471   : > { %v3714_v40 = vpop.permute.xlu0 %1324 }
 0x472   : > { %5156 = vst [vmem:[#allocation207_spill] sm:$0xff] %v3714_v40  ;;  %1420 = vrot.lane.b32.xlu0 %v3714_v40, %s2522_s25 }
 0x475   : > { %v3718_v21 = vpop.permute.xlu1 %1326 }
 0x476   : > { %5157 = vst [vmem:[#allocation208_spill] sm:$0xff] %v3718_v21  ;;  %1422 = vrot.lane.b32.xlu1 %v3718_v21, %s2522_s25 }
 0x479   : > { %v3722_v17 = vpop.permute.xlu0 %1328 }
 0x47a   : > { %5158 = vst [vmem:[#allocation209_spill] sm:$0xff] %v3722_v17  ;;  %1424 = vrot.lane.b32.xlu0 %v3722_v17, %s2522_s25 }
 0x47d   : > { %v3726_v12 = vpop.permute.xlu1 %1330 }
 0x47e   : > { %5159 = vst [vmem:[#allocation210_spill] sm:$0xff] %v3726_v12  ;;  %1426 = vrot.lane.b32.xlu1 %v3726_v12, %s2522_s25 }
 0x481   : > { %v3730_v31 = vpop.permute.xlu0 %1332 }
 0x482   : > { %1428 = vrot.lane.b32.xlu0 %v3730_v31, %s2522_s25 }
 0x485   : > { %v3734_v40 = vpop.permute.xlu1 %1334 }
 0x486   : > { %1444 = vrot.lane.b32.xlu0 %v3662_v24, %s2522_s25  ;;  %1430 = vrot.lane.b32.xlu1 %v3734_v40, %s2522_s25 }
 0x48a   : > { %1446 = vrot.lane.b32.xlu1 %v3676_v11, %s2522_s25 }
 0x49c   : > { %v3742_v17 = vpop.permute.xlu0 %1384 }
 0x49d   : > { %1480 = vrot.lane.b32.xlu0 %v3742_v17, %s2522_s25 }
 0x4a0   : > { %v3746_v12 = vpop.permute.xlu0 %1432 }
 0x4a1   : > { %5160 = vst [vmem:[#allocation211_spill] sm:$0xff] %v3746_v12  ;;  %1528 = vrot.lane.b32.xlu0 %v3746_v12, %s2522_s25 }
 0x4a4   : > { %v3750_v21 = vpop.permute.xlu0 %1388  ;;  %v3752_v48 = vpop.permute.xlu1 %1386 }
 0x4a5   : > { %5161 = vst [vmem:[#allocation212_spill] sm:$0xff] %v3752_v48  ;;  %1484 = vrot.lane.b32.xlu0 %v3750_v21, %s2522_s25  ;;  %1482 = vrot.lane.b32.xlu1 %v3752_v48, %s2522_s25 }
 0x4a8   : > { %v3758_v11 = vpop.permute.xlu0 %1436  ;;  %v3760_v24 = vpop.permute.xlu1 %1434 }
 0x4a9   : > { %5162 = vst [vmem:[#allocation213_spill] sm:$0xff] %v3758_v11  ;;  %5163 = vst [vmem:[#allocation214_spill] sm:$0xff] %v3760_v24  ;;  %1530 = vrot.lane.b32.xlu1 %v3760_v24, %s2522_s25 }
 0x4ac   : > { %v3764_v60 = vpop.permute.xlu0 %1392  ;;  %v3766_v12 = vpop.permute.xlu1 %1390 }
 0x4ad   : > { %5164 = vst [vmem:[#allocation215_spill] sm:$0xff] %v3764_v60  ;;  %5165 = vst [vmem:[#allocation216_spill] sm:$0xff] %v3766_v12  ;;  %1488 = vrot.lane.b32.xlu0 %v3764_v60, %s2522_s25  ;;  %1486 = vrot.lane.b32.xlu1 %v3766_v12, %s2522_s25 }
 0x4b0   : > { %v3772_v58 = vpop.permute.xlu0 %1440  ;;  %v3774_v18 = vpop.permute.xlu1 %1438 }
 0x4b1   : > { %5166 = vst [vmem:[#allocation217_spill] sm:$0xff] %v3772_v58  ;;  %5167 = vst [vmem:[#allocation218_spill] sm:$0xff] %v3774_v18 }
 0x4b4   : > { %v3776_v46 = vpop.permute.xlu0 %1396  ;;  %v3778_v5 = vpop.permute.xlu1 %1394 }
 0x4b5   : > { %5168 = vst [vmem:[#allocation219_spill] sm:$0xff] %v3776_v46  ;;  %5169 = vst [vmem:[#allocation220_spill] sm:$0xff] %v3778_v5  ;;  %1492 = vrot.lane.b32.xlu0 %v3776_v46, %s2522_s25  ;;  %1490 = vrot.lane.b32.xlu1 %v3778_v5, %s2522_s25 }
 0x4b8   : > { %v3784_v24 = vpop.permute.xlu1 %1442 }
 0x4b9   : > { %5170 = vst [vmem:[#allocation221_spill] sm:$0xff] %v3784_v24 }
 0x4bc   : > { %v3786_v60 = vpop.permute.xlu0 %1400  ;;  %v3788_v7 = vpop.permute.xlu1 %1398 }
 0x4bd   : > { %5171 = vst [vmem:[#allocation222_spill] sm:$0xff] %v3786_v60  ;;  %5172 = vst [vmem:[#allocation223_spill] sm:$0xff] %v3788_v7  ;;  %1496 = vrot.lane.b32.xlu0 %v3786_v60, %s2522_s25  ;;  %1494 = vrot.lane.b32.xlu1 %v3788_v7, %s2522_s25 }
 0x4c4   : > { %v3794_v12 = vpop.permute.xlu0 %1404  ;;  %v3796_v1 = vpop.permute.xlu1 %1402 }
 0x4c5   : > { %5173 = vst [vmem:[#allocation224_spill] sm:$0xff] %v3794_v12  ;;  %5174 = vst [vmem:[#allocation225_spill] sm:$0xff] %v3796_v1  ;;  %1500 = vrot.lane.b32.xlu0 %v3794_v12, %s2522_s25  ;;  %1498 = vrot.lane.b32.xlu1 %v3796_v1, %s2522_s25 }
 0x4c8   : > { %v3802_v5 = vpop.permute.xlu1 %1406 }
 0x4c9   : > { %5175 = vst [vmem:[#allocation226_spill] sm:$0xff] %v3802_v5  ;;  %1502 = vrot.lane.b32.xlu1 %v3802_v5, %s2522_s25 }
 0x4cc   : > { %v3806_v46 = vpop.permute.xlu0 %1408 }
 0x4cd   : > { %5176 = vst [vmem:[#allocation227_spill] sm:$0xff] %v3806_v46  ;;  %1504 = vrot.lane.b32.xlu0 %v3806_v46, %s2522_s25 }
 0x4d0   : > { %v3810_v7 = vpop.permute.xlu1 %1410 }
 0x4d1   : > { %5177 = vst [vmem:[#allocation228_spill] sm:$0xff] %v3810_v7  ;;  %1506 = vrot.lane.b32.xlu1 %v3810_v7, %s2522_s25 }
 0x4d4   : > { %v3814_v60 = vpop.permute.xlu0 %1412 }
 0x4d5   : > { %5178 = vst [vmem:[#allocation229_spill] sm:$0xff] %v3814_v60  ;;  %1508 = vrot.lane.b32.xlu0 %v3814_v60, %s2522_s25  ;;  %v798_v60 = vmax.f32 %v2838_v41, %v2966_v42 }
 0x4d8   : > { %v3818_v1 = vpop.permute.xlu1 %1414 }
 0x4d9   : > { %5179 = vst [vmem:[#allocation230_spill] sm:$0xff] %v3818_v1  ;;  %1510 = vrot.lane.b32.xlu1 %v3818_v1, %s2522_s25  ;;  %v894_v1 = vmax.f32 %v798_v60, %v3094_v33 }
 0x4dc   : > { %v3822_v5 = vpop.permute.xlu0 %1416 }
 0x4dd   : > { %5180 = vst [vmem:[#allocation231_spill] sm:$0xff] %v3822_v5  ;;  %1512 = vrot.lane.b32.xlu0 %v3822_v5, %s2522_s25  ;;  %v799_v5 = vmax.f32 %v2842_v43, %v2970_v44  ;;  %v777_v44 = vmax.f32 %v2724_v49, %v2856_v52 }
 0x4df   : > { %v895_v48 = vmax.f32 %v799_v5, %v3098_v37 }
 0x4e0   : > { %v3826_v46 = vpop.permute.xlu1 %1418 }
 0x4e1   : > { %5181 = vst [vmem:[#allocation232_spill] sm:$0xff] %v3826_v46  ;;  %1514 = vrot.lane.b32.xlu1 %v3826_v46, %s2522_s25  ;;  %v990_v46 = vmax.f32 %v894_v1, %v3222_v6  ;;  %v991_v41 = vmax.f32 %v895_v48, %v3226_v27 }
 0x4e3   : > { %v1087_v42 = vmax.f32 %v991_v41, %v3354_v28 }
 0x4e4   : > { %v3830_v7 = vpop.permute.xlu0 %1420 }
 0x4e5   : > { %5182 = vst [vmem:[#allocation233_spill] sm:$0xff] %v3830_v7  ;;  %1516 = vrot.lane.b32.xlu0 %v3830_v7, %s2522_s25  ;;  %v1086_v7 = vmax.f32 %v990_v46, %v3350_v20  ;;  %v1183_v1 = vmax.f32 %v1087_v42, %v3482_v39  ;;  %v2453_v20 = vld [vmem:[%s4717_s3 + $0x28] sm:$0xff]   ;;  %v873_v42 = vmax.f32 %v777_v44, %v2984_v0 }
 0x4e7   : > { %v1182_v33 = vmax.f32 %v1086_v7, %v3478_v15  ;;  %v1279_v6 = vmax.f32 %v1183_v1, %v3610_v50  ;;  %v2452_v50 = vld [vmem:[%s4717_s3 + $0x30] sm:$0xff]  }
 0x4e8   : > { %v3836_v12 = vpop.permute.xlu1 %1422 }
 0x4e9   : > { %1518 = vrot.lane.b32.xlu1 %v3836_v12, %s2522_s25  ;;  %v1278_v43 = vmax.f32 %v1182_v33, %v3606_v10  ;;  %v1375_v15 = vmax.f32 %v1279_v6, %v3734_v40  ;;  %v2451_v10 = vld [vmem:[%s4717_s3 + $0x38] sm:$0xff]  }
 0x4ea   : > { %2276 = vmatprep.subr.bf16.mxu1 %v2451_v10 }
 0x4eb   : > { %v1374_v46 = vmax.f32 %v1278_v43, %v3730_v31  ;;  %2277 = vmatpush3.bf16.msra.mxu1 %v2451_v10  ;;  %v776_v31 = vmax.f32 %v2718_v45, %v2846_v47  ;;  %v1672_v47 = vlaneseq  ;;  %v2455_v43 = vld [vmem:[%s4717_s3 + $0x18] sm:$0xff]   ;;  %v5184_v10 = vld [vmem:[#allocation35_spill] sm:$0xff] }
 0x4ec   : > { %v3844_v3 = vpop.permute.xlu0 %1424  ;;  %2278 = vmatprep.subr.bf16.mxu1 %v2452_v50 }
 0x4ed   : > { %1520 = vrot.lane.b32.xlu0 %v3844_v3, %s2522_s25  ;;  %v872_v7 = vmax.f32 %v776_v31, %v2974_v2  ;;  %v2454_v2 = vld [vmem:[%s4717_s3 + $0x20] sm:$0xff]   ;;  %v3912_v1 = vand.u32 127, %v1672_v47  ;;  %v5187_v31 = vld [vmem:[#allocation12_spill] sm:$0xff] }
 0x4ee   : > { %v5190_v47 = vld [vmem:[#allocation60_spill] sm:$0xff] }
 0x4ef   : > { %2279 = vmatpush3.bf16.msra.mxu1 %v2452_v50  ;;  %v968_v28 = vmax.f32 %v872_v7, %v3102_v38  ;;  %v778_v38 = vmax.f32 %v2732_v53, %v2858_v55  ;;  %v969_v53 = vmax.f32 %v873_v42, %v3112_v34  ;;  %v780_v34 = vmax.f32 %v2748_v61, %v2874_v63  ;;  %v5188_v7 = vld [vmem:[#allocation133_spill] sm:$0xff] }
 0x4f0   : > { %v3852_v60 = vpop.permute.xlu1 %1426  ;;  %2280 = vmatprep.subr.bf16.mxu1 %v2453_v20  ;;  %vm1674_vm1 = vcmp.lt.s32.totalorder %v3912_v1, 84  ;;  %vm1707_vm2 = vcmp.lt.s32.totalorder %v3912_v1, 44 }
 0x4f1   : > { %1522 = vrot.lane.b32.xlu1 %v3852_v60, %s2522_s25  ;;  %v1064_v45 = vmax.f32 %v968_v28, %v3230_v25  ;;  %v874_v33 = vmax.f32 %v778_v38, %v2982_v62  ;;  %v1065_v55 = vmax.f32 %v969_v53, %v3240_v23  ;;  %v5191_v38 = vld [vmem:[#allocation61_spill] sm:$0xff] }
 0x4f3   : > { %2281 = vmatpush3.bf16.msra.mxu1 %v2453_v20  ;;  %v1160_v41 = vmax.f32 %v1064_v45, %v3358_v14  ;;  %v970_v49 = vmax.f32 %v874_v33, %v3110_v36  ;;  %v2456_v14 = vld [vmem:[%s4717_s3 + $0x10] sm:$0xff]   ;;  %v1161_v23 = vmax.f32 %v1065_v55, %v3368_v19  ;;  %v2457_v19 = vld [vmem:[%s4717_s3 + $0x8] sm:$0xff]   ;;  %v5192_v33 = vld [vmem:[#allocation160_spill] sm:$0xff] }
 0x4f4   : > { %v1429_v5 = vpop.permute.xlu0 %1428  ;;  %2282 = vmatprep.subr.bf16.mxu1 %v2454_v2 }
 0x4f5   : > { %v3861_v37 = vmax.f32 %v1374_v46, %v1429_v5  ;;  %1524 = vrot.lane.b32.xlu0 %v1429_v5, %s2522_s25  ;;  %v1256_v25 = vmax.f32 %v1160_v41, %v3486_v16  ;;  %v1066_v62 = vmax.f32 %v970_v49, %v3238_v51  ;;  %v779_v16 = vmax.f32 %v2740_v57, %v2866_v59 }
 0x4f6   : > { %v1257_v61 = vmax.f32 %v1161_v23, %v3496_v29  ;;  %v5198_v23 = vld [vmem:[#allocation110_spill] sm:$0xff] }
 0x4f7   : > { %2283 = vmatpush3.bf16.msra.mxu1 %v2454_v2  ;;  %v1352_v52 = vmax.f32 %v1256_v25, %v3614_v13  ;;  %v1162_v51 = vmax.f32 %v1066_v62, %v3366_v30  ;;  %v875_v46 = vmax.f32 %v779_v16, %v3000_v56  ;;  %v5193_v25 = vld [vmem:[#allocation161_spill] sm:$0xff]  ;;  %v5196_v16 = vld [vmem:[#allocation187_spill] sm:$0xff] }
 0x4f8   : > { %v1431_v27 = vpop.permute.xlu1 %1430  ;;  %v3882_v39 = vpop.permute.xlu0 %1444  ;;  %2284 = vmatprep.subr.bf16.mxu1 %v2455_v43  ;;  %v1353_v29 = vmax.f32 %v1257_v61, %v3624_v4  ;;  %v5200_v61 = vld [vmem:[#allocation215_spill] sm:$0xff] }
 0x4f9   : > { %v3865_v48 = vmax.f32 %v1375_v15, %v1431_v27  ;;  %1532 = vrot.lane.b32.xlu0 %v3758_v11, %s2522_s25  ;;  %1526 = vrot.lane.b32.xlu1 %v1431_v27, %s2522_s25  ;;  %v1448_v0 = vmax.f32 %v1352_v52, %v3742_v17  ;;  %v876_v17 = vmax.f32 %v780_v34, %v2998_v54  ;;  %v5183_v15 = vld [vmem:[#allocation212_spill] sm:$0xff]  ;;  %v5194_v52 = vld [vmem:[#allocation85_spill] sm:$0xff] }
 0x4fa   : > { %v1258_v57 = vmax.f32 %v1162_v51, %v3494_v22  ;;  %v971_v54 = vmax.f32 %v875_v46, %v3128_v32  ;;  %v1449_v27 = vmax.f32 %v1353_v29, %v5183_v15  ;;  %v5185_v32 = vld [vmem:[#allocation10_spill] sm:$0xff]  ;;  %v5199_v46 = vld [vmem:[#allocation111_spill] sm:$0xff]  ;;  %v5325_v11 = vld [vmem:[#allocation232_spill] sm:$0xff] }
 0x4fb   : > { %2285 = vmatpush3.bf16.msra.mxu1 %v2455_v43  ;;  %v972_v63 = vmax.f32 %v876_v17, %v3126_v35  ;;  %v2458_v35 = vld [vmem:[%s4717_s3] sm:$0xff]   ;;  %v781_v50 = vmax.f32 %v5185_v32, %v5184_v10  ;;  %v5203_v29 = vld [vmem:[#allocation14_spill] sm:$0xff] }
 0x4fc   : > { %v3893_v40 = vpop.permute.xlu1 %1446  ;;  %2286 = vmatprep.subr.bf16.mxu1 %v2456_v14  ;;  %v1354_v56 = vmax.f32 %v1258_v57, %v3622_v9  ;;  %v1067_v5 = vmax.f32 %v971_v54, %v3256_v8  ;;  %v5186_v9 = vld [vmem:[#allocation37_spill] sm:$0xff]  ;;  %v5189_v8 = vld [vmem:[#allocation134_spill] sm:$0xff] }
 0x4fd   : > { %1536 = vrot.lane.b32.xlu0 %v3772_v58, %s2522_s25  ;;  %1534 = vrot.lane.b32.xlu1 %v3774_v18, %s2522_s25  ;;  %v1068_v22 = vmax.f32 %v972_v63, %v3254_v26  ;;  %v782_v4 = vmax.f32 %v5187_v31, %v5186_v9  ;;  %v877_v41 = vmax.f32 %v781_v50, %v5191_v38  ;;  %v5201_v63 = vld [vmem:[#allocation216_spill] sm:$0xff]  ;;  %v5207_v50 = vld [vmem:[#allocation138_spill] sm:$0xff]  ;;  %v5314_v18 = vld [vmem:[#allocation231_spill] sm:$0xff] }
 0x4fe   : > { %v1450_v6 = vmax.f32 %v1354_v56, %v3750_v21  ;;  %v1163_v45 = vmax.f32 %v1067_v5, %v5189_v8  ;;  %v5202_v56 = vld [vmem:[#allocation39_spill] sm:$0xff]  ;;  %v5204_v5 = vld [vmem:[#allocation40_spill] sm:$0xff] }
 0x4ff   : > { %2287 = vmatpush3.bf16.msra.mxu1 %v2456_v14  ;;  %v1164_v20 = vmax.f32 %v1068_v22, %v5188_v7  ;;  %v878_v44 = vmax.f32 %v782_v4, %v5190_v47  ;;  %v783_v22 = vmax.f32 %v5203_v29, %v5202_v56  ;;  %v5208_v7 = vld [vmem:[#allocation64_spill] sm:$0xff]  ;;  %v5211_v47 = vld [vmem:[#allocation165_spill] sm:$0xff]  ;;  %v5223_v56 = vld [vmem:[#allocation18_spill] sm:$0xff] }
 0x500   : > { %2288 = vmatprep.subr.bf16.mxu1 %v2457_v19  ;;  %v1259_v43 = vmax.f32 %v1163_v45, %v5193_v25  ;;  %v5210_v8 = vld [vmem:[#allocation164_spill] sm:$0xff]  ;;  %v5213_v25 = vld [vmem:[#allocation90_spill] sm:$0xff] }
 0x501   : > { %1540 = vrot.lane.b32.xlu0 %v3882_v39, %s2522_s25  ;;  %1538 = vrot.lane.b32.xlu1 %v3784_v24, %s2522_s25  ;;  %v1260_v42 = vmax.f32 %v1164_v20, %v5192_v33  ;;  %v974_v62 = vmax.f32 %v878_v44, %v5194_v52  ;;  %v5212_v33 = vld [vmem:[#allocation89_spill] sm:$0xff]  ;;  %v5214_v52 = vld [vmem:[#allocation191_spill] sm:$0xff] }
 0x503   : > { %2289 = vmatpush3.bf16.msra.mxu1 %v2457_v19  ;;  %v1356_v34 = vmax.f32 %v1260_v42, %v5196_v16  ;;  %v1070_v17 = vmax.f32 %v974_v62, %v5198_v23  ;;  %v5216_v16 = vld [vmem:[#allocation114_spill] sm:$0xff]  ;;  %v5218_v23 = vld [vmem:[#allocation219_spill] sm:$0xff] }
 0x504   : > { %2290 = vmatprep.subr.bf16.mxu1 %v2458_v35 }
 0x505   : > { %1542 = vrot.lane.b32.xlu1 %v3893_v40, %s2522_s25  ;;  %v1452_v19 = vmax.f32 %v1356_v34, %v5200_v61  ;;  %v5220_v61 = vld [vmem:[#allocation42_spill] sm:$0xff] }
 0x507   : > { %2291 = vmatpush3.bf16.msra.mxu1 %v2458_v35 }
 0x50f   : > { %v1481_v13 = vpop.permute.xlu0 %1480 }
 0x510   : > { %v3930_v36 = vmax.f32 %v1448_v0, %v1481_v13  ;;  %1576 = vrot.lane.b32.xlu0 %v1481_v13, %s2522_s25  ;;  %v5197_v13 = vld [vmem:[#allocation188_spill] sm:$0xff] }
 0x511   : > { %v1355_v51 = vmax.f32 %v1259_v43, %v5197_v13  ;;  %v5217_v13 = vld [vmem:[#allocation115_spill] sm:$0xff] }
 0x512   : > { %v3940_v59 = vsel %vm1674_vm1, %v3930_v36, %v1448_v0  ;;  %v5195_v0 = vld [vmem:[#allocation86_spill] sm:$0xff] }
 0x513   : > { %v3946_v30 = vpop.permute.xlu0 %1528  ;;  %v973_v14 = vmax.f32 %v877_v41, %v5195_v0  ;;  %v1451_v54 = vmax.f32 %v1355_v51, %v5201_v63  ;;  %v5215_v0 = vld [vmem:[#allocation192_spill] sm:$0xff] }
 0x515   : > { %v1069_v57 = vmax.f32 %v973_v14, %v5199_v46  ;;  %v5219_v46 = vld [vmem:[#allocation220_spill] sm:$0xff] }
 0x517   : > { %v1485_v26 = vpop.permute.xlu0 %1484  ;;  %v1483_v28 = vpop.permute.xlu1 %1482  ;;  %v1165_v9 = vmax.f32 %v1069_v57, %v5207_v50  ;;  %v5226_v50 = vld [vmem:[#allocation67_spill] sm:$0xff] }
 0x518   : > { %v3964_v21 = vmax.f32 %v1450_v6, %v1485_v26  ;;  %v3966_v2 = vmax.f32 %v1449_v27, %v1483_v28  ;;  %1580 = vrot.lane.b32.xlu0 %v1485_v26, %s2522_s25  ;;  %1578 = vrot.lane.b32.xlu1 %v1483_v28, %s2522_s25  ;;  %v5209_v26 = vld [vmem:[#allocation65_spill] sm:$0xff] }
 0x519   : > { %v879_v28 = vmax.f32 %v783_v22, %v5209_v26  ;;  %v1261_v44 = vmax.f32 %v1165_v9, %v5211_v47  ;;  %v5224_v22 = vld [vmem:[#allocation141_spill] sm:$0xff]  ;;  %v5228_v26 = vld [vmem:[#allocation168_spill] sm:$0xff] }
 0x51a   : > { %v3977_v49 = vsel %vm1674_vm1, %v3964_v21, %v1450_v6  ;;  %v3982_v53 = vsel %vm1674_vm1, %v3966_v2, %v1449_v27  ;;  %v5205_v6 = vld [vmem:[#allocation16_spill] sm:$0xff]  ;;  %v5206_v27 = vld [vmem:[#allocation137_spill] sm:$0xff] }
 0x51b   : > { %v3985_v55 = vpop.permute.xlu1 %1530  ;;  %v784_v15 = vmax.f32 %v5205_v6, %v5204_v5  ;;  %v1166_v35 = vmax.f32 %v1070_v17, %v5206_v27  ;;  %v975_v43 = vmax.f32 %v879_v28, %v5213_v25  ;;  %v1357_v14 = vmax.f32 %v1261_v44, %v5215_v0  ;;  %v5225_v27 = vld [vmem:[#allocation142_spill] sm:$0xff] }
 0x51d   : > { %v880_v20 = vmax.f32 %v784_v15, %v5208_v7  ;;  %v1262_v45 = vmax.f32 %v1166_v35, %v5210_v8  ;;  %v1071_v51 = vmax.f32 %v975_v43, %v5217_v13  ;;  %v1453_v57 = vmax.f32 %v1357_v14, %v5219_v46  ;;  %v5227_v7 = vld [vmem:[#allocation68_spill] sm:$0xff]  ;;  %v5229_v8 = vld [vmem:[#allocation169_spill] sm:$0xff]  ;;  %v5234_v14 = vld [vmem:[#allocation195_spill] sm:$0xff] }
 0x51e   : > { %v5232_v43 = vld [vmem:[#allocation92_spill] sm:$0xff] }
 0x51f   : > { %v1489_v10 = vpop.permute.xlu0 %1488  ;;  %v1487_v32 = vpop.permute.xlu1 %1486  ;;  %v976_v42 = vmax.f32 %v880_v20, %v5212_v33  ;;  %v1358_v62 = vmax.f32 %v1262_v45, %v5214_v52  ;;  %v1167_v35 = vmax.f32 %v1071_v51, %v5225_v27  ;;  %v5230_v33 = vld [vmem:[#allocation44_spill] sm:$0xff]  ;;  %v5236_v51 = vld [vmem:[#allocation69_spill] sm:$0xff] }
 0x520   : > { %v4000_v31 = vmax.f32 %v1452_v19, %v1489_v10  ;;  %v4002_v4 = vmax.f32 %v1451_v54, %v1487_v32  ;;  %1584 = vrot.lane.b32.xlu0 %v1489_v10, %s2522_s25  ;;  %1582 = vrot.lane.b32.xlu1 %v1487_v32, %s2522_s25  ;;  %v5244_v27 = vld [vmem:[#allocation144_spill] sm:$0xff] }
 0x521   : > { %v1072_v34 = vmax.f32 %v976_v42, %v5216_v16  ;;  %v1454_v17 = vmax.f32 %v1358_v62, %v5218_v23  ;;  %v1263_v45 = vmax.f32 %v1167_v35, %v5229_v8  ;;  %v5231_v42 = vld [vmem:[#allocation19_spill] sm:$0xff]  ;;  %v5233_v62 = vld [vmem:[#allocation93_spill] sm:$0xff]  ;;  %v5246_v8 = vld [vmem:[#allocation70_spill] sm:$0xff] }
 0x522   : > { %v4013_v38 = vsel %vm1674_vm1, %v4000_v31, %v1452_v19  ;;  %v4018_v41 = vsel %vm1674_vm1, %v4002_v4, %v1451_v54  ;;  %v5221_v19 = vld [vmem:[#allocation17_spill] sm:$0xff]  ;;  %v5222_v54 = vld [vmem:[#allocation43_spill] sm:$0xff]  ;;  %v787_v25 = vmax.f32 %v5231_v42, %v5230_v33 }
 0x523   : > { %v785_v63 = vmax.f32 %v5221_v19, %v5220_v61  ;;  %v786_v29 = vmax.f32 %v5223_v56, %v5222_v54  ;;  %v1168_v5 = vmax.f32 %v1072_v34, %v5224_v22  ;;  %v5235_v34 = vld [vmem:[#allocation196_spill] sm:$0xff]  ;;  %v5238_v61 = vld [vmem:[#allocation118_spill] sm:$0xff]  ;;  %v5240_v54 = vld [vmem:[#allocation223_spill] sm:$0xff] }
 0x524   : > { %v1359_v13 = vmax.f32 %v1263_v45, %v5235_v34  ;;  %v883_v23 = vmax.f32 %v787_v25, %v5236_v51  ;;  %v5242_v22 = vld [vmem:[#allocation20_spill] sm:$0xff]  ;;  %v5247_v33 = vld [vmem:[#allocation119_spill] sm:$0xff]  ;;  %v5251_v34 = vld [vmem:[#allocation21_spill] sm:$0xff] }
 0x525   : > { %v882_v9 = vmax.f32 %v786_v29, %v5226_v50  ;;  %v881_v20 = vmax.f32 %v785_v63, %v5227_v7  ;;  %v1264_v28 = vmax.f32 %v1168_v5, %v5228_v26  ;;  %v5239_v63 = vld [vmem:[#allocation222_spill] sm:$0xff]  ;;  %v5241_v29 = vld [vmem:[#allocation45_spill] sm:$0xff]  ;;  %v5248_v25 = vld [vmem:[#allocation171_spill] sm:$0xff] }
 0x526   : > { %v1455_v56 = vmax.f32 %v1359_v13, %v5240_v54  ;;  %v788_v5 = vmax.f32 %v5242_v22, %v5241_v29  ;;  %v5245_v7 = vld [vmem:[#allocation145_spill] sm:$0xff]  ;;  %v5252_v51 = vld [vmem:[#allocation95_spill] sm:$0xff] }
 0x527   : > { %v1493_v6 = vpop.permute.xlu0 %1492  ;;  %v1491_v15 = vpop.permute.xlu1 %1490  ;;  %v978_v52 = vmax.f32 %v882_v9, %v5232_v43  ;;  %v977_v0 = vmax.f32 %v881_v20, %v5233_v62  ;;  %v1360_v16 = vmax.f32 %v1264_v28, %v5234_v14  ;;  %v5256_v29 = vld [vmem:[#allocation71_spill] sm:$0xff] }
 0x528   : > { %v4034_v10 = vmax.f32 %v1454_v17, %v1493_v6  ;;  %v4036_v32 = vmax.f32 %v1453_v57, %v1491_v15  ;;  %1588 = vrot.lane.b32.xlu0 %v1493_v6, %s2522_s25  ;;  %1586 = vrot.lane.b32.xlu1 %v1491_v15, %s2522_s25  ;;  %v5243_v6 = vld [vmem:[#allocation94_spill] sm:$0xff]  ;;  %v884_v45 = vmax.f32 %v788_v5, %v5246_v8  ;;  %v5263_v8 = vld [vmem:[#allocation96_spill] sm:$0xff] }
 0x529   : > { %v1073_v19 = vmax.f32 %v977_v0, %v5238_v61  ;;  %v979_v15 = vmax.f32 %v883_v23, %v5243_v6  ;;  %v5254_v61 = vld [vmem:[#allocation198_spill] sm:$0xff]  ;;  %v5258_v6 = vld [vmem:[#allocation173_spill] sm:$0xff] }
 0x52a   : > { %v4047_v47 = vsel %vm1674_vm1, %v4034_v10, %v1454_v17  ;;  %v4052_v44 = vsel %vm1674_vm1, %v4036_v32, %v1453_v57  ;;  %v5237_v17 = vld [vmem:[#allocation117_spill] sm:$0xff]  ;;  %v1456_v57 = vmax.f32 %v1360_v16, %v5239_v63  ;;  %v5250_v16 = vld [vmem:[#allocation46_spill] sm:$0xff]  ;;  %v980_v23 = vmax.f32 %v884_v45, %v5252_v51  ;;  %v5255_v63 = vld [vmem:[#allocation199_spill] sm:$0xff] }
 0x52b   : > { %v1074_v46 = vmax.f32 %v978_v52, %v5237_v17  ;;  %v1169_v20 = vmax.f32 %v1073_v19, %v5245_v7  ;;  %v1075_v42 = vmax.f32 %v979_v15, %v5247_v33  ;;  %v5249_v52 = vld [vmem:[#allocation172_spill] sm:$0xff]  ;;  %v789_v13 = vmax.f32 %v5251_v34, %v5250_v16  ;;  %v5253_v17 = vld [vmem:[#allocation146_spill] sm:$0xff]  ;;  %v5264_v33 = vld [vmem:[#allocation147_spill] sm:$0xff] }
 0x52c   : > { %v5262_v7 = vld [vmem:[#allocation22_spill] sm:$0xff] }
 0x52d   : > { %v1170_v35 = vmax.f32 %v1074_v46, %v5244_v27  ;;  %v1265_v62 = vmax.f32 %v1169_v20, %v5249_v52  ;;  %v1171_v46 = vmax.f32 %v1075_v42, %v5253_v17  ;;  %v885_v22 = vmax.f32 %v789_v13, %v5256_v29  ;;  %v5259_v27 = vld [vmem:[#allocation224_spill] sm:$0xff] }
 0x52e   : > { %v5265_v52 = vld [vmem:[#allocation200_spill] sm:$0xff] }
 0x52f   : > { %v1497_v50 = vpop.permute.xlu0 %1496  ;;  %v1495_v9 = vpop.permute.xlu1 %1494  ;;  %v1266_v43 = vmax.f32 %v1170_v35, %v5248_v25  ;;  %v1361_v54 = vmax.f32 %v1265_v62, %v5255_v63  ;;  %v1267_v15 = vmax.f32 %v1171_v46, %v5258_v6  ;;  %v5260_v35 = vld [vmem:[#allocation225_spill] sm:$0xff]  ;;  %v981_v45 = vmax.f32 %v885_v22, %v5263_v8  ;;  %v5266_v13 = vld [vmem:[#allocation72_spill] sm:$0xff]  ;;  %v5268_v46 = vld [vmem:[#allocation174_spill] sm:$0xff] }
 0x530   : > { %v4070_v26 = vmax.f32 %v1456_v57, %v1497_v50  ;;  %v4072_v28 = vmax.f32 %v1455_v56, %v1495_v9  ;;  %1592 = vrot.lane.b32.xlu0 %v1497_v50, %s2522_s25  ;;  %1590 = vrot.lane.b32.xlu1 %v1495_v9, %s2522_s25  ;;  %v5261_v9 = vld [vmem:[#allocation47_spill] sm:$0xff]  ;;  %v5270_v22 = vld [vmem:[#allocation48_spill] sm:$0xff] }
 0x531   : > { %v1362_v19 = vmax.f32 %v1266_v43, %v5254_v61  ;;  %v1457_v50 = vmax.f32 %v1361_v54, %v5260_v35  ;;  %v790_v20 = vmax.f32 %v5262_v7, %v5261_v9  ;;  %v1363_v62 = vmax.f32 %v1267_v15, %v5265_v52  ;;  %v5272_v15 = vld [vmem:[#allocation97_spill] sm:$0xff]  ;;  %v5273_v35 = vld [vmem:[#allocation148_spill] sm:$0xff] }
 0x532   : > { %v4083_v0 = vsel %vm1674_vm1, %v4070_v26, %v1456_v57  ;;  %v4088_v14 = vsel %vm1674_vm1, %v4072_v28, %v1455_v56  ;;  %v5257_v57 = vld [vmem:[#allocation120_spill] sm:$0xff]  ;;  %v5274_v7 = vld [vmem:[#allocation201_spill] sm:$0xff] }
 0x533   : > { %v1076_v5 = vmax.f32 %v980_v23, %v5257_v57  ;;  %v1458_v56 = vmax.f32 %v1362_v19, %v5259_v27  ;;  %v886_v51 = vmax.f32 %v790_v20, %v5266_v13  ;;  %v5267_v23 = vld [vmem:[#allocation121_spill] sm:$0xff]  ;;  %v5269_v19 = vld [vmem:[#allocation226_spill] sm:$0xff]  ;;  %v5271_v57 = vld [vmem:[#allocation23_spill] sm:$0xff] }
 0x534   : > { %v1077_v17 = vmax.f32 %v981_v45, %v5267_v23  ;;  %v1459_v63 = vmax.f32 %v1363_v62, %v5269_v19  ;;  %v5279_v13 = vld [vmem:[#allocation49_spill] sm:$0xff] }
 0x535   : > { %v1172_v42 = vmax.f32 %v1076_v5, %v5264_v33  ;;  %v791_v5 = vmax.f32 %v5271_v57, %v5270_v22  ;;  %v982_v27 = vmax.f32 %v886_v51, %v5272_v15  ;;  %v5276_v33 = vld [vmem:[#allocation122_spill] sm:$0xff]  ;;  %v5280_v51 = vld [vmem:[#allocation24_spill] sm:$0xff]  ;;  %v5282_v19 = vld [vmem:[#allocation149_spill] sm:$0xff] }
 0x536   : > { %v1173_v9 = vmax.f32 %v1077_v17, %v5273_v35  ;;  %v792_v23 = vmax.f32 %v5280_v51, %v5279_v13  ;;  %v5283_v57 = vld [vmem:[#allocation202_spill] sm:$0xff]  ;;  %v5285_v35 = vld [vmem:[#allocation123_spill] sm:$0xff] }
 0x537   : > { %v1501_v25 = vpop.permute.xlu0 %1500  ;;  %v1499_v43 = vpop.permute.xlu1 %1498  ;;  %v1268_v61 = vmax.f32 %v1172_v42, %v5268_v46  ;;  %v1078_v42 = vmax.f32 %v982_v27, %v5276_v33  ;;  %v5281_v46 = vld [vmem:[#allocation98_spill] sm:$0xff] }
 0x538   : > { %v4106_v16 = vmax.f32 %v1458_v56, %v1501_v25  ;;  %v4108_v34 = vmax.f32 %v1457_v50, %v1499_v43  ;;  %1596 = vrot.lane.b32.xlu0 %v1501_v25, %s2522_s25  ;;  %1594 = vrot.lane.b32.xlu1 %v1499_v43, %s2522_s25  ;;  %v5278_v43 = vld [vmem:[#allocation227_spill] sm:$0xff]  ;;  %v5284_v15 = vld [vmem:[#allocation74_spill] sm:$0xff] }
 0x539   : > { %v1364_v20 = vmax.f32 %v1268_v61, %v5274_v7  ;;  %v1174_v22 = vmax.f32 %v1078_v42, %v5282_v19  ;;  %v888_v27 = vmax.f32 %v792_v23, %v5284_v15  ;;  %v5288_v33 = vld [vmem:[#allocation50_spill] sm:$0xff]  ;;  %v5289_v42 = vld [vmem:[#allocation25_spill] sm:$0xff]  ;;  %v5292_v23 = vld [vmem:[#allocation203_spill] sm:$0xff] }
 0x53a   : > { %v4119_v54 = vsel %vm1674_vm1, %v4106_v16, %v1458_v56  ;;  %v4124_v29 = vsel %vm1674_vm1, %v4108_v34, %v1457_v50  ;;  %v5275_v56 = vld [vmem:[#allocation73_spill] sm:$0xff]  ;;  %v5277_v50 = vld [vmem:[#allocation175_spill] sm:$0xff]  ;;  %v5291_v51 = vld [vmem:[#allocation150_spill] sm:$0xff] }
 0x53b   : > { %v1503_v6 = vpop.permute.xlu1 %1502  ;;  %v887_v45 = vmax.f32 %v791_v5, %v5275_v56  ;;  %v1269_v25 = vmax.f32 %v1173_v9, %v5277_v50  ;;  %v1460_v52 = vmax.f32 %v1364_v20, %v5278_v43  ;;  %v5287_v20 = vld [vmem:[#allocation228_spill] sm:$0xff]  ;;  %v793_v50 = vmax.f32 %v5289_v42, %v5288_v33  ;;  %v5290_v43 = vld [vmem:[#allocation99_spill] sm:$0xff] }
 0x53c   : > { %v4131_v8 = vmax.f32 %v1459_v63, %v1503_v6  ;;  %1598 = vrot.lane.b32.xlu1 %v1503_v6, %s2522_s25  ;;  %v984_v13 = vmax.f32 %v888_v27, %v5290_v43  ;;  %v5293_v19 = vld [vmem:[#allocation75_spill] sm:$0xff]  ;;  %v5299_v42 = vld [vmem:[#allocation100_spill] sm:$0xff] }
 0x53d   : > { %v983_v61 = vmax.f32 %v887_v45, %v5281_v46  ;;  %v1365_v5 = vmax.f32 %v1269_v25, %v5283_v57  ;;  %v5294_v57 = vld [vmem:[#allocation124_spill] sm:$0xff] }
 0x53e   : > { %v4141_v62 = vsel %vm1674_vm1, %v4131_v8, %v1459_v63  ;;  %v5286_v63 = vld [vmem:[#allocation176_spill] sm:$0xff] }
 0x53f   : > { %v1505_v17 = vpop.permute.xlu0 %1504  ;;  %v1079_v9 = vmax.f32 %v983_v61, %v5285_v35  ;;  %v1270_v7 = vmax.f32 %v1174_v22, %v5286_v63  ;;  %v1461_v56 = vmax.f32 %v1365_v5, %v5287_v20  ;;  %v889_v22 = vmax.f32 %v793_v50, %v5293_v19  ;;  %v5296_v35 = vld [vmem:[#allocation229_spill] sm:$0xff]  ;;  %v5298_v20 = vld [vmem:[#allocation26_spill] sm:$0xff]  ;;  %v5301_v50 = vld [vmem:[#allocation204_spill] sm:$0xff] }
 0x540   : > { %v4148_v6 = vmax.f32 %v1460_v52, %v1505_v17  ;;  %1600 = vrot.lane.b32.xlu0 %v1505_v17, %s2522_s25  ;;  %v1080_v5 = vmax.f32 %v984_v13, %v5294_v57  ;;  %v5303_v19 = vld [vmem:[#allocation125_spill] sm:$0xff] }
 0x541   : > { %v1175_v17 = vmax.f32 %v1079_v9, %v5291_v51  ;;  %v1366_v46 = vmax.f32 %v1270_v7, %v5292_v23  ;;  %v5297_v9 = vld [vmem:[#allocation51_spill] sm:$0xff]  ;;  %v985_v43 = vmax.f32 %v889_v22, %v5299_v42  ;;  %v5308_v42 = vld [vmem:[#allocation101_spill] sm:$0xff] }
 0x542   : > { %v4158_v45 = vsel %vm1674_vm1, %v4148_v6, %v1460_v52  ;;  %v5295_v52 = vld [vmem:[#allocation177_spill] sm:$0xff]  ;;  %v794_v7 = vmax.f32 %v5298_v20, %v5297_v9  ;;  %v5307_v9 = vld [vmem:[#allocation27_spill] sm:$0xff] }
 0x543   : > { %v1507_v25 = vpop.permute.xlu1 %1506  ;;  %v1271_v15 = vmax.f32 %v1175_v17, %v5295_v52  ;;  %v1462_v63 = vmax.f32 %v1366_v46, %v5296_v35  ;;  %v5302_v17 = vld [vmem:[#allocation76_spill] sm:$0xff]  ;;  %v1081_v57 = vmax.f32 %v985_v43, %v5303_v19  ;;  %v5305_v35 = vld [vmem:[#allocation230_spill] sm:$0xff] }
 0x544   : > { %v4165_v61 = vmax.f32 %v1461_v56, %v1507_v25  ;;  %1602 = vrot.lane.b32.xlu1 %v1507_v25, %s2522_s25  ;;  %v5300_v25 = vld [vmem:[#allocation151_spill] sm:$0xff]  ;;  %v890_v46 = vmax.f32 %v794_v7, %v5302_v17  ;;  %v5310_v7 = vld [vmem:[#allocation205_spill] sm:$0xff]  ;;  %v5312_v19 = vld [vmem:[#allocation126_spill] sm:$0xff] }
 0x545   : > { %v1176_v51 = vmax.f32 %v1080_v5, %v5300_v25  ;;  %v1367_v23 = vmax.f32 %v1271_v15, %v5301_v50  ;;  %v5306_v5 = vld [vmem:[#allocation52_spill] sm:$0xff] }
 0x546   : > { %v4175_v27 = vsel %vm1674_vm1, %v4165_v61, %v1461_v56  ;;  %v5304_v56 = vld [vmem:[#allocation178_spill] sm:$0xff]  ;;  %v795_v15 = vmax.f32 %v5307_v9, %v5306_v5  ;;  %v986_v25 = vmax.f32 %v890_v46, %v5308_v42  ;;  %v5317_v5 = vld [vmem:[#allocation28_spill] sm:$0xff] }
 0x547   : > { %v1509_v33 = vpop.permute.xlu0 %1508  ;;  %v1272_v52 = vmax.f32 %v1176_v51, %v5304_v56  ;;  %v1463_v24 = vmax.f32 %v1367_v23, %v5305_v35  ;;  %v5311_v51 = vld [vmem:[#allocation77_spill] sm:$0xff]  ;;  %v5318_v42 = vld [vmem:[#allocation102_spill] sm:$0xff] }
 0x548   : > { %v4182_v13 = vmax.f32 %v1462_v63, %v1509_v33  ;;  %1604 = vrot.lane.b32.xlu0 %v1509_v33, %s2522_s25  ;;  %v5309_v33 = vld [vmem:[#allocation152_spill] sm:$0xff]  ;;  %v891_v23 = vmax.f32 %v795_v15, %v5311_v51  ;;  %v1082_v56 = vmax.f32 %v986_v25, %v5312_v19  ;;  %v5320_v15 = vld [vmem:[#allocation206_spill] sm:$0xff] }
 0x549   : > { %v1177_v50 = vmax.f32 %v1081_v57, %v5309_v33  ;;  %v1368_v17 = vmax.f32 %v1272_v52, %v5310_v7  ;;  %v5316_v57 = vld [vmem:[#allocation53_spill] sm:$0xff] }
 0x54a   : > { %v4192_v22 = vsel %vm1674_vm1, %v4182_v13, %v1462_v63  ;;  %v5313_v63 = vld [vmem:[#allocation179_spill] sm:$0xff]  ;;  %v796_v52 = vmax.f32 %v5317_v5, %v5316_v57  ;;  %v987_v33 = vmax.f32 %v891_v23, %v5318_v42  ;;  %v5328_v57 = vld [vmem:[#allocation29_spill] sm:$0xff] }
 0x54b   : > { %v1511_v20 = vpop.permute.xlu1 %1510  ;;  %v1273_v35 = vmax.f32 %v1177_v50, %v5313_v63  ;;  %v1464_v58 = vmax.f32 %v1368_v17, %v5314_v18  ;;  %v5322_v18 = vld [vmem:[#allocation78_spill] sm:$0xff]  ;;  %v5323_v17 = vld [vmem:[#allocation127_spill] sm:$0xff] }
 0x54c   : > { %v4199_v43 = vmax.f32 %v1463_v24, %v1511_v20  ;;  %1606 = vrot.lane.b32.xlu1 %v1511_v20, %s2522_s25  ;;  %v5319_v20 = vld [vmem:[#allocation153_spill] sm:$0xff]  ;;  %v892_v50 = vmax.f32 %v796_v52, %v5322_v18  ;;  %v1083_v19 = vmax.f32 %v987_v33, %v5323_v17  ;;  %v5329_v42 = vld [vmem:[#allocation103_spill] sm:$0xff] }
 0x54d   : > { %v1178_v7 = vmax.f32 %v1082_v56, %v5319_v20  ;;  %v1369_v51 = vmax.f32 %v1273_v35, %v5320_v15  ;;  %v5327_v56 = vld [vmem:[#allocation54_spill] sm:$0xff]  ;;  %v5331_v52 = vld [vmem:[#allocation207_spill] sm:$0xff] }
 0x54e   : > { %v4209_v46 = vsel %vm1674_vm1, %v4199_v43, %v1463_v24  ;;  %v5324_v24 = vld [vmem:[#allocation180_spill] sm:$0xff]  ;;  %v797_v35 = vmax.f32 %v5328_v57, %v5327_v56  ;;  %v988_v20 = vmax.f32 %v892_v50, %v5329_v42  ;;  %v5337_v57 = vld [vmem:[#allocation155_spill] sm:$0xff] }
 0x54f   : > { %5315 = vst [vmem:[#allocation212_spill] sm:$0xff] %v4209_v46  ;;  %v1513_v9 = vpop.permute.xlu0 %1512  ;;  %v1274_v63 = vmax.f32 %v1178_v7, %v5324_v24  ;;  %v1465_v46 = vmax.f32 %v1369_v51, %v5325_v11  ;;  %v5332_v11 = vld [vmem:[#allocation79_spill] sm:$0xff]  ;;  %v5333_v51 = vld [vmem:[#allocation128_spill] sm:$0xff] }
 0x550   : > { %v4216_v25 = vmax.f32 %v1464_v58, %v1513_v9  ;;  %1608 = vrot.lane.b32.xlu0 %v1513_v9, %s2522_s25  ;;  %v5330_v9 = vld [vmem:[#allocation154_spill] sm:$0xff]  ;;  %v893_v7 = vmax.f32 %v797_v35, %v5332_v11  ;;  %v1084_v17 = vmax.f32 %v988_v20, %v5333_v51  ;;  %v5336_v56 = vld [vmem:[#allocation104_spill] sm:$0xff]  ;;  %v5339_v35 = vld [vmem:[#allocation129_spill] sm:$0xff] }
 0x551   : > { %v1179_v15 = vmax.f32 %v1083_v19, %v5330_v9  ;;  %v1370_v18 = vmax.f32 %v1274_v63, %v5331_v52  ;;  %v5338_v9 = vld [vmem:[#allocation208_spill] sm:$0xff] }
 0x552   : > { %5321 = vst [vmem:[#allocation35_spill] sm:$0xff] %v4216_v25  ;;  %v4226_v23 = vsel %vm1674_vm1, %v4216_v25, %v1464_v58  ;;  %v5334_v58 = vld [vmem:[#allocation181_spill] sm:$0xff]  ;;  %v989_v63 = vmax.f32 %v893_v7, %v5336_v56  ;;  %v1180_v42 = vmax.f32 %v1084_v17, %v5337_v57  ;;  %v5341_v7 = vld [vmem:[#allocation156_spill] sm:$0xff]  ;;  %v5344_v57 = vld [vmem:[#allocation210_spill] sm:$0xff] }
 0x553   : > { %5326 = vst [vmem:[#allocation10_spill] sm:$0xff] %v4226_v23  ;;  %v1515_v5 = vpop.permute.xlu1 %1514  ;;  %v1275_v24 = vmax.f32 %v1179_v15, %v5334_v58  ;;  %v5335_v23 = vld [vmem:[#allocation233_spill] sm:$0xff]  ;;  %v5340_v15 = vld [vmem:[#allocation182_spill] sm:$0xff] }
 0x554   : > { %v4233_v33 = vmax.f32 %v1465_v46, %v1515_v5  ;;  %1610 = vrot.lane.b32.xlu1 %v1515_v5, %s2522_s25  ;;  %v1466_v25 = vmax.f32 %v1370_v18, %v5335_v23  ;;  %v1085_v20 = vmax.f32 %v989_v63, %v5339_v35  ;;  %v1276_v23 = vmax.f32 %v1180_v42, %v5340_v15  ;;  %v5342_v17 = vld [vmem:[#allocation209_spill] sm:$0xff] }
 0x555   : > { %v1371_v5 = vmax.f32 %v1275_v24, %v5338_v9  ;;  %v5346_v15 = vld [vmem:[#allocation13_spill] sm:$0xff] }
 0x556   : > { %v4243_v50 = vsel %vm1674_vm1, %v4233_v33, %v1465_v46  ;;  %v1181_v51 = vmax.f32 %v1085_v20, %v5341_v7  ;;  %v1372_v58 = vmax.f32 %v1276_v23, %v5342_v17  ;;  %v5345_v20 = vld [vmem:[#allocation38_spill] sm:$0xff]  ;;  %v5348_v17 = vld [vmem:[#allocation41_spill] sm:$0xff] }
 0x557   : > { %v1517_v19 = vpop.permute.xlu0 %1516  ;;  %v1467_v18 = vmax.f32 %v1371_v5, %v3836_v12  ;;  %v806_v23 = vmax.f32 %v5346_v15, %v5345_v20 }
 0x558   : > { %v4248_v52 = vmax.f32 %v1466_v25, %v1517_v19  ;;  %1612 = vrot.lane.b32.xlu0 %v1517_v19, %s2522_s25  ;;  %v5343_v19 = vld [vmem:[#allocation183_spill] sm:$0xff]  ;;  %v1468_v63 = vmax.f32 %v1372_v58, %v3844_v3 }
 0x559   : > { %v1277_v56 = vmax.f32 %v1181_v51, %v5343_v19  ;;  %v5349_v58 = vld [vmem:[#allocation15_spill] sm:$0xff] }
 0x55a   : > { %v4257_v46 = vsel %vm1674_vm1, %v4248_v52, %v1466_v25  ;;  %v807_v19 = vmax.f32 %v5349_v58, %v5348_v17  ;;  %v5355_v17 = vld [vmem:[#allocation139_spill] sm:$0xff] }
 0x55b   : > { %v1519_v11 = vpop.permute.xlu1 %1518  ;;  %v1373_v42 = vmax.f32 %v1277_v56, %v5344_v57  ;;  %v5350_v56 = vld [vmem:[#allocation87_spill] sm:$0xff]  ;;  %v5351_v57 = vld [vmem:[#allocation66_spill] sm:$0xff] }
 0x55c   : > { %v4261_v24 = vmax.f32 %v1467_v18, %v1519_v11  ;;  %1614 = vrot.lane.b32.xlu1 %v1519_v11, %s2522_s25  ;;  %v5347_v11 = vld [vmem:[#allocation62_spill] sm:$0xff] }
 0x55d   : > { %v1469_v5 = vmax.f32 %v1373_v42, %v3852_v60  ;;  %v902_v7 = vmax.f32 %v806_v23, %v5347_v11  ;;  %v903_v42 = vmax.f32 %v807_v19, %v5351_v57  ;;  %v5354_v11 = vld [vmem:[#allocation91_spill] sm:$0xff] }
 0x55e   : > { %v4269_v12 = vsel %vm1674_vm1, %v4261_v24, %v1467_v18 }
 0x55f   : > { %v1521_v25 = vpop.permute.xlu0 %1520 }
 0x560   : > { %v4272_v9 = vmax.f32 %v1468_v63, %v1521_v25  ;;  %1616 = vrot.lane.b32.xlu0 %v1521_v25, %s2522_s25 }
 0x562   : > { %v4279_v35 = vsel %vm1674_vm1, %v4272_v9, %v1468_v63  ;;  %v998_v63 = vmax.f32 %v902_v7, %v5350_v56  ;;  %v999_v7 = vmax.f32 %v903_v42, %v5354_v11 }
 0x563   : > { %v1523_v3 = vpop.permute.xlu1 %1522 }
 0x564   : > { %v4283_v18 = vmax.f32 %v1469_v5, %v1523_v3  ;;  %1618 = vrot.lane.b32.xlu1 %v1523_v3, %s2522_s25  ;;  %v5352_v3 = vld [vmem:[#allocation112_spill] sm:$0xff] }
 0x565   : > { %v1094_v20 = vmax.f32 %v998_v63, %v5352_v3  ;;  %v5358_v63 = vld [vmem:[#allocation166_spill] sm:$0xff] }
 0x566   : > { %v4290_v51 = vsel %vm1674_vm1, %v4283_v18, %v1469_v5 }
 0x567   : > { %v1525_v60 = vpop.permute.xlu0 %1524  ;;  %v1190_v58 = vmax.f32 %v1094_v20, %v5355_v17  ;;  %v5360_v20 = vld [vmem:[#allocation143_spill] sm:$0xff]  ;;  %v5361_v17 = vld [vmem:[#allocation193_spill] sm:$0xff] }
 0x568   : > { %v4296_v25 = vmax.f32 %v3861_v37, %v1525_v60  ;;  %1620 = vrot.lane.b32.xlu0 %v1525_v60, %s2522_s25  ;;  %v5357_v60 = vld [vmem:[#allocation116_spill] sm:$0xff] }
 0x569   : > { %v1095_v19 = vmax.f32 %v999_v7, %v5357_v60 }
 0x56a   : > { %v4305_v5 = vsel %vm1674_vm1, %v4296_v25, %v3861_v37  ;;  %v1286_v37 = vmax.f32 %v1190_v58, %v5358_v63  ;;  %v5363_v63 = vld [vmem:[#allocation197_spill] sm:$0xff] }
 0x56b   : > { %5353 = vst [vmem:[#allocation37_spill] sm:$0xff] %v4305_v5  ;;  %v4307_v15 = vpop.permute.xlu0 %1532  ;;  %v1527_v23 = vpop.permute.xlu1 %1526  ;;  %v1191_v11 = vmax.f32 %v1095_v19, %v5360_v20 }
 0x56c   : > { %v4312_v56 = vmax.f32 %v3865_v48, %v1527_v23  ;;  %1624 = vrot.lane.b32.xlu0 %v3946_v30, %s2522_s25  ;;  %1622 = vrot.lane.b32.xlu1 %v1527_v23, %s2522_s25  ;;  %v1382_v5 = vmax.f32 %v1286_v37, %v5361_v17  ;;  %v5362_v23 = vld [vmem:[#allocation170_spill] sm:$0xff]  ;;  %v4371_v17 = vld [vmem:[%s4716_s2] ss:$0 sm:$0xff] }
 0x56d   : > { %v1287_v7 = vmax.f32 %v1191_v11, %v5362_v23 }
 0x56e   : > { %5356 = vst [vmem:[#allocation12_spill] sm:$0xff] %v4312_v56  ;;  %v4323_v57 = vsel %vm1674_vm1, %v4312_v56, %v3865_v48  ;;  %v1478_v58 = vmax.f32 %v1382_v5, %v3882_v39 }
 0x56f   : > { %5359 = vst [vmem:[#allocation133_spill] sm:$0xff] %v4323_v57  ;;  %v4325_v42 = vpop.permute.xlu0 %1536  ;;  %v4327_v3 = vpop.permute.xlu1 %1534  ;;  %v1383_v57 = vmax.f32 %v1287_v7, %v5363_v63 }
 0x570   : > { %1628 = vrot.lane.b32.xlu0 %v4307_v15, %s2522_s25  ;;  %1626 = vrot.lane.b32.xlu1 %v3985_v55, %s2522_s25 }
 0x571   : > { %v1479_v19 = vmax.f32 %v1383_v57, %v3893_v40 }
 0x573   : > { %v1541_v48 = vpop.permute.xlu0 %1540  ;;  %v4337_v60 = vpop.permute.xlu1 %1538 }
 0x574   : > { %v4340_v56 = vmax.f32 %v1478_v58, %v1541_v48  ;;  %1632 = vrot.lane.b32.xlu0 %v4325_v42, %s2522_s25  ;;  %1630 = vrot.lane.b32.xlu1 %v4327_v3, %s2522_s25 }
 0x576   : > { %v4350_v37 = vsel %vm1674_vm1, %v4340_v56, %v1478_v58 }
 0x577   : > { %v1543_v39 = vpop.permute.xlu1 %1542 }
 0x578   : > { %v4352_v5 = vmax.f32 %v1479_v19, %v1543_v39  ;;  %1636 = vrot.lane.b32.xlu0 %v1541_v48, %s2522_s25  ;;  %1634 = vrot.lane.b32.xlu1 %v4337_v60, %s2522_s25 }
 0x57a   : > { %5364 = vst [vmem:[#allocation134_spill] sm:$0xff] %v4352_v5  ;;  %v4360_v20 = vsel %vm1674_vm1, %v4352_v5, %v1479_v19 }
 0x57b   : > { %5365 = vst [vmem:[#allocation60_spill] sm:$0xff] %v4360_v20 }
 0x57c   : > { %1638 = vrot.lane.b32.xlu1 %v1543_v39, %s2522_s25  ;;  %s218_s25 = sand.u32 1, %s2511_s19  }
 0x57d   : > { %s2171_s6 = sshll.u32 %s218_s25, 8  ;;  %s4674_s22 = scalar_lea.sflag [#allocation3], %s218_s25 }
 0x57e   : > { %s4598_s9 = scalar_lea.vmem [#allocation2], %s2171_s6 }
 0x57f   : > { %s2105_s11 = sshll.u32 %s4598_s9, 4  ;;  %s4667_s11 = int_to_ptr.vmem [resolvable:$true] %s2105_s11 }
 0x580   : > { %s2459_s15 = scalar_lea.vmem %s4667_s11, 4096  ;;  %p2466_p0 = scmp.lt.s32.totalorder %s4667_s11, %s2464_s23 }
 0x581   : > { %p2460_p11 = scmp.ne.s32.totalorder %s4667_s11, %s2459_s15  ;;  %p2467_p1 = scmp.lt.s32.totalorder %s2465_s17, %s2459_s15 }
 0x582   : > { %v1577_v40 = vpop.permute.xlu0 %1576 }
 0x583   : > { %v1640_v57 = vmax.f32 %v3930_v36, %v1577_v40  ;;  %p2461_p12 = pnand %p2460_p11, %p2594_p5  ;;  %p2468_p2 = por %p2467_p1, %p2466_p0 }
 0x585   : > { %v1708_v11 = vsel %vm1707_vm2, %v1640_v57, %v3940_v59  ;;  %p2462_p13 = pneg %p2461_p12 }
 0x586   : > { %v1747_v63 = vadd.f32 %v4371_v17, %v1708_v11 }
 0x587   : > { %p2469_p3 = pnand %p2468_p2, %p2462_p13 }
 0x588   : > { %v1779_v39 = vmax.f32 %v1747_v63, 0.0 }
 0x58a   : > { %v1581_v23 = vpop.permute.xlu0 %1580  ;;  %v1579_v7 = vpop.permute.xlu1 %1578 }
 0x58b   : > { %v1642_v58 = vmax.f32 %v3964_v21, %v1581_v23  ;;  %v1641_v48 = vmax.f32 %v3966_v2, %v1579_v7 }
 0x58d   : > { %v1710_v36 = vsel %vm1707_vm2, %v1642_v58, %v3977_v49  ;;  %v1709_v59 = vsel %vm1707_vm2, %v1641_v48, %v3982_v53 }
 0x58e   : > { %v1748_v19 = vadd.f32 %v4371_v17, %v1709_v59  ;;  %v1749_v11 = vadd.f32 %v4371_v17, %v1710_v36 }
 0x590   : > { %v1780_v40 = vmax.f32 %v1748_v19, 0.0  ;;  %v1781_v7 = vmax.f32 %v1749_v11, 0.0 }
 0x592   : > { %v1585_v57 = vpop.permute.xlu0 %1584  ;;  %v1583_v20 = vpop.permute.xlu1 %1582  ;;  %v1811_v5 = vpack.c.bf16 %v1780_v40, %v1779_v39 }
 0x593   : > { %v1644_v21 = vmax.f32 %v4000_v31, %v1585_v57  ;;  %v1643_v2 = vmax.f32 %v4002_v4, %v1583_v20 }
 0x594   : > { %2292 = vmatprep.mubr.bf16.mxu1 %v1811_v5 }
 0x595   : > { %v1712_v49 = vsel %vm1707_vm2, %v1644_v21, %v4013_v38  ;;  %v1711_v53 = vsel %vm1707_vm2, %v1643_v2, %v4018_v41 }
 0x596   : > { %v1750_v23 = vadd.f32 %v4371_v17, %v1711_v53  ;;  %v1751_v5 = vadd.f32 %v4371_v17, %v1712_v49 }
 0x598   : > { %v1782_v58 = vmax.f32 %v1750_v23, 0.0  ;;  %v1783_v59 = vmax.f32 %v1751_v5, 0.0 }
 0x59a   : > { %v1812_v48 = vpack.c.bf16 %v1782_v58, %v1781_v7  ;;  %v1589_v63 = vpop.permute.xlu0 %1588  ;;  %v1587_v31 = vpop.permute.xlu1 %1586 }
 0x59b   : > { %v1646_v4 = vmax.f32 %v4034_v10, %v1589_v63  ;;  %v1645_v20 = vmax.f32 %v4036_v32, %v1587_v31 }
 0x59c   : > { %2293 = vmatmul.mubr.bf16.vlgmr.msra.gmra.mxu1 %v1812_v48 }
 0x59d   : > { %v1714_v38 = vsel %vm1707_vm2, %v1646_v4, %v4047_v47  ;;  %v1713_v41 = vsel %vm1707_vm2, %v1645_v20, %v4052_v44 }
 0x59e   : > { %v1752_v36 = vadd.f32 %v4371_v17, %v1713_v41  ;;  %v1753_v21 = vadd.f32 %v4371_v17, %v1714_v38 }
 0x5a0   : > { %v1784_v19 = vmax.f32 %v1752_v36, 0.0  ;;  %v1785_v11 = vmax.f32 %v1753_v21, 0.0 }
 0x5a2   : > { %v1593_v39 = vpop.permute.xlu0 %1592  ;;  %v1591_v40 = vpop.permute.xlu1 %1590  ;;  %v1813_v10 = vpack.c.bf16 %v1784_v19, %v1783_v59 }
 0x5a3   : > { %v1648_v32 = vmax.f32 %v4070_v26, %v1593_v39  ;;  %v1647_v57 = vmax.f32 %v4072_v28, %v1591_v40 }
 0x5a4   : > { %2296 = vmatprep.mubr.bf16.mxu1 %v1813_v10 }
 0x5a5   : > { %v1716_v47 = vsel %vm1707_vm2, %v1648_v32, %v4083_v0  ;;  %v1715_v44 = vsel %vm1707_vm2, %v1647_v57, %v4088_v14 }
 0x5a6   : > { %v1754_v2 = vadd.f32 %v4371_v17, %v1715_v44  ;;  %v1755_v58 = vadd.f32 %v4371_v17, %v1716_v47 }
 0x5a8   : > { %v1786_v49 = vmax.f32 %v1754_v2, 0.0  ;;  %v1787_v4 = vmax.f32 %v1755_v58, 0.0 }
 0x5aa   : > { %v1597_v53 = vpop.permute.xlu0 %1596  ;;  %v1595_v23 = vpop.permute.xlu1 %1594  ;;  %v1814_v26 = vpack.c.bf16 %v1786_v49, %v1785_v11  ;;  %v5366_v11 = vld [vmem:[#allocation212_spill] sm:$0xff] }
 0x5ab   : > { %v1650_v28 = vmax.f32 %v4106_v16, %v1597_v53  ;;  %v1649_v7 = vmax.f32 %v4108_v34, %v1595_v23  ;;  %v5367_v53 = vld [vmem:[#allocation35_spill] sm:$0xff] }
 0x5ac   : > { %2297 = vmatmul.mubr.bf16.gmra.mxu1 %v1814_v26 }
 0x5ad   : > { %v1718_v0 = vsel %vm1707_vm2, %v1650_v28, %v4119_v54  ;;  %v1717_v14 = vsel %vm1707_vm2, %v1649_v7, %v4124_v29  ;;  %v5368_v7 = vld [vmem:[#allocation10_spill] sm:$0xff] }
 0x5ae   : > { %v1756_v48 = vadd.f32 %v4371_v17, %v1717_v14  ;;  %v1599_v63 = vpop.permute.xlu1 %1598  ;;  %v1757_v16 = vadd.f32 %v4371_v17, %v1718_v0 }
 0x5af   : > { %v1651_v31 = vmax.f32 %v4131_v8, %v1599_v63 }
 0x5b0   : > { %v1788_v34 = vmax.f32 %v1756_v48, 0.0  ;;  %v1789_v29 = vmax.f32 %v1757_v16, 0.0 }
 0x5b1   : > { %v1719_v20 = vsel %vm1707_vm2, %v1651_v31, %v4141_v62 }
 0x5b2   : > { %v1758_v5 = vadd.f32 %v4371_v17, %v1719_v20  ;;  %v1601_v54 = vpop.permute.xlu0 %1600  ;;  %v1815_v38 = vpack.c.bf16 %v1788_v34, %v1787_v4  ;;  %v5369_v4 = vld [vmem:[#allocation31_spill] sm:$0xff]  ;;  %v5370_v34 = vld [vmem:[#allocation5_spill] sm:$0xff] }
 0x5b3   : > { %v1652_v41 = vmax.f32 %v4148_v6, %v1601_v54  ;;  %v800_v20 = vmax.f32 %v5370_v34, %v5369_v4  ;;  %v5390_v4 = vld [vmem:[#allocation58_spill] sm:$0xff] }
 0x5b4   : > { %2300 = vmatprep.mubr.bf16.mxu1 %v1815_v38  ;;  %v1790_v36 = vmax.f32 %v1758_v5, 0.0  ;;  %v5371_v38 = vld [vmem:[#allocation30_spill] sm:$0xff] }
 0x5b5   : > { %v1720_v8 = vsel %vm1707_vm2, %v1652_v41, %v4158_v45  ;;  %v5372_v41 = vld [vmem:[#allocation6_spill] sm:$0xff] }
 0x5b6   : > { %v1603_v59 = vpop.permute.xlu1 %1602  ;;  %v1816_v19 = vpack.c.bf16 %v1790_v36, %v1789_v29  ;;  %v1759_v40 = vadd.f32 %v4371_v17, %v1720_v8  ;;  %v801_v29 = vmax.f32 %v5372_v41, %v5371_v38  ;;  %v5373_v36 = vld [vmem:[#allocation55_spill] sm:$0xff] }
 0x5b7   : > { %v1653_v39 = vmax.f32 %v4165_v61, %v1603_v59  ;;  %v896_v8 = vmax.f32 %v800_v20, %v5373_v36  ;;  %v5391_v20 = vld [vmem:[#allocation59_spill] sm:$0xff]  ;;  %v5394_v36 = vld [vmem:[#allocation132_spill] sm:$0xff] }
 0x5b8   : > { %2301 = vmatmul.mubr.bf16.gmra.mxu1 %v1816_v19  ;;  %v1791_v57 = vmax.f32 %v1759_v40, 0.0  ;;  %v5374_v19 = vld [vmem:[#allocation32_spill] sm:$0xff]  ;;  %v5393_v41 = vld [vmem:[#allocation63_spill] sm:$0xff] }
 0x5b9   : > { %v1721_v62 = vsel %vm1707_vm2, %v1653_v39, %v4175_v27  ;;  %v5375_v39 = vld [vmem:[#allocation7_spill] sm:$0xff] }
 0x5ba   : > { %v1760_v6 = vadd.f32 %v4371_v17, %v1721_v62  ;;  %v1605_v10 = vpop.permute.xlu0 %1604  ;;  %v802_v40 = vmax.f32 %v5375_v39, %v5374_v19  ;;  %v5376_v62 = vld [vmem:[#allocation57_spill] sm:$0xff]  ;;  %v5396_v39 = vld [vmem:[#allocation83_spill] sm:$0xff] }
 0x5bb   : > { %v1654_v32 = vmax.f32 %v4182_v13, %v1605_v10  ;;  %v5377_v10 = vld [vmem:[#allocation80_spill] sm:$0xff] }
 0x5bc   : > { %v1792_v21 = vmax.f32 %v1760_v6, 0.0  ;;  %v897_v6 = vmax.f32 %v801_v29, %v5376_v62 }
 0x5bd   : > { %v1722_v45 = vsel %vm1707_vm2, %v1654_v32, %v4192_v22  ;;  %v992_v32 = vmax.f32 %v896_v8, %v5377_v10  ;;  %v5395_v8 = vld [vmem:[#allocation157_spill] sm:$0xff] }
 0x5be   : > { %v1607_v47 = vpop.permute.xlu1 %1606  ;;  %v1817_v61 = vpack.c.bf16 %v1792_v21, %v1791_v57  ;;  %v1761_v2 = vadd.f32 %v4371_v17, %v1722_v45 }
 0x5bf   : > { %v1655_v44 = vmax.f32 %v4199_v43, %v1607_v47  ;;  %v5379_v47 = vld [vmem:[#allocation33_spill] sm:$0xff] }
 0x5c0   : > { %2304 = vmatprep.mubr.bf16.mxu1 %v1817_v61  ;;  %v1793_v26 = vmax.f32 %v1761_v2, 0.0  ;;  %v5380_v61 = vld [vmem:[#allocation8_spill] sm:$0xff]  ;;  %v5381_v2 = vld [vmem:[#allocation82_spill] sm:$0xff] }
 0x5c1   : > { %v1723_v27 = vsel %vm1707_vm2, %v1655_v44, %v5366_v11  ;;  %v803_v44 = vmax.f32 %v5380_v61, %v5379_v47  ;;  %v993_v11 = vmax.f32 %v897_v6, %v5381_v2  ;;  %v5398_v6 = vld [vmem:[#allocation131_spill] sm:$0xff] }
 0x5c2   : > { %v1762_v49 = vadd.f32 %v4371_v17, %v1723_v27  ;;  %v1609_v13 = vpop.permute.xlu0 %1608  ;;  %v5382_v27 = vld [vmem:[#allocation105_spill] sm:$0xff] }
 0x5c3   : > { %v1656_v23 = vmax.f32 %v5367_v53, %v1609_v13  ;;  %v5383_v53 = vld [vmem:[#allocation34_spill] sm:$0xff] }
 0x5c4   : > { %v1794_v28 = vmax.f32 %v1762_v49, 0.0 }
 0x5c5   : > { %v1724_v22 = vsel %vm1707_vm2, %v1656_v23, %v5368_v7  ;;  %v5384_v23 = vld [vmem:[#allocation9_spill] sm:$0xff]  ;;  %v5386_v7 = vld [vmem:[#allocation11_spill] sm:$0xff] }
 0x5c6   : > { %v1611_v58 = vpop.permute.xlu1 %1610  ;;  %v1818_v43 = vpack.c.bf16 %v1794_v28, %v1793_v26  ;;  %v1763_v14 = vadd.f32 %v4371_v17, %v1724_v22  ;;  %v804_v26 = vmax.f32 %v5384_v23, %v5383_v53  ;;  %v5385_v28 = vld [vmem:[#allocation36_spill] sm:$0xff]  ;;  %v5406_v23 = vld [vmem:[#allocation186_spill] sm:$0xff] }
 0x5c7   : > { %v1657_v0 = vmax.f32 %v4233_v33, %v1611_v58  ;;  %v805_v22 = vmax.f32 %v5386_v7, %v5385_v28  ;;  %v5387_v58 = vld [vmem:[#allocation81_spill] sm:$0xff]  ;;  %v5407_v28 = vld [vmem:[#allocation211_spill] sm:$0xff] }
 0x5c8   : > { %2305 = vmatmul.mubr.bf16.gmra.mxu1 %v1818_v43  ;;  %v1795_v5 = vmax.f32 %v1763_v14, 0.0  ;;  %v900_v34 = vmax.f32 %v804_v26, %v5390_v4 }
 0x5c9   : > { %v1725_v48 = vsel %vm1707_vm2, %v1657_v0, %v4243_v50  ;;  %v5388_v0 = vld [vmem:[#allocation107_spill] sm:$0xff]  ;;  %v901_v29 = vmax.f32 %v805_v22, %v5393_v41  ;;  %v5414_v41 = vld [vmem:[#allocation37_spill] sm:$0xff] }
 0x5ca   : > { %v1764_v63 = vadd.f32 %v4371_v17, %v1725_v48  ;;  %v1613_v31 = vpop.permute.xlu0 %1612  ;;  %v1089_v14 = vmax.f32 %v993_v11, %v5388_v0  ;;  %v5389_v48 = vld [vmem:[#allocation130_spill] sm:$0xff]  ;;  %v5403_v11 = vld [vmem:[#allocation109_spill] sm:$0xff]  ;;  %v5409_v0 = vld [vmem:[#allocation136_spill] sm:$0xff] }
 0x5cb   : > { %v1658_v16 = vmax.f32 %v4248_v52, %v1613_v31 }
 0x5cc   : > { %v1796_v54 = vmax.f32 %v1764_v63, 0.0 }
 0x5cd   : > { %v1726_v33 = vsel %vm1707_vm2, %v1658_v16, %v4257_v46  ;;  %v5378_v46 = vld [vmem:[#allocation56_spill] sm:$0xff] }
 0x5ce   : > { %v1615_v50 = vpop.permute.xlu1 %1614  ;;  %v1819_v59 = vpack.c.bf16 %v1796_v54, %v1795_v5  ;;  %v1765_v57 = vadd.f32 %v4371_v17, %v1726_v33  ;;  %v898_v21 = vmax.f32 %v802_v40, %v5378_v46  ;;  %v899_v5 = vmax.f32 %v803_v44, %v5391_v20  ;;  %v5392_v54 = vld [vmem:[#allocation106_spill] sm:$0xff]  ;;  %v5402_v44 = vld [vmem:[#allocation108_spill] sm:$0xff] }
 0x5cf   : > { %v1659_v52 = vmax.f32 %v4261_v24, %v1615_v50  ;;  %v1088_v24 = vmax.f32 %v992_v32, %v5382_v27  ;;  %v996_v40 = vmax.f32 %v900_v34, %v5396_v39 }
 0x5d0   : > { %2308 = vmatprep.mubr.bf16.mxu1 %v1819_v59  ;;  %v994_v43 = vmax.f32 %v898_v21, %v5387_v58  ;;  %v1797_v31 = vmax.f32 %v1765_v57, 0.0  ;;  %v5399_v57 = vld [vmem:[#allocation88_spill] sm:$0xff]  ;;  %v5400_v21 = vld [vmem:[#allocation159_spill] sm:$0xff] }
 0x5d1   : > { %v1727_v45 = vsel %vm1707_vm2, %v1659_v52, %v4269_v12  ;;  %v1184_v63 = vmax.f32 %v1088_v24, %v5389_v48  ;;  %v5397_v52 = vld [vmem:[#allocation84_spill] sm:$0xff]  ;;  %v997_v46 = vmax.f32 %v901_v29, %v5399_v57  ;;  %v1092_v2 = vmax.f32 %v996_v40, %v5402_v44  ;;  %v5404_v24 = vld [vmem:[#allocation158_spill] sm:$0xff]  ;;  %v5410_v48 = vld [vmem:[#allocation185_spill] sm:$0xff] }
 0x5d2   : > { %v1766_v49 = vadd.f32 %v4371_v17, %v1727_v45  ;;  %v1617_v13 = vpop.permute.xlu0 %1616  ;;  %v1090_v33 = vmax.f32 %v994_v43, %v5392_v54  ;;  %v995_v62 = vmax.f32 %v899_v5, %v5397_v52  ;;  %v5401_v45 = vld [vmem:[#allocation184_spill] sm:$0xff]  ;;  %v5408_v43 = vld [vmem:[#allocation135_spill] sm:$0xff]  ;;  %v5412_v5 = vld [vmem:[#allocation162_spill] sm:$0xff] }
 0x5d3   : > { %v1660_v12 = vmax.f32 %v4272_v9, %v1617_v13  ;;  %v1185_v9 = vmax.f32 %v1089_v14, %v5394_v36  ;;  %v1280_v50 = vmax.f32 %v1184_v63, %v5395_v8  ;;  %v5415_v36 = vld [vmem:[#allocation140_spill] sm:$0xff]  ;;  %v5416_v8 = vld [vmem:[#allocation213_spill] sm:$0xff]  ;;  %v5418_v52 = vld [vmem:[#allocation190_spill] sm:$0xff] }
 0x5d4   : > { %v1798_v16 = vmax.f32 %v1766_v49, 0.0  ;;  %v1186_v10 = vmax.f32 %v1090_v33, %v5398_v6  ;;  %v1091_v27 = vmax.f32 %v995_v62, %v5403_v11  ;;  %v5413_v33 = vld [vmem:[#allocation163_spill] sm:$0xff]  ;;  %v5423_v11 = vld [vmem:[#allocation133_spill] sm:$0xff] }
 0x5d5   : > { %v1728_v38 = vsel %vm1707_vm2, %v1660_v12, %v4279_v35  ;;  %v1281_v35 = vmax.f32 %v1185_v9, %v5400_v21  ;;  %v1376_v47 = vmax.f32 %v1280_v50, %v5401_v45  ;;  %v1188_v12 = vmax.f32 %v1092_v2, %v5408_v43  ;;  %v5420_v57 = vld [vmem:[#allocation167_spill] sm:$0xff] }
 0x5d6   : > { %v1619_v59 = vpop.permute.xlu1 %1618  ;;  %v1820_v19 = vpack.c.bf16 %v1798_v16, %v1797_v31  ;;  %v1767_v61 = vadd.f32 %v4371_v17, %v1728_v38  ;;  %v1282_v49 = vmax.f32 %v1186_v10, %v5404_v24  ;;  %v1187_v14 = vmax.f32 %v1091_v27, %v5409_v0  ;;  %v5411_v16 = vld [vmem:[#allocation214_spill] sm:$0xff]  ;;  %v5419_v10 = vld [vmem:[#allocation12_spill] sm:$0xff] }
 0x5d7   : > { %v1661_v32 = vmax.f32 %v4283_v18, %v1619_v59  ;;  %v5405_v18 = vld [vmem:[#allocation113_spill] sm:$0xff]  ;;  %v1377_v26 = vmax.f32 %v1281_v35, %v5406_v23  ;;  %v1472_v7 = vmax.f32 %v1376_v47, %v5407_v28  ;;  %v1284_v54 = vmax.f32 %v1188_v12, %v5412_v5  ;;  %v5424_v24 = vld [vmem:[#allocation194_spill] sm:$0xff] }
 0x5d8   : > { %2309 = vmatmul.mubr.bf16.gmra.mxu1 %v1820_v19  ;;  %v1093_v53 = vmax.f32 %v997_v46, %v5405_v18  ;;  %v1378_v63 = vmax.f32 %v1282_v49, %v5410_v48  ;;  %v1799_v34 = vmax.f32 %v1767_v61, 0.0  ;;  %v1283_v38 = vmax.f32 %v1187_v14, %v5413_v33  ;;  %v5422_v61 = vld [vmem:[#allocation218_spill] sm:$0xff]  ;;  %v5425_v48 = vld [vmem:[#allocation221_spill] sm:$0xff] }
 0x5d9   : > { %v1729_v13 = vsel %vm1707_vm2, %v1661_v32, %v4290_v51  ;;  %v1473_v4 = vmax.f32 %v1377_v26, %v5411_v16  ;;  %v1568_v51 = vmax.f32 %v1472_v7, %v3946_v30  ;;  %v5417_v30 = vld [vmem:[#allocation189_spill] sm:$0xff] }
 0x5da   : > { %v1768_v22 = vadd.f32 %v4371_v17, %v1729_v13  ;;  %v1621_v58 = vpop.permute.xlu0 %1620  ;;  %v1189_v9 = vmax.f32 %v1093_v53, %v5415_v36  ;;  %v1474_v50 = vmax.f32 %v1378_v63, %v5416_v8  ;;  %v1380_v40 = vmax.f32 %v1284_v54, %v5417_v30 }
 0x5db   : > { %v1662_v31 = vmax.f32 %v4296_v25, %v1621_v58  ;;  %v1569_v25 = vmax.f32 %v1473_v4, %v3985_v55  ;;  %v1379_v62 = vmax.f32 %v1283_v38, %v5418_v52  ;;  %v1699_v21 = vsel %vm1674_vm1, %v1568_v51, %v1472_v7  ;;  %v5421_v55 = vld [vmem:[#allocation217_spill] sm:$0xff] }
 0x5dc   : > { %v1800_v20 = vmax.f32 %v1768_v22, 0.0  ;;  %v1285_v46 = vmax.f32 %v1189_v9, %v5420_v57  ;;  %v1570_v35 = vmax.f32 %v1474_v50, %v4307_v15  ;;  %v1476_v47 = vmax.f32 %v1380_v40, %v5421_v55 }
 0x5dd   : > { %v1730_v29 = vsel %vm1707_vm2, %v1662_v31, %v5414_v41  ;;  %v1475_v44 = vmax.f32 %v1379_v62, %v5422_v61  ;;  %v1700_v13 = vsel %vm1674_vm1, %v1569_v25, %v1473_v4 }
 0x5de   : > { %v1625_v59 = vpop.permute.xlu0 %1624  ;;  %v1623_v19 = vpop.permute.xlu1 %1622  ;;  %v1821_v39 = vpack.c.bf16 %v1800_v20, %v1799_v34  ;;  %v1769_v45 = vadd.f32 %v4371_v17, %v1730_v29  ;;  %v1381_v49 = vmax.f32 %v1285_v46, %v5424_v24  ;;  %v1572_v23 = vmax.f32 %v1476_v47, %v4325_v42 }
 0x5df   : > { %v1664_v6 = vmax.f32 %v1568_v51, %v1625_v59  ;;  %v1663_v32 = vmax.f32 %v5419_v10, %v1623_v19  ;;  %v1571_v26 = vmax.f32 %v1475_v44, %v4327_v3  ;;  %v1701_v22 = vsel %vm1674_vm1, %v1570_v35, %v1474_v50  ;;  %v5426_v10 = vld [vmem:[#allocation134_spill] sm:$0xff] }
 0x5e0   : > { %2312 = vmatprep.mubr.bf16.mxu1 %v1821_v39  ;;  %v1801_v43 = vmax.f32 %v1769_v45, 0.0  ;;  %v1477_v63 = vmax.f32 %v1381_v49, %v5425_v48  ;;  %v1703_v4 = vsel %vm1674_vm1, %v1572_v23, %v1476_v47 }
 0x5e1   : > { %v1732_v2 = vsel %vm1707_vm2, %v1664_v6, %v1699_v21  ;;  %v1731_v27 = vsel %vm1707_vm2, %v1663_v32, %v5423_v11  ;;  %v1702_v51 = vsel %vm1674_vm1, %v1571_v26, %v1475_v44 }
 0x5e2   : > { %v1770_v15 = vadd.f32 %v4371_v17, %v1731_v27  ;;  %v1629_v18 = vpop.permute.xlu0 %1628  ;;  %v1627_v53 = vpop.permute.xlu1 %1626  ;;  %v1771_v58 = vadd.f32 %v4371_v17, %v1732_v2  ;;  %v1573_v5 = vmax.f32 %v1477_v63, %v4337_v60  ;;  %v4595_v2 = vld [vmem:[%s4718_s4] ss:$0 sm:$0xff] }
 0x5e3   : > { %v1666_v28 = vmax.f32 %v1570_v35, %v1629_v18  ;;  %v1665_v7 = vmax.f32 %v1569_v25, %v1627_v53  ;;  %v5427_v35 = vld [vmem:[#allocation60_spill] sm:$0xff] }
 0x5e4   : > { %v1802_v12 = vmax.f32 %v1770_v15, 0.0  ;;  %v1803_v33 = vmax.f32 %v1771_v58, 0.0  ;;  %v1704_v60 = vsel %vm1674_vm1, %v1573_v5, %v1477_v63 }
 0x5e5   : > { %v1734_v0 = vsel %vm1707_vm2, %v1666_v28, %v1701_v22  ;;  %v1733_v14 = vsel %vm1707_vm2, %v1665_v7, %v1700_v13 }
 0x5e6   : > { %v1772_v42 = vadd.f32 %v4371_v17, %v1733_v14  ;;  %v1633_v3 = vpop.permute.xlu0 %1632  ;;  %v1631_v31 = vpop.permute.xlu1 %1630  ;;  %v1822_v16 = vpack.c.bf16 %v1802_v12, %v1801_v43  ;;  %v1773_v54 = vadd.f32 %v4371_v17, %v1734_v0 }
 0x5e7   : > { %v1668_v34 = vmax.f32 %v1572_v23, %v1633_v3  ;;  %v1667_v20 = vmax.f32 %v1571_v26, %v1631_v31 }
 0x5e8   : > { %2313 = vmatmul.mubr.bf16.gmra.mxu1 %v1822_v16  ;;  %v1804_v38 = vmax.f32 %v1772_v42, 0.0  ;;  %v1805_v39 = vmax.f32 %v1773_v54, 0.0 }
 0x5e9   : > { %v1736_v41 = vsel %vm1707_vm2, %v1668_v34, %v1703_v4  ;;  %v1735_v29 = vsel %vm1707_vm2, %v1667_v20, %v1702_v51 }
 0x5ea   : > { %v1774_v36 = vadd.f32 %v4371_v17, %v1735_v29  ;;  %v1637_v9 = vpop.permute.xlu0 %1636  ;;  %v1635_v8 = vpop.permute.xlu1 %1634  ;;  %v1823_v50 = vpack.c.bf16 %v1804_v38, %v1803_v33  ;;  %v1775_v19 = vadd.f32 %v4371_v17, %v1736_v41 }
 0x5eb   : > { %v1670_v25 = vmax.f32 %v4340_v56, %v1637_v9  ;;  %v1669_v59 = vmax.f32 %v1573_v5, %v1635_v8 }
 0x5ec   : > { %2316 = vmatprep.mubr.bf16.mxu1 %v1823_v50  ;;  %v1806_v30 = vmax.f32 %v1774_v36, 0.0  ;;  %v1807_v46 = vmax.f32 %v1775_v19, 0.0 }
 0x5ed   : > { %v1738_v40 = vsel %vm1707_vm2, %v1670_v25, %v4350_v37  ;;  %v1737_v52 = vsel %vm1707_vm2, %v1669_v59, %v1704_v60 }
 0x5ee   : > { %v1776_v62 = vadd.f32 %v4371_v17, %v1737_v52  ;;  %v1639_v56 = vpop.permute.xlu1 %1638  ;;  %v1824_v6 = vpack.c.bf16 %v1806_v30, %v1805_v39  ;;  %v1777_v57 = vadd.f32 %v4371_v17, %v1738_v40 }
 0x5ef   : > { %v1671_v32 = vmax.f32 %v5426_v10, %v1639_v56 }
 0x5f0   : > { %2317 = vmatmul.mubr.bf16.gmra.mxu1 %v1824_v6  ;;  %v1808_v21 = vmax.f32 %v1776_v62, 0.0  ;;  %v1809_v47 = vmax.f32 %v1777_v57, 0.0 }
 0x5f1   : > { %v1739_v37 = vsel %vm1707_vm2, %v1671_v32, %v5427_v35 }
 0x5f2   : > { %v1778_v45 = vadd.f32 %v4371_v17, %v1739_v37  ;;  %v1825_v55 = vpack.c.bf16 %v1808_v21, %v1807_v46 }
 0x5f4   : > { %2320 = vmatprep.mubr.bf16.mxu1 %v1825_v55  ;;  %v1810_v61 = vmax.f32 %v1778_v45, 0.0 }
 0x5f6   : > { %v1826_v44 = vpack.c.bf16 %v1810_v61, %v1809_v47 }
 0x5f8   : > { %2321 = vmatmul.mubr.bf16.gmra.mxu1 %v1826_v44 }
 0x65c   : > { %v2294_v11 = vpop.f32.mrf.mxu1 }
 0x65d   : > { %v1941_v1 = vadd.f32 %v2294_v11, %v4595_v2 }
 0x65e   : > { %v1932_v27 = vpop.f32.mrf.mxu1 }
 0x65f   : > { %2061 = vst [vmem:[%s4598_s9 + $0x10] sm:$0xff] %v1941_v1  ;;  %v1933_v17 = vadd.f32 %v4595_v2, %v1932_v27 }
 0x660   : > { %v2295_v24 = vpop.f32.mrf.mxu1 }
 0x661   : > { %2059 = vst [vmem:[%s4598_s9] sm:$0xff] %v1933_v17  ;;  %v1944_v49 = vadd.f32 %v2295_v24, %v4595_v2 }
 0x662   : > { %v1935_v13 = vpop.f32.mrf.mxu1 }
 0x663   : > { %2062 = vst [vmem:[%s4598_s9 + $0x18] sm:$0xff] %v1944_v49  ;;  %v1936_v15 = vadd.f32 %v4595_v2, %v1935_v13 }
 0x665   : > { %2060 = vst [vmem:[%s4598_s9 + $0x8] sm:$0xff] %v1936_v15 }
 0x66c   : > { %v2298_v18 = vpop.f32.mrf.mxu1 }
 0x66d   : > { %v1957_v53 = vadd.f32 %v2298_v18, %v4595_v2 }
 0x66e   : > { %v1948_v23 = vpop.f32.mrf.mxu1 }
 0x66f   : > { %2065 = vst [vmem:[%s4598_s9 + $0x30] sm:$0xff] %v1957_v53  ;;  %v1949_v26 = vadd.f32 %v4595_v2, %v1948_v23 }
 0x670   : > { %v2299_v28 = vpop.f32.mrf.mxu1 }
 0x671   : > { %2063 = vst [vmem:[%s4598_s9 + $0x20] sm:$0xff] %v1949_v26  ;;  %v1960_v7 = vadd.f32 %v2299_v28, %v4595_v2 }
 0x672   : > { %v1951_v22 = vpop.f32.mrf.mxu1 }
 0x673   : > { %2066 = vst [vmem:[%s4598_s9 + $0x38] sm:$0xff] %v1960_v7  ;;  %v1952_v58 = vadd.f32 %v4595_v2, %v1951_v22 }
 0x675   : > { %2064 = vst [vmem:[%s4598_s9 + $0x28] sm:$0xff] %v1952_v58 }
 0x678   : > { %v2302_v43 = vpop.f32.mrf.mxu1 }
 0x679   : > { %v1973_v12 = vadd.f32 %v2302_v43, %v4595_v2 }
 0x67a   : > { %v1964_v0 = vpop.f32.mrf.mxu1 }
 0x67b   : > { %2069 = vst [vmem:[%s4598_s9 + $0x50] sm:$0xff] %v1973_v12  ;;  %v1965_v14 = vadd.f32 %v4595_v2, %v1964_v0 }
 0x67c   : > { %v2303_v48 = vpop.f32.mrf.mxu1 }
 0x67d   : > { %2067 = vst [vmem:[%s4598_s9 + $0x40] sm:$0xff] %v1965_v14  ;;  %v1976_v63 = vadd.f32 %v2303_v48, %v4595_v2 }
 0x67e   : > { %v1967_v42 = vpop.f32.mrf.mxu1 }
 0x67f   : > { %2070 = vst [vmem:[%s4598_s9 + $0x58] sm:$0xff] %v1976_v63  ;;  %v1968_v3 = vadd.f32 %v4595_v2, %v1967_v42 }
 0x681   : > { %2068 = vst [vmem:[%s4598_s9 + $0x48] sm:$0xff] %v1968_v3 }
 0x688   : > { %v2306_v31 = vpop.f32.mrf.mxu1 }
 0x689   : > { %v1989_v16 = vadd.f32 %v2306_v31, %v4595_v2 }
 0x68a   : > { %v1980_v4 = vpop.f32.mrf.mxu1 }
 0x68b   : > { %2073 = vst [vmem:[%s4598_s9 + $0x70] sm:$0xff] %v1989_v16  ;;  %v1981_v51 = vadd.f32 %v4595_v2, %v1980_v4 }
 0x68c   : > { %v2307_v34 = vpop.f32.mrf.mxu1 }
 0x68d   : > { %2071 = vst [vmem:[%s4598_s9 + $0x60] sm:$0xff] %v1981_v51  ;;  %v1992_v20 = vadd.f32 %v2307_v34, %v4595_v2 }
 0x68e   : > { %v1983_v5 = vpop.f32.mrf.mxu1 }
 0x68f   : > { %2074 = vst [vmem:[%s4598_s9 + $0x78] sm:$0xff] %v1992_v20  ;;  %v1984_v54 = vadd.f32 %v4595_v2, %v1983_v5 }
 0x691   : > { %2072 = vst [vmem:[%s4598_s9 + $0x68] sm:$0xff] %v1984_v54 }
 0x698   : > { %v2310_v33 = vpop.f32.mrf.mxu1 }
 0x699   : > { %v2005_v38 = vadd.f32 %v2310_v33, %v4595_v2 }
 0x69a   : > { %v1996_v41 = vpop.f32.mrf.mxu1 }
 0x69b   : > { %2077 = vst [vmem:[%s4598_s9 + $0x90] sm:$0xff] %v2005_v38  ;;  %v1997_v29 = vadd.f32 %v4595_v2, %v1996_v41 }
 0x69c   : > { %v2311_v36 = vpop.f32.mrf.mxu1 }
 0x69d   : > { %2075 = vst [vmem:[%s4598_s9 + $0x80] sm:$0xff] %v1997_v29  ;;  %v2008_v9 = vadd.f32 %v2311_v36, %v4595_v2 }
 0x69e   : > { %v1999_v8 = vpop.f32.mrf.mxu1 }
 0x69f   : > { %2078 = vst [vmem:[%s4598_s9 + $0x98] sm:$0xff] %v2008_v9  ;;  %v2000_v50 = vadd.f32 %v4595_v2, %v1999_v8 }
 0x6a1   : > { %2076 = vst [vmem:[%s4598_s9 + $0x88] sm:$0xff] %v2000_v50 }
 0x6a8   : > { %v2314_v25 = vpop.f32.mrf.mxu1 }
 0x6a9   : > { %v2021_v59 = vadd.f32 %v2314_v25, %v4595_v2 }
 0x6aa   : > { %v2012_v60 = vpop.f32.mrf.mxu1 }
 0x6ab   : > { %2081 = vst [vmem:[%s4598_s9 + $0xb0] sm:$0xff] %v2021_v59  ;;  %v2013_v19 = vadd.f32 %v4595_v2, %v2012_v60 }
 0x6ac   : > { %v2315_v39 = vpop.f32.mrf.mxu1 }
 0x6ad   : > { %2079 = vst [vmem:[%s4598_s9 + $0xa0] sm:$0xff] %v2013_v19  ;;  %v2024_v30 = vadd.f32 %v2315_v39, %v4595_v2 }
 0x6ae   : > { %v2015_v40 = vpop.f32.mrf.mxu1 }
 0x6af   : > { %2082 = vst [vmem:[%s4598_s9 + $0xb8] sm:$0xff] %v2024_v30  ;;  %v2016_v52 = vadd.f32 %v4595_v2, %v2015_v40 }
 0x6b0   : > { %v2318_v62 = vpop.f32.mrf.mxu1 }
 0x6b1   : > { %2080 = vst [vmem:[%s4598_s9 + $0xa8] sm:$0xff] %v2016_v52  ;;  %v2037_v56 = vadd.f32 %v2318_v62, %v4595_v2 }
 0x6b2   : > { %v2028_v6 = vpop.f32.mrf.mxu1 }
 0x6b3   : > { %2085 = vst [vmem:[%s4598_s9 + $0xd0] sm:$0xff] %v2037_v56  ;;  %v2029_v10 = vadd.f32 %v4595_v2, %v2028_v6 }
 0x6b4   : > { %v2319_v32 = vpop.f32.mrf.mxu1 }
 0x6b5   : > { %2083 = vst [vmem:[%s4598_s9 + $0xc0] sm:$0xff] %v2029_v10  ;;  %v2040_v57 = vadd.f32 %v2319_v32, %v4595_v2 }
 0x6b6   : > { %v2031_v46 = vpop.f32.mrf.mxu1 }
 0x6b7   : > { %2086 = vst [vmem:[%s4598_s9 + $0xd8] sm:$0xff] %v2040_v57  ;;  %v2032_v21 = vadd.f32 %v4595_v2, %v2031_v46 }
 0x6b8   : > { %v2322_v35 = vpop.f32.mrf.mxu1 }
 0x6b9   : > { %2084 = vst [vmem:[%s4598_s9 + $0xc8] sm:$0xff] %v2032_v21  ;;  %v2053_v37 = vadd.f32 %v2322_v35, %v4595_v2 }
 0x6ba   : > { %v2044_v45 = vpop.f32.mrf.mxu1 }
 0x6bb   : > { %2089 = vst [vmem:[%s4598_s9 + $0xf0] sm:$0xff] %v2053_v37  ;;  %v2045_v55 = vadd.f32 %v4595_v2, %v2044_v45 }
 0x6bc   : > { %v2323_v47 = vpop.f32.mrf.mxu1 }
 0x6bd   : > { %2087 = vst [vmem:[%s4598_s9 + $0xe0] sm:$0xff] %v2045_v55  ;;  %v2056_v61 = vadd.f32 %v2323_v47, %v4595_v2 }
 0x6be   : > { %v2047_v44 = vpop.f32.mrf.mxu1 }
 0x6bf   : > { %2090 = vst [vmem:[%s4598_s9 + $0xf8] sm:$0xff] %v2056_v61  ;;  %v2048_v11 = vadd.f32 %v4595_v2, %v2047_v44 }
 0x6c1   : > { %2088 = vst [vmem:[%s4598_s9 + $0xe8] sm:$0xff] %v2048_v11 }
 0x6c2   : > { %2472 = shalt.err (!%p2469_p3)
}
 0x6c3   : > { %s2473_s26 = scalar_lea.hbm %s4665_s14, 4096  ;;  %s2477_s6 = scalar_lea.hbm %s4719_s5, 8192 }
 0x6c4   : > { %p2474_p4 = scmp.ne.s32.totalorder %s4665_s14, %s2473_s26  ;;  %p2478_p9 = scmp.lt.s32.totalorder %s4665_s14, %s4719_s5 }
 0x6c5   : > { %p2479_p10 = scmp.lt.s32.totalorder %s2477_s6, %s2473_s26 }
 0x6c6   : > { %p2475_p7 = pnand %p2474_p4, %p2594_p5 }
 0x6c7   : > { %p2480_p11 = por %p2479_p10, %p2478_p9 }
 0x6c8   : > { %p2476_p8 = pneg %p2475_p7 }
 0x6ca   : > { %p2481_p12 = pnand %p2480_p11, %p2476_p8 }
 0x6cc   : > { %2484 = shalt.err (!%p2481_p12)
}
 0x6cd   : > { %s2524_s9 = smov 128   ;;  %s2525_s10 = smov 8  }
 0x6ce   : > { %2348 = dma.vmem_to_hbm [thread:$0]  (%p2594_p5), %s4667_s11, 4096, %s4665_s14, %s4674_s22, %s2524_s9, %s2524_s9, %s2525_s10  }
 0x6cf PF: > { %p2354_p13 = scmp.ge.s32.totalorder %s2519_s21, 2  ;;  %s2120_s12 = sand.u32 1, %s2507_s18  }
 0x6d0   : > { %s2121_s13 = scalar_lea.sflag [#allocation3], %s2120_s12 }
 0x6d1   : > { %p2351_p0 = pnand %p2354_p13, %p2598_p6 }
 0x6d3   : > { %p2352_p1 = pneg %p2351_p0 }
 0x6d5   : > { %2502 = dma.done.wait (%p2352_p1), %s2121_s13, 4096  }
 0x6d6   : > { %2504 = vsyncadd (%p2352_p1), %s2121_s13, 4294963200  ;;  %p15_p2 = scmp.ge.s32.totalorder %s2581_s24, 4   ;;  %s5428_s18 = smov %s2511_s19 }
 0x6d7   : > { %s5429_s19 = smov %s2515_s20  ;;  %s5430_s20 = smov %s2592_s27 }
 0x6d8   : > { %s5431_s21 = smov %s2581_s24  ;;  %17 = sbr.rel (!%p15_p2) target bundleno = 3 (0x3), region = 75 }
 0x6dd   :  { %2126 = vsyncpa [#allocation3], 1 }
 0x6de   :  { %2128 = vsyncpa [#allocation3 + $0x1], 1 }

</bundles_post_ra>
